<compile_context>
chip_gen: v5e
topology: v5e:2x2
jax: 0.10.0
libtpu: 0.0.40
codegen_flags: <defaults>
</compile_context>

<pallas_src>
import math

import jax
import jax.numpy as jnp
import numpy as np
from jax import lax
from jax.experimental import pallas as pl
from jax.experimental.pallas import tpu as pltpu

# ----------------------------------------------------------------------------
# Hyper-params consistent with ECGTransformer.__init__ (small test config)
# ----------------------------------------------------------------------------
NUM_LEADS = 4          # conv in-channels
SIGNAL_LEN = 16        # sequence length L
NUM_CLASSES = 3
EMBED = 32             # embed_dim
HEADS = 4              # num_heads
FF_DIM = 64            # ff_dim
NUM_BLOCKS = 2         # num_transformer_blocks
HEAD_DIM = EMBED // HEADS
KSIZE = 5              # conv kernel size
PAD = 2                # conv padding
KC = KSIZE * NUM_LEADS # im2col contraction dim = 20
LN_EPS = 1e-5


def _layernorm(x, gamma, beta):
    """LayerNorm over last dim (biased variance, eps inside rsqrt) — PyTorch semantics."""
    mu = jnp.mean(x, axis=-1, keepdims=True)
    d = x - mu
    var = jnp.mean(d * d, axis=-1, keepdims=True)
    return d * lax.rsqrt(var + LN_EPS) * gamma + beta


# ----------------------------------------------------------------------------
# Fused kernel: conv-embed + pos, NUM_BLOCKS transformer blocks, classifier.
# One grid step processes bt batch elements (rows = bt * L activation matrix).
# ----------------------------------------------------------------------------
def ecg_fused_kernel(xcol_ref, posb_ref, hmask_ref, wconv_ref,
                     wq_ref, wk_ref, wv_ref, bq_ref, bk_ref, bv_ref,
                     wo_ref, bo_ref,
                     w1_ref, b1_ref, w2_ref, b2_ref,
                     g1_ref, be1_ref, g2_ref, be2_ref,
                     wcls_ref, bcls_ref, o_ref):
    bt = xcol_ref.shape[0]
    L = SIGNAL_LEN
    rows = bt * L

    # ---- Conv1d(k=5,pad=2) as one im2col matmul; conv bias + pos pre-folded -
    xcol = xcol_ref[...].reshape(rows, KC)                        # (rows, 20)
    y = jnp.dot(xcol, wconv_ref[...], preferred_element_type=jnp.float32)
    y = (y.reshape(bt, L, EMBED) + posb_ref[...][None]).reshape(rows, EMBED)

    hmask = hmask_ref[...]            # (HEADS, 1, EMBED) disjoint 0/1 head masks

    # ---- Transformer blocks (static unroll; weights resident in VMEM) ------
    for blk in range(NUM_BLOCKS):
        # Separate Q/K/V projections: lane-aligned outputs, no column slicing.
        # 1/sqrt(head_dim) is pre-folded into wq/bq.
        q = jnp.dot(y, wq_ref[blk], preferred_element_type=jnp.float32) + bq_ref[blk]
        k = jnp.dot(y, wk_ref[blk], preferred_element_type=jnp.float32) + bk_ref[blk]
        v = jnp.dot(y, wv_ref[blk], preferred_element_type=jnp.float32) + bv_ref[blk]

        q3 = q.reshape(bt, L, EMBED)
        k3 = k.reshape(bt, L, EMBED)
        v3 = v.reshape(bt, L, EMBED)

        # Block-diagonal head expansion on Q:
        #   qblk[b, h*L+i, e] = q[b, i, e] * mask_h[e]
        # so one batched matmul against K gives per-head scores for all (b, h).
        qblk = (q3[:, None, :, :] * hmask[None]).reshape(bt, HEADS * L, EMBED)

        s = jnp.einsum('bre,bje->brj', qblk, k3,
                       preferred_element_type=jnp.float32)        # (bt, H*L, L)
        s = s - jnp.max(s, axis=-1, keepdims=True)
        p = jnp.exp(s)
        p = p / jnp.sum(p, axis=-1, keepdims=True)                # one softmax pass

        ctx_blk = jnp.einsum('brj,bje->bre', p, v3,
                             preferred_element_type=jnp.float32)  # (bt, H*L, E)

        # Re-assemble heads: masks are disjoint, so a masked sum over the head
        # axis reproduces the standard head-concat context without any
        # lane-axis concatenates; then one fused output projection.
        ctx = jnp.sum(ctx_blk.reshape(bt, HEADS, L, EMBED) * hmask[None],
                      axis=1).reshape(rows, EMBED)
        attn = jnp.dot(ctx, wo_ref[blk],
                       preferred_element_type=jnp.float32) + bo_ref[blk]

        y = _layernorm(y + attn, g1_ref[blk], be1_ref[blk])                   # LN1
        hdn = jnp.maximum(
            jnp.dot(y, w1_ref[blk], preferred_element_type=jnp.float32) + b1_ref[blk],
            0.0)
        ffn = jnp.dot(hdn, w2_ref[blk],
                      preferred_element_type=jnp.float32) + b2_ref[blk]
        y = _layernorm(y + ffn, g2_ref[blk], be2_ref[blk])                    # LN2

    # ---- Classifier: Linear(E*L -> NC) as per-class Frobenius contraction --
    y3 = y.reshape(bt, L, EMBED)
    cols = []
    for c in range(NUM_CLASSES):
        pc = jnp.sum(y3 * wcls_ref[c], axis=-1, keepdims=True)    # (bt, L, 1)
        cols.append(jnp.sum(pc, axis=1))                          # (bt, 1)
    o_ref[0] = jnp.concatenate(cols, axis=-1) + bcls_ref[...]     # single store


# ----------------------------------------------------------------------------
# Wrapper
# ----------------------------------------------------------------------------
_BT_MAX = 64   # rows = 1024 per step; VMEM footprint still < 2 MiB


def _choose_tiling(batch):
    """Return (batch_tile, grid_steps).

    - Small batches (<4): a single grid step (single-TC v5e/v6e pay no extra
      per-step overhead; splitting tiny work would just add it).
    - batch >= 4: at least 2 "parallel" grid steps so dual-TC v7x uses both
      TensorCores; more steps only if the per-step tile would exceed _BT_MAX.
    Odd batches are padded up to bt * g by the caller.
    """
    if batch < 4:
        return batch, 1
    g = max(2, -(-batch // _BT_MAX))
    bt = -(-batch // g)
    return bt, g


def _full_spec(arr):
    rank = arr.ndim
    return pl.BlockSpec(arr.shape, lambda i, _r=rank: (0,) * _r)


@jax.jit
def ecg_transformer_forward(x_bcl, kp):
    """x_bcl: (B, num_leads, signal_length) float32 — same layout as PyTorch input."""
    B = x_bcl.shape[0]
    bt, g = _choose_tiling(B)
    B_pad = bt * g

    # Channels-last, batch-pad, and im2col (layout plumbing only; conv math is in-kernel).
    x_blc = jnp.transpose(x_bcl, (0, 2, 1)).astype(jnp.float32)              # (B, L, C)
    xpad = jnp.pad(x_blc, ((0, B_pad - B), (PAD, PAD), (0, 0)))              # (B_pad, L+4, C)
    xcol = jnp.concatenate([xpad[:, kk:kk + SIGNAL_LEN, :] for kk in range(KSIZE)],
                           axis=-1)                                          # (B_pad, L, K*C)

    weights = [kp["pos_bias"], kp["hmask"], kp["conv_w"],
               kp["wq"], kp["wk"], kp["wv"], kp["bq"], kp["bk"], kp["bv"],
               kp["wo"], kp["bo"],
               kp["w1"], kp["b1"], kp["w2"], kp["b2"],
               kp["g1"], kp["be1"], kp["g2"], kp["be2"],
               kp["cls_w"], kp["cls_b"]]

    in_specs = [pl.BlockSpec((bt, SIGNAL_LEN, KC), lambda i: (i, 0, 0))]
    in_specs += [_full_spec(w) for w in weights]

    out = pl.pallas_call(
        ecg_fused_kernel,
        out_shape=jax.ShapeDtypeStruct((g, bt, NUM_CLASSES), jnp.float32),
        grid=(g,),
        in_specs=in_specs,
        out_specs=pl.BlockSpec((1, bt, NUM_CLASSES), lambda i: (i, 0, 0)),
        compiler_params=pltpu.CompilerParams(dimension_semantics=("parallel",)),
    )(xcol, *weights)

    return out.reshape(B_pad, NUM_CLASSES)[:B]


# ----------------------------------------------------------------------------
# Deterministic synthetic parameters in native PyTorch layouts
# ----------------------------------------------------------------------------
def init_torch_params(key):
    keys = iter(jax.random.split(key, 64))

    def nrm(shape, scale=0.08):
        return (scale * jax.random.normal(next(keys), shape)).astype(jnp.float32)

    tp = dict(
        conv_w=nrm((EMBED, NUM_LEADS, KSIZE), 0.1),       # Conv1d.weight (E, C, K)
        conv_b=nrm((EMBED,), 0.1),
        pos=nrm((1, SIGNAL_LEN, EMBED), 0.1),
        cls_w=nrm((NUM_CLASSES, EMBED * SIGNAL_LEN), 0.05),
        cls_b=nrm((NUM_CLASSES,), 0.05),
        blocks=[],
    )
    for _ in range(NUM_BLOCKS):
        tp["blocks"].append(dict(
            in_proj_w=nrm((3 * EMBED, EMBED)),            # MHA in_proj_weight
            in_proj_b=nrm((3 * EMBED,), 0.05),
            out_proj_w=nrm((EMBED, EMBED)),
            out_proj_b=nrm((EMBED,), 0.05),
            w1=nrm((FF_DIM, EMBED)), b1=nrm((FF_DIM,), 0.05),
            w2=nrm((EMBED, FF_DIM)), b2=nrm((EMBED,), 0.05),
            ln1_g=1.0 + nrm((EMBED,), 0.05), ln1_b=nrm((EMBED,), 0.05),
            ln2_g=1.0 + nrm((EMBED,), 0.05), ln2_b=nrm((EMBED,), 0.05),
        ))
    return tp


def to_kernel_params(tp):
    """PyTorch layouts -> kernel layouts (stacked per-block, transposed, pre-folded)."""
    scale = 1.0 / math.sqrt(HEAD_DIM)

    def stack(fn):
        return jnp.stack([fn(b) for b in tp["blocks"]], axis=0)

    # Disjoint head-column masks: mask[h, 0, e] = 1 iff e belongs to head h.
    cols = np.arange(EMBED)
    hmask = (cols[None, :] // HEAD_DIM == np.arange(HEADS)[:, None]).astype(np.float32)

    return dict(
        # im2col conv weight: (K*C, E), row index = k*C + c
        conv_w=jnp.transpose(tp["conv_w"], (2, 1, 0)).reshape(KC, EMBED),
        # conv bias + positional embedding pre-folded into one (L, E) table
        pos_bias=tp["conv_b"][None, :] + tp["pos"][0],
        hmask=jnp.asarray(hmask).reshape(HEADS, 1, EMBED),
        # separate Q/K/V weights (1/sqrt(hd) folded into q), each (NB, E, E)
        wq=stack(lambda b: b["in_proj_w"][:EMBED].T * scale),
        wk=stack(lambda b: b["in_proj_w"][EMBED:2 * EMBED].T),
        wv=stack(lambda b: b["in_proj_w"][2 * EMBED:].T),
        bq=stack(lambda b: (b["in_proj_b"][:EMBED] * scale).reshape(1, EMBED)),
        bk=stack(lambda b: b["in_proj_b"][EMBED:2 * EMBED].reshape(1, EMBED)),
        bv=stack(lambda b: b["in_proj_b"][2 * EMBED:].reshape(1, EMBED)),
        wo=stack(lambda b: b["out_proj_w"].T),                      # (NB, E, E)
        bo=stack(lambda b: b["out_proj_b"].reshape(1, EMBED)),
        w1=stack(lambda b: b["w1"].T),                              # (NB, E, FF)
        b1=stack(lambda b: b["b1"].reshape(1, FF_DIM)),
        w2=stack(lambda b: b["w2"].T),                              # (NB, FF, E)
        b2=stack(lambda b: b["b2"].reshape(1, EMBED)),
        g1=stack(lambda b: b["ln1_g"].reshape(1, EMBED)),
        be1=stack(lambda b: b["ln1_b"].reshape(1, EMBED)),
        g2=stack(lambda b: b["ln2_g"].reshape(1, EMBED)),
        be2=stack(lambda b: b["ln2_b"].reshape(1, EMBED)),
        # classifier weight reshaped to (NC, L, E): flatten order l*E + e
        cls_w=tp["cls_w"].reshape(NUM_CLASSES, SIGNAL_LEN, EMBED),
        cls_b=tp["cls_b"].reshape(1, NUM_CLASSES),
    )


# ----------------------------------------------------------------------------
# Pure-JAX reference built directly from PyTorch-layout weights
# (faithful to Conv1d / nn.MultiheadAttention / LayerNorm / Linear semantics,
#  so layout mistakes in to_kernel_params would be caught).
# ----------------------------------------------------------------------------
def reference_forward(x_bcl, tp):
    x = x_bcl.astype(jnp.float32)
    B = x.shape[0]
    xpad = jnp.pad(x, ((0, 0), (0, 0), (PAD, PAD)))                          # (B, C, L+4)
    y = sum(jnp.einsum('bcl,ec->bel', xpad[:, :, k:k + SIGNAL_LEN], tp["conv_w"][:, :, k])
            for k in range(KSIZE)) + tp["conv_b"][None, :, None]             # (B, E, L)
    y = jnp.transpose(y, (0, 2, 1)) + tp["pos"]                              # (B, L, E)

    scale = 1.0 / math.sqrt(HEAD_DIM)
    for blk in tp["blocks"]:
        qkv = y @ blk["in_proj_w"].T + blk["in_proj_b"]
        q, k, v = jnp.split(qkv, 3, axis=-1)
        q = q * scale

        def split_heads(t):
            return t.reshape(B, SIGNAL_LEN, HEADS, HEAD_DIM).transpose(0, 2, 1, 3)

        qh, kh, vh = split_heads(q), split_heads(k), split_heads(v)
        s = jnp.einsum('bhld,bhmd->bhlm', qh, kh)
        p = jax.nn.softmax(s, axis=-1)
        ctx = jnp.einsum('bhlm,bhmd->bhld', p, vh)
        ctx = ctx.transpose(0, 2, 1, 3).reshape(B, SIGNAL_LEN, EMBED)
        attn = ctx @ blk["out_proj_w"].T + blk["out_proj_b"]
        y = _layernorm(y + attn, blk["ln1_g"], blk["ln1_b"])
        ffn = jnp.maximum(y @ blk["w1"].T + blk["b1"], 0.0) @ blk["w2"].T + blk["b2"]
        y = _layernorm(y + ffn, blk["ln2_g"], blk["ln2_b"])

    flat = y.reshape(B, SIGNAL_LEN * EMBED)
    return flat @ tp["cls_w"].T + tp["cls_b"]


if __name__ == "__main__":
    root = jax.random.PRNGKey(0)
    pkey, xkey = jax.random.split(root)
    tp = init_torch_params(pkey)
    kp = to_kernel_params(tp)

    B = 2
    x = jax.random.normal(xkey, (B, NUM_LEADS, SIGNAL_LEN), dtype=jnp.float32)

    out = ecg_transformer_forward(x, kp)
    out = jax.block_until_ready(out)
    assert out.shape == (B, NUM_CLASSES)

    ref = reference_forward(x, tp)
    np.testing.assert_allclose(np.asarray(out), np.asarray(ref), rtol=1e-4, atol=1e-4)

    print("KERNEL_OK")
</pallas_src>

<mosaic_0001>
module attributes {stable_mosaic.version = 11 : i64} {
  func.func @ecg_fused_kernel(%arg0: i32, %arg1: memref<2x16x20xf32, #tpu.memory_space<vmem>>, %arg2: memref<16x32xf32, #tpu.memory_space<vmem>>, %arg3: memref<4x1x32xf32, #tpu.memory_space<vmem>>, %arg4: memref<20x32xf32, #tpu.memory_space<vmem>>, %arg5: memref<2x32x32xf32, #tpu.memory_space<vmem>>, %arg6: memref<2x32x32xf32, #tpu.memory_space<vmem>>, %arg7: memref<2x32x32xf32, #tpu.memory_space<vmem>>, %arg8: memref<2x1x32xf32, #tpu.memory_space<vmem>>, %arg9: memref<2x1x32xf32, #tpu.memory_space<vmem>>, %arg10: memref<2x1x32xf32, #tpu.memory_space<vmem>>, %arg11: memref<2x32x32xf32, #tpu.memory_space<vmem>>, %arg12: memref<2x1x32xf32, #tpu.memory_space<vmem>>, %arg13: memref<2x32x64xf32, #tpu.memory_space<vmem>>, %arg14: memref<2x1x64xf32, #tpu.memory_space<vmem>>, %arg15: memref<2x64x32xf32, #tpu.memory_space<vmem>>, %arg16: memref<2x1x32xf32, #tpu.memory_space<vmem>>, %arg17: memref<2x1x32xf32, #tpu.memory_space<vmem>>, %arg18: memref<2x1x32xf32, #tpu.memory_space<vmem>>, %arg19: memref<2x1x32xf32, #tpu.memory_space<vmem>>, %arg20: memref<2x1x32xf32, #tpu.memory_space<vmem>>, %arg21: memref<3x16x32xf32, #tpu.memory_space<vmem>>, %arg22: memref<1x3xf32, #tpu.memory_space<vmem>>, %arg23: memref<1x2x3xf32, #tpu.memory_space<vmem>>) attributes {dimension_semantics = [#tpu.dimension_semantics<parallel>], iteration_bounds = array<i64: 1>, scalar_prefetch = 0 : i64, scratch_operands = 0 : i64, tpu.core_type = #tpu.core_type<tc>, window_params = [{transform_indices = @transform_0, window_bounds = array<i64: 2, 16, 20>}, {pipeline_mode = #tpu.pipeline_mode<synchronous>, transform_indices = @transform_1, window_bounds = array<i64: 16, 32>}, {pipeline_mode = #tpu.pipeline_mode<synchronous>, transform_indices = @transform_2, window_bounds = array<i64: 4, 1, 32>}, {pipeline_mode = #tpu.pipeline_mode<synchronous>, transform_indices = @transform_3, window_bounds = array<i64: 20, 32>}, {pipeline_mode = #tpu.pipeline_mode<synchronous>, transform_indices = @transform_4, window_bounds = array<i64: 2, 32, 32>}, {pipeline_mode = #tpu.pipeline_mode<synchronous>, transform_indices = @transform_5, window_bounds = array<i64: 2, 32, 32>}, {pipeline_mode = #tpu.pipeline_mode<synchronous>, transform_indices = @transform_6, window_bounds = array<i64: 2, 32, 32>}, {pipeline_mode = #tpu.pipeline_mode<synchronous>, transform_indices = @transform_7, window_bounds = array<i64: 2, 1, 32>}, {pipeline_mode = #tpu.pipeline_mode<synchronous>, transform_indices = @transform_8, window_bounds = array<i64: 2, 1, 32>}, {pipeline_mode = #tpu.pipeline_mode<synchronous>, transform_indices = @transform_9, window_bounds = array<i64: 2, 1, 32>}, {pipeline_mode = #tpu.pipeline_mode<synchronous>, transform_indices = @transform_10, window_bounds = array<i64: 2, 32, 32>}, {pipeline_mode = #tpu.pipeline_mode<synchronous>, transform_indices = @transform_11, window_bounds = array<i64: 2, 1, 32>}, {pipeline_mode = #tpu.pipeline_mode<synchronous>, transform_indices = @transform_12, window_bounds = array<i64: 2, 32, 64>}, {pipeline_mode = #tpu.pipeline_mode<synchronous>, transform_indices = @transform_13, window_bounds = array<i64: 2, 1, 64>}, {pipeline_mode = #tpu.pipeline_mode<synchronous>, transform_indices = @transform_14, window_bounds = array<i64: 2, 64, 32>}, {pipeline_mode = #tpu.pipeline_mode<synchronous>, transform_indices = @transform_15, window_bounds = array<i64: 2, 1, 32>}, {pipeline_mode = #tpu.pipeline_mode<synchronous>, transform_indices = @transform_16, window_bounds = array<i64: 2, 1, 32>}, {pipeline_mode = #tpu.pipeline_mode<synchronous>, transform_indices = @transform_17, window_bounds = array<i64: 2, 1, 32>}, {pipeline_mode = #tpu.pipeline_mode<synchronous>, transform_indices = @transform_18, window_bounds = array<i64: 2, 1, 32>}, {pipeline_mode = #tpu.pipeline_mode<synchronous>, transform_indices = @transform_19, window_bounds = array<i64: 2, 1, 32>}, {pipeline_mode = #tpu.pipeline_mode<synchronous>, transform_indices = @transform_20, window_bounds = array<i64: 3, 16, 32>}, {pipeline_mode = #tpu.pipeline_mode<synchronous>, transform_indices = @transform_21, window_bounds = array<i64: 1, 3>}, {transform_indices = @transform_22, window_bounds = array<i64: 1, 2, 3>}]} {
    %c0 = arith.constant 0 : index
    %c0_0 = arith.constant 0 : index
    %c0_1 = arith.constant 0 : index
    %0 = vector.load %arg1[%c0, %c0_0, %c0_1] : memref<2x16x20xf32, #tpu.memory_space<vmem>>, vector<2x16x20xf32>
    %1 = vector.shape_cast %0 : vector<2x16x20xf32> to vector<32x20xf32>
    %c0_2 = arith.constant 0 : index
    %c0_3 = arith.constant 0 : index
    %2 = vector.load %arg4[%c0_2, %c0_3] : memref<20x32xf32, #tpu.memory_space<vmem>>, vector<20x32xf32>
    %cst = arith.constant dense<0.000000e+00> : vector<32x32xf32>
    %3 = tpu.matmul %1, %2, %cst {dimension_numbers = #tpu.dot_dimension_numbers<[1], [0], [0], [1], [0, 0, 1, 1], [], []>} : vector<32x20xf32>, vector<20x32xf32>, vector<32x32xf32> -> vector<32x32xf32>
    %4 = vector.shape_cast %3 : vector<32x32xf32> to vector<2x16x32xf32>
    %c0_4 = arith.constant 0 : index
    %c0_5 = arith.constant 0 : index
    %5 = vector.load %arg2[%c0_4, %c0_5] : memref<16x32xf32, #tpu.memory_space<vmem>>, vector<16x32xf32>
    %6 = vector.shape_cast %5 : vector<16x32xf32> to vector<1x16x32xf32>
    %7 = vector.broadcast %6 : vector<1x16x32xf32> to vector<2x16x32xf32>
    %8 = arith.addf %4, %7 : vector<2x16x32xf32>
    %9 = vector.shape_cast %8 : vector<2x16x32xf32> to vector<32x32xf32>
    %c0_6 = arith.constant 0 : index
    %c0_7 = arith.constant 0 : index
    %c0_8 = arith.constant 0 : index
    %10 = vector.load %arg3[%c0_6, %c0_7, %c0_8] : memref<4x1x32xf32, #tpu.memory_space<vmem>>, vector<4x1x32xf32>
    %c0_9 = arith.constant 0 : index
    %c0_10 = arith.constant 0 : index
    %c0_11 = arith.constant 0 : index
    %11 = vector.load %arg5[%c0_9, %c0_10, %c0_11] : memref<2x32x32xf32, #tpu.memory_space<vmem>>, vector<1x32x32xf32>
    %12 = vector.shape_cast %11 : vector<1x32x32xf32> to vector<32x32xf32>
    %cst_12 = arith.constant dense<0.000000e+00> : vector<32x32xf32>
    %13 = tpu.matmul %9, %12, %cst_12 {dimension_numbers = #tpu.dot_dimension_numbers<[1], [0], [0], [1], [0, 0, 1, 1], [], []>} : vector<32x32xf32>, vector<32x32xf32>, vector<32x32xf32> -> vector<32x32xf32>
    %c0_13 = arith.constant 0 : index
    %c0_14 = arith.constant 0 : index
    %c0_15 = arith.constant 0 : index
    %14 = vector.load %arg8[%c0_13, %c0_14, %c0_15] : memref<2x1x32xf32, #tpu.memory_space<vmem>>, vector<1x1x32xf32>
    %15 = vector.shape_cast %14 : vector<1x1x32xf32> to vector<1x32xf32>
    %16 = vector.broadcast %15 : vector<1x32xf32> to vector<32x32xf32>
    %17 = arith.addf %13, %16 : vector<32x32xf32>
    %c0_16 = arith.constant 0 : index
    %c0_17 = arith.constant 0 : index
    %c0_18 = arith.constant 0 : index
    %18 = vector.load %arg6[%c0_16, %c0_17, %c0_18] : memref<2x32x32xf32, #tpu.memory_space<vmem>>, vector<1x32x32xf32>
    %19 = vector.shape_cast %18 : vector<1x32x32xf32> to vector<32x32xf32>
    %cst_19 = arith.constant dense<0.000000e+00> : vector<32x32xf32>
    %20 = tpu.matmul %9, %19, %cst_19 {dimension_numbers = #tpu.dot_dimension_numbers<[1], [0], [0], [1], [0, 0, 1, 1], [], []>} : vector<32x32xf32>, vector<32x32xf32>, vector<32x32xf32> -> vector<32x32xf32>
    %c0_20 = arith.constant 0 : index
    %c0_21 = arith.constant 0 : index
    %c0_22 = arith.constant 0 : index
    %21 = vector.load %arg9[%c0_20, %c0_21, %c0_22] : memref<2x1x32xf32, #tpu.memory_space<vmem>>, vector<1x1x32xf32>
    %22 = vector.shape_cast %21 : vector<1x1x32xf32> to vector<1x32xf32>
    %23 = vector.broadcast %22 : vector<1x32xf32> to vector<32x32xf32>
    %24 = arith.addf %20, %23 : vector<32x32xf32>
    %c0_23 = arith.constant 0 : index
    %c0_24 = arith.constant 0 : index
    %c0_25 = arith.constant 0 : index
    %25 = vector.load %arg7[%c0_23, %c0_24, %c0_25] : memref<2x32x32xf32, #tpu.memory_space<vmem>>, vector<1x32x32xf32>
    %26 = vector.shape_cast %25 : vector<1x32x32xf32> to vector<32x32xf32>
    %cst_26 = arith.constant dense<0.000000e+00> : vector<32x32xf32>
    %27 = tpu.matmul %9, %26, %cst_26 {dimension_numbers = #tpu.dot_dimension_numbers<[1], [0], [0], [1], [0, 0, 1, 1], [], []>} : vector<32x32xf32>, vector<32x32xf32>, vector<32x32xf32> -> vector<32x32xf32>
    %c0_27 = arith.constant 0 : index
    %c0_28 = arith.constant 0 : index
    %c0_29 = arith.constant 0 : index
    %28 = vector.load %arg10[%c0_27, %c0_28, %c0_29] : memref<2x1x32xf32, #tpu.memory_space<vmem>>, vector<1x1x32xf32>
    %29 = vector.shape_cast %28 : vector<1x1x32xf32> to vector<1x32xf32>
    %30 = vector.broadcast %29 : vector<1x32xf32> to vector<32x32xf32>
    %31 = arith.addf %27, %30 : vector<32x32xf32>
    %32 = vector.shape_cast %17 : vector<32x32xf32> to vector<2x16x32xf32>
    %33 = vector.shape_cast %24 : vector<32x32xf32> to vector<2x16x32xf32>
    %34 = vector.shape_cast %31 : vector<32x32xf32> to vector<2x16x32xf32>
    %35 = vector.shape_cast %32 : vector<2x16x32xf32> to vector<2x1x16x32xf32>
    %36 = vector.shape_cast %10 : vector<4x1x32xf32> to vector<1x4x1x32xf32>
    %37 = vector.broadcast %35 : vector<2x1x16x32xf32> to vector<2x4x16x32xf32>
    %38 = vector.broadcast %36 : vector<1x4x1x32xf32> to vector<2x4x16x32xf32>
    %39 = arith.mulf %37, %38 : vector<2x4x16x32xf32>
    %40 = vector.shape_cast %39 : vector<2x4x16x32xf32> to vector<2x64x32xf32>
    "tpu.trace_start"() <{level = 10 : i32, message = "bre,bje->brj"}> : () -> ()
    %cst_30 = arith.constant dense<0.000000e+00> : vector<2x64x16xf32>
    %41 = tpu.matmul %40, %33, %cst_30 {dimension_numbers = #tpu.dot_dimension_numbers<[2], [2], [1], [1], [0, 0, 0, 1, 1, 1], [0], [0]>} : vector<2x64x32xf32>, vector<2x16x32xf32>, vector<2x64x16xf32> -> vector<2x64x16xf32>
    "tpu.trace_stop"() : () -> ()
    %cst_31 = arith.constant dense<0xFF800000> : vector<2x64xf32>
    %42 = vector.multi_reduction <maximumf>, %41, %cst_31 [2] : vector<2x64x16xf32> to vector<2x64xf32>
    %43 = vector.shape_cast %42 : vector<2x64xf32> to vector<2x64x1xf32>
    %44 = vector.broadcast %43 : vector<2x64x1xf32> to vector<2x64x16xf32>
    %45 = arith.subf %41, %44 : vector<2x64x16xf32>
    %46 = math.exp %45 : vector<2x64x16xf32>
    %cst_32 = arith.constant dense<0.000000e+00> : vector<2x64xf32>
    %47 = vector.multi_reduction <add>, %46, %cst_32 [2] : vector<2x64x16xf32> to vector<2x64xf32>
    %48 = vector.shape_cast %47 : vector<2x64xf32> to vector<2x64x1xf32>
    %49 = vector.broadcast %48 : vector<2x64x1xf32> to vector<2x64x16xf32>
    %50 = arith.divf %46, %49 : vector<2x64x16xf32>
    "tpu.trace_start"() <{level = 10 : i32, message = "brj,bje->bre"}> : () -> ()
    %cst_33 = arith.constant dense<0.000000e+00> : vector<2x64x32xf32>
    %51 = tpu.matmul %50, %34, %cst_33 {dimension_numbers = #tpu.dot_dimension_numbers<[2], [1], [1], [2], [0, 0, 0, 1, 1, 2], [0], [0]>} : vector<2x64x16xf32>, vector<2x16x32xf32>, vector<2x64x32xf32> -> vector<2x64x32xf32>
    "tpu.trace_stop"() : () -> ()
    %52 = vector.shape_cast %51 : vector<2x64x32xf32> to vector<2x4x16x32xf32>
    %53 = vector.shape_cast %10 : vector<4x1x32xf32> to vector<1x4x1x32xf32>
    %54 = vector.broadcast %53 : vector<1x4x1x32xf32> to vector<2x4x16x32xf32>
    %55 = arith.mulf %52, %54 : vector<2x4x16x32xf32>
    %cst_34 = arith.constant dense<0.000000e+00> : vector<2x16x32xf32>
    %56 = vector.multi_reduction <add>, %55, %cst_34 [1] : vector<2x4x16x32xf32> to vector<2x16x32xf32>
    %57 = vector.shape_cast %56 : vector<2x16x32xf32> to vector<32x32xf32>
    %c0_35 = arith.constant 0 : index
    %c0_36 = arith.constant 0 : index
    %c0_37 = arith.constant 0 : index
    %58 = vector.load %arg11[%c0_35, %c0_36, %c0_37] : memref<2x32x32xf32, #tpu.memory_space<vmem>>, vector<1x32x32xf32>
    %59 = vector.shape_cast %58 : vector<1x32x32xf32> to vector<32x32xf32>
    %cst_38 = arith.constant dense<0.000000e+00> : vector<32x32xf32>
    %60 = tpu.matmul %57, %59, %cst_38 {dimension_numbers = #tpu.dot_dimension_numbers<[1], [0], [0], [1], [0, 0, 1, 1], [], []>} : vector<32x32xf32>, vector<32x32xf32>, vector<32x32xf32> -> vector<32x32xf32>
    %c0_39 = arith.constant 0 : index
    %c0_40 = arith.constant 0 : index
    %c0_41 = arith.constant 0 : index
    %61 = vector.load %arg12[%c0_39, %c0_40, %c0_41] : memref<2x1x32xf32, #tpu.memory_space<vmem>>, vector<1x1x32xf32>
    %62 = vector.shape_cast %61 : vector<1x1x32xf32> to vector<1x32xf32>
    %63 = vector.broadcast %62 : vector<1x32xf32> to vector<32x32xf32>
    %64 = arith.addf %60, %63 : vector<32x32xf32>
    %65 = arith.addf %9, %64 : vector<32x32xf32>
    %c0_42 = arith.constant 0 : index
    %c0_43 = arith.constant 0 : index
    %c0_44 = arith.constant 0 : index
    %66 = vector.load %arg17[%c0_42, %c0_43, %c0_44] : memref<2x1x32xf32, #tpu.memory_space<vmem>>, vector<1x1x32xf32>
    %67 = vector.shape_cast %66 : vector<1x1x32xf32> to vector<1x32xf32>
    %c0_45 = arith.constant 0 : index
    %c0_46 = arith.constant 0 : index
    %c0_47 = arith.constant 0 : index
    %68 = vector.load %arg18[%c0_45, %c0_46, %c0_47] : memref<2x1x32xf32, #tpu.memory_space<vmem>>, vector<1x1x32xf32>
    %69 = vector.shape_cast %68 : vector<1x1x32xf32> to vector<1x32xf32>
    %cst_48 = arith.constant dense<0.000000e+00> : vector<32xf32>
    %70 = vector.multi_reduction <add>, %65, %cst_48 [1] : vector<32x32xf32> to vector<32xf32>
    %71 = vector.shape_cast %70 : vector<32xf32> to vector<32x1xf32>
    %cst_49 = arith.constant 3.200000e+01 : f32
    %72 = vector.broadcast %cst_49 : f32 to vector<32x1xf32>
    %73 = arith.divf %71, %72 : vector<32x1xf32>
    %74 = vector.broadcast %73 : vector<32x1xf32> to vector<32x32xf32>
    %75 = arith.subf %65, %74 : vector<32x32xf32>
    %76 = arith.mulf %75, %75 : vector<32x32xf32>
    %cst_50 = arith.constant dense<0.000000e+00> : vector<32xf32>
    %77 = vector.multi_reduction <add>, %76, %cst_50 [1] : vector<32x32xf32> to vector<32xf32>
    %78 = vector.shape_cast %77 : vector<32xf32> to vector<32x1xf32>
    %cst_51 = arith.constant 3.200000e+01 : f32
    %79 = vector.broadcast %cst_51 : f32 to vector<32x1xf32>
    %80 = arith.divf %78, %79 : vector<32x1xf32>
    %cst_52 = arith.constant 9.99999974E-6 : f32
    %81 = vector.broadcast %cst_52 : f32 to vector<32x1xf32>
    %82 = arith.addf %80, %81 : vector<32x1xf32>
    %83 = math.rsqrt %82 : vector<32x1xf32>
    %84 = vector.broadcast %83 : vector<32x1xf32> to vector<32x32xf32>
    %85 = arith.mulf %75, %84 : vector<32x32xf32>
    %86 = vector.broadcast %67 : vector<1x32xf32> to vector<32x32xf32>
    %87 = arith.mulf %85, %86 : vector<32x32xf32>
    %88 = vector.broadcast %69 : vector<1x32xf32> to vector<32x32xf32>
    %89 = arith.addf %87, %88 : vector<32x32xf32>
    %c0_53 = arith.constant 0 : index
    %c0_54 = arith.constant 0 : index
    %c0_55 = arith.constant 0 : index
    %90 = vector.load %arg13[%c0_53, %c0_54, %c0_55] : memref<2x32x64xf32, #tpu.memory_space<vmem>>, vector<1x32x64xf32>
    %91 = vector.shape_cast %90 : vector<1x32x64xf32> to vector<32x64xf32>
    %cst_56 = arith.constant dense<0.000000e+00> : vector<32x64xf32>
    %92 = tpu.matmul %89, %91, %cst_56 {dimension_numbers = #tpu.dot_dimension_numbers<[1], [0], [0], [1], [0, 0, 1, 1], [], []>} : vector<32x32xf32>, vector<32x64xf32>, vector<32x64xf32> -> vector<32x64xf32>
    %c0_57 = arith.constant 0 : index
    %c0_58 = arith.constant 0 : index
    %c0_59 = arith.constant 0 : index
    %93 = vector.load %arg14[%c0_57, %c0_58, %c0_59] : memref<2x1x64xf32, #tpu.memory_space<vmem>>, vector<1x1x64xf32>
    %94 = vector.shape_cast %93 : vector<1x1x64xf32> to vector<1x64xf32>
    %95 = vector.broadcast %94 : vector<1x64xf32> to vector<32x64xf32>
    %96 = arith.addf %92, %95 : vector<32x64xf32>
    %cst_60 = arith.constant 0.000000e+00 : f32
    %97 = vector.broadcast %cst_60 : f32 to vector<32x64xf32>
    %98 = arith.maximumf %96, %97 : vector<32x64xf32>
    %c0_61 = arith.constant 0 : index
    %c0_62 = arith.constant 0 : index
    %c0_63 = arith.constant 0 : index
    %99 = vector.load %arg15[%c0_61, %c0_62, %c0_63] : memref<2x64x32xf32, #tpu.memory_space<vmem>>, vector<1x64x32xf32>
    %100 = vector.shape_cast %99 : vector<1x64x32xf32> to vector<64x32xf32>
    %cst_64 = arith.constant dense<0.000000e+00> : vector<32x32xf32>
    %101 = tpu.matmul %98, %100, %cst_64 {dimension_numbers = #tpu.dot_dimension_numbers<[1], [0], [0], [1], [0, 0, 1, 1], [], []>} : vector<32x64xf32>, vector<64x32xf32>, vector<32x32xf32> -> vector<32x32xf32>
    %c0_65 = arith.constant 0 : index
    %c0_66 = arith.constant 0 : index
    %c0_67 = arith.constant 0 : index
    %102 = vector.load %arg16[%c0_65, %c0_66, %c0_67] : memref<2x1x32xf32, #tpu.memory_space<vmem>>, vector<1x1x32xf32>
    %103 = vector.shape_cast %102 : vector<1x1x32xf32> to vector<1x32xf32>
    %104 = vector.broadcast %103 : vector<1x32xf32> to vector<32x32xf32>
    %105 = arith.addf %101, %104 : vector<32x32xf32>
    %106 = arith.addf %89, %105 : vector<32x32xf32>
    %c0_68 = arith.constant 0 : index
    %c0_69 = arith.constant 0 : index
    %c0_70 = arith.constant 0 : index
    %107 = vector.load %arg19[%c0_68, %c0_69, %c0_70] : memref<2x1x32xf32, #tpu.memory_space<vmem>>, vector<1x1x32xf32>
    %108 = vector.shape_cast %107 : vector<1x1x32xf32> to vector<1x32xf32>
    %c0_71 = arith.constant 0 : index
    %c0_72 = arith.constant 0 : index
    %c0_73 = arith.constant 0 : index
    %109 = vector.load %arg20[%c0_71, %c0_72, %c0_73] : memref<2x1x32xf32, #tpu.memory_space<vmem>>, vector<1x1x32xf32>
    %110 = vector.shape_cast %109 : vector<1x1x32xf32> to vector<1x32xf32>
    %cst_74 = arith.constant dense<0.000000e+00> : vector<32xf32>
    %111 = vector.multi_reduction <add>, %106, %cst_74 [1] : vector<32x32xf32> to vector<32xf32>
    %112 = vector.shape_cast %111 : vector<32xf32> to vector<32x1xf32>
    %cst_75 = arith.constant 3.200000e+01 : f32
    %113 = vector.broadcast %cst_75 : f32 to vector<32x1xf32>
    %114 = arith.divf %112, %113 : vector<32x1xf32>
    %115 = vector.broadcast %114 : vector<32x1xf32> to vector<32x32xf32>
    %116 = arith.subf %106, %115 : vector<32x32xf32>
    %117 = arith.mulf %116, %116 : vector<32x32xf32>
    %cst_76 = arith.constant dense<0.000000e+00> : vector<32xf32>
    %118 = vector.multi_reduction <add>, %117, %cst_76 [1] : vector<32x32xf32> to vector<32xf32>
    %119 = vector.shape_cast %118 : vector<32xf32> to vector<32x1xf32>
    %cst_77 = arith.constant 3.200000e+01 : f32
    %120 = vector.broadcast %cst_77 : f32 to vector<32x1xf32>
    %121 = arith.divf %119, %120 : vector<32x1xf32>
    %cst_78 = arith.constant 9.99999974E-6 : f32
    %122 = vector.broadcast %cst_78 : f32 to vector<32x1xf32>
    %123 = arith.addf %121, %122 : vector<32x1xf32>
    %124 = math.rsqrt %123 : vector<32x1xf32>
    %125 = vector.broadcast %124 : vector<32x1xf32> to vector<32x32xf32>
    %126 = arith.mulf %116, %125 : vector<32x32xf32>
    %127 = vector.broadcast %108 : vector<1x32xf32> to vector<32x32xf32>
    %128 = arith.mulf %126, %127 : vector<32x32xf32>
    %129 = vector.broadcast %110 : vector<1x32xf32> to vector<32x32xf32>
    %130 = arith.addf %128, %129 : vector<32x32xf32>
    %c1 = arith.constant 1 : index
    %c0_79 = arith.constant 0 : index
    %c0_80 = arith.constant 0 : index
    %131 = vector.load %arg5[%c1, %c0_79, %c0_80] : memref<2x32x32xf32, #tpu.memory_space<vmem>>, vector<1x32x32xf32>
    %132 = vector.shape_cast %131 : vector<1x32x32xf32> to vector<32x32xf32>
    %cst_81 = arith.constant dense<0.000000e+00> : vector<32x32xf32>
    %133 = tpu.matmul %130, %132, %cst_81 {dimension_numbers = #tpu.dot_dimension_numbers<[1], [0], [0], [1], [0, 0, 1, 1], [], []>} : vector<32x32xf32>, vector<32x32xf32>, vector<32x32xf32> -> vector<32x32xf32>
    %c1_82 = arith.constant 1 : index
    %c0_83 = arith.constant 0 : index
    %c0_84 = arith.constant 0 : index
    %134 = vector.load %arg8[%c1_82, %c0_83, %c0_84] : memref<2x1x32xf32, #tpu.memory_space<vmem>>, vector<1x1x32xf32>
    %135 = vector.shape_cast %134 : vector<1x1x32xf32> to vector<1x32xf32>
    %136 = vector.broadcast %135 : vector<1x32xf32> to vector<32x32xf32>
    %137 = arith.addf %133, %136 : vector<32x32xf32>
    %c1_85 = arith.constant 1 : index
    %c0_86 = arith.constant 0 : index
    %c0_87 = arith.constant 0 : index
    %138 = vector.load %arg6[%c1_85, %c0_86, %c0_87] : memref<2x32x32xf32, #tpu.memory_space<vmem>>, vector<1x32x32xf32>
    %139 = vector.shape_cast %138 : vector<1x32x32xf32> to vector<32x32xf32>
    %cst_88 = arith.constant dense<0.000000e+00> : vector<32x32xf32>
    %140 = tpu.matmul %130, %139, %cst_88 {dimension_numbers = #tpu.dot_dimension_numbers<[1], [0], [0], [1], [0, 0, 1, 1], [], []>} : vector<32x32xf32>, vector<32x32xf32>, vector<32x32xf32> -> vector<32x32xf32>
    %c1_89 = arith.constant 1 : index
    %c0_90 = arith.constant 0 : index
    %c0_91 = arith.constant 0 : index
    %141 = vector.load %arg9[%c1_89, %c0_90, %c0_91] : memref<2x1x32xf32, #tpu.memory_space<vmem>>, vector<1x1x32xf32>
    %142 = vector.shape_cast %141 : vector<1x1x32xf32> to vector<1x32xf32>
    %143 = vector.broadcast %142 : vector<1x32xf32> to vector<32x32xf32>
    %144 = arith.addf %140, %143 : vector<32x32xf32>
    %c1_92 = arith.constant 1 : index
    %c0_93 = arith.constant 0 : index
    %c0_94 = arith.constant 0 : index
    %145 = vector.load %arg7[%c1_92, %c0_93, %c0_94] : memref<2x32x32xf32, #tpu.memory_space<vmem>>, vector<1x32x32xf32>
    %146 = vector.shape_cast %145 : vector<1x32x32xf32> to vector<32x32xf32>
    %cst_95 = arith.constant dense<0.000000e+00> : vector<32x32xf32>
    %147 = tpu.matmul %130, %146, %cst_95 {dimension_numbers = #tpu.dot_dimension_numbers<[1], [0], [0], [1], [0, 0, 1, 1], [], []>} : vector<32x32xf32>, vector<32x32xf32>, vector<32x32xf32> -> vector<32x32xf32>
    %c1_96 = arith.constant 1 : index
    %c0_97 = arith.constant 0 : index
    %c0_98 = arith.constant 0 : index
    %148 = vector.load %arg10[%c1_96, %c0_97, %c0_98] : memref<2x1x32xf32, #tpu.memory_space<vmem>>, vector<1x1x32xf32>
    %149 = vector.shape_cast %148 : vector<1x1x32xf32> to vector<1x32xf32>
    %150 = vector.broadcast %149 : vector<1x32xf32> to vector<32x32xf32>
    %151 = arith.addf %147, %150 : vector<32x32xf32>
    %152 = vector.shape_cast %137 : vector<32x32xf32> to vector<2x16x32xf32>
    %153 = vector.shape_cast %144 : vector<32x32xf32> to vector<2x16x32xf32>
    %154 = vector.shape_cast %151 : vector<32x32xf32> to vector<2x16x32xf32>
    %155 = vector.shape_cast %152 : vector<2x16x32xf32> to vector<2x1x16x32xf32>
    %156 = vector.shape_cast %10 : vector<4x1x32xf32> to vector<1x4x1x32xf32>
    %157 = vector.broadcast %155 : vector<2x1x16x32xf32> to vector<2x4x16x32xf32>
    %158 = vector.broadcast %156 : vector<1x4x1x32xf32> to vector<2x4x16x32xf32>
    %159 = arith.mulf %157, %158 : vector<2x4x16x32xf32>
    %160 = vector.shape_cast %159 : vector<2x4x16x32xf32> to vector<2x64x32xf32>
    "tpu.trace_start"() <{level = 10 : i32, message = "bre,bje->brj"}> : () -> ()
    %cst_99 = arith.constant dense<0.000000e+00> : vector<2x64x16xf32>
    %161 = tpu.matmul %160, %153, %cst_99 {dimension_numbers = #tpu.dot_dimension_numbers<[2], [2], [1], [1], [0, 0, 0, 1, 1, 1], [0], [0]>} : vector<2x64x32xf32>, vector<2x16x32xf32>, vector<2x64x16xf32> -> vector<2x64x16xf32>
    "tpu.trace_stop"() : () -> ()
    %cst_100 = arith.constant dense<0xFF800000> : vector<2x64xf32>
    %162 = vector.multi_reduction <maximumf>, %161, %cst_100 [2] : vector<2x64x16xf32> to vector<2x64xf32>
    %163 = vector.shape_cast %162 : vector<2x64xf32> to vector<2x64x1xf32>
    %164 = vector.broadcast %163 : vector<2x64x1xf32> to vector<2x64x16xf32>
    %165 = arith.subf %161, %164 : vector<2x64x16xf32>
    %166 = math.exp %165 : vector<2x64x16xf32>
    %cst_101 = arith.constant dense<0.000000e+00> : vector<2x64xf32>
    %167 = vector.multi_reduction <add>, %166, %cst_101 [2] : vector<2x64x16xf32> to vector<2x64xf32>
    %168 = vector.shape_cast %167 : vector<2x64xf32> to vector<2x64x1xf32>
    %169 = vector.broadcast %168 : vector<2x64x1xf32> to vector<2x64x16xf32>
    %170 = arith.divf %166, %169 : vector<2x64x16xf32>
    "tpu.trace_start"() <{level = 10 : i32, message = "brj,bje->bre"}> : () -> ()
    %cst_102 = arith.constant dense<0.000000e+00> : vector<2x64x32xf32>
    %171 = tpu.matmul %170, %154, %cst_102 {dimension_numbers = #tpu.dot_dimension_numbers<[2], [1], [1], [2], [0, 0, 0, 1, 1, 2], [0], [0]>} : vector<2x64x16xf32>, vector<2x16x32xf32>, vector<2x64x32xf32> -> vector<2x64x32xf32>
    "tpu.trace_stop"() : () -> ()
    %172 = vector.shape_cast %171 : vector<2x64x32xf32> to vector<2x4x16x32xf32>
    %173 = vector.shape_cast %10 : vector<4x1x32xf32> to vector<1x4x1x32xf32>
    %174 = vector.broadcast %173 : vector<1x4x1x32xf32> to vector<2x4x16x32xf32>
    %175 = arith.mulf %172, %174 : vector<2x4x16x32xf32>
    %cst_103 = arith.constant dense<0.000000e+00> : vector<2x16x32xf32>
    %176 = vector.multi_reduction <add>, %175, %cst_103 [1] : vector<2x4x16x32xf32> to vector<2x16x32xf32>
    %177 = vector.shape_cast %176 : vector<2x16x32xf32> to vector<32x32xf32>
    %c1_104 = arith.constant 1 : index
    %c0_105 = arith.constant 0 : index
    %c0_106 = arith.constant 0 : index
    %178 = vector.load %arg11[%c1_104, %c0_105, %c0_106] : memref<2x32x32xf32, #tpu.memory_space<vmem>>, vector<1x32x32xf32>
    %179 = vector.shape_cast %178 : vector<1x32x32xf32> to vector<32x32xf32>
    %cst_107 = arith.constant dense<0.000000e+00> : vector<32x32xf32>
    %180 = tpu.matmul %177, %179, %cst_107 {dimension_numbers = #tpu.dot_dimension_numbers<[1], [0], [0], [1], [0, 0, 1, 1], [], []>} : vector<32x32xf32>, vector<32x32xf32>, vector<32x32xf32> -> vector<32x32xf32>
    %c1_108 = arith.constant 1 : index
    %c0_109 = arith.constant 0 : index
    %c0_110 = arith.constant 0 : index
    %181 = vector.load %arg12[%c1_108, %c0_109, %c0_110] : memref<2x1x32xf32, #tpu.memory_space<vmem>>, vector<1x1x32xf32>
    %182 = vector.shape_cast %181 : vector<1x1x32xf32> to vector<1x32xf32>
    %183 = vector.broadcast %182 : vector<1x32xf32> to vector<32x32xf32>
    %184 = arith.addf %180, %183 : vector<32x32xf32>
    %185 = arith.addf %130, %184 : vector<32x32xf32>
    %c1_111 = arith.constant 1 : index
    %c0_112 = arith.constant 0 : index
    %c0_113 = arith.constant 0 : index
    %186 = vector.load %arg17[%c1_111, %c0_112, %c0_113] : memref<2x1x32xf32, #tpu.memory_space<vmem>>, vector<1x1x32xf32>
    %187 = vector.shape_cast %186 : vector<1x1x32xf32> to vector<1x32xf32>
    %c1_114 = arith.constant 1 : index
    %c0_115 = arith.constant 0 : index
    %c0_116 = arith.constant 0 : index
    %188 = vector.load %arg18[%c1_114, %c0_115, %c0_116] : memref<2x1x32xf32, #tpu.memory_space<vmem>>, vector<1x1x32xf32>
    %189 = vector.shape_cast %188 : vector<1x1x32xf32> to vector<1x32xf32>
    %cst_117 = arith.constant dense<0.000000e+00> : vector<32xf32>
    %190 = vector.multi_reduction <add>, %185, %cst_117 [1] : vector<32x32xf32> to vector<32xf32>
    %191 = vector.shape_cast %190 : vector<32xf32> to vector<32x1xf32>
    %cst_118 = arith.constant 3.200000e+01 : f32
    %192 = vector.broadcast %cst_118 : f32 to vector<32x1xf32>
    %193 = arith.divf %191, %192 : vector<32x1xf32>
    %194 = vector.broadcast %193 : vector<32x1xf32> to vector<32x32xf32>
    %195 = arith.subf %185, %194 : vector<32x32xf32>
    %196 = arith.mulf %195, %195 : vector<32x32xf32>
    %cst_119 = arith.constant dense<0.000000e+00> : vector<32xf32>
    %197 = vector.multi_reduction <add>, %196, %cst_119 [1] : vector<32x32xf32> to vector<32xf32>
    %198 = vector.shape_cast %197 : vector<32xf32> to vector<32x1xf32>
    %cst_120 = arith.constant 3.200000e+01 : f32
    %199 = vector.broadcast %cst_120 : f32 to vector<32x1xf32>
    %200 = arith.divf %198, %199 : vector<32x1xf32>
    %cst_121 = arith.constant 9.99999974E-6 : f32
    %201 = vector.broadcast %cst_121 : f32 to vector<32x1xf32>
    %202 = arith.addf %200, %201 : vector<32x1xf32>
    %203 = math.rsqrt %202 : vector<32x1xf32>
    %204 = vector.broadcast %203 : vector<32x1xf32> to vector<32x32xf32>
    %205 = arith.mulf %195, %204 : vector<32x32xf32>
    %206 = vector.broadcast %187 : vector<1x32xf32> to vector<32x32xf32>
    %207 = arith.mulf %205, %206 : vector<32x32xf32>
    %208 = vector.broadcast %189 : vector<1x32xf32> to vector<32x32xf32>
    %209 = arith.addf %207, %208 : vector<32x32xf32>
    %c1_122 = arith.constant 1 : index
    %c0_123 = arith.constant 0 : index
    %c0_124 = arith.constant 0 : index
    %210 = vector.load %arg13[%c1_122, %c0_123, %c0_124] : memref<2x32x64xf32, #tpu.memory_space<vmem>>, vector<1x32x64xf32>
    %211 = vector.shape_cast %210 : vector<1x32x64xf32> to vector<32x64xf32>
    %cst_125 = arith.constant dense<0.000000e+00> : vector<32x64xf32>
    %212 = tpu.matmul %209, %211, %cst_125 {dimension_numbers = #tpu.dot_dimension_numbers<[1], [0], [0], [1], [0, 0, 1, 1], [], []>} : vector<32x32xf32>, vector<32x64xf32>, vector<32x64xf32> -> vector<32x64xf32>
    %c1_126 = arith.constant 1 : index
    %c0_127 = arith.constant 0 : index
    %c0_128 = arith.constant 0 : index
    %213 = vector.load %arg14[%c1_126, %c0_127, %c0_128] : memref<2x1x64xf32, #tpu.memory_space<vmem>>, vector<1x1x64xf32>
    %214 = vector.shape_cast %213 : vector<1x1x64xf32> to vector<1x64xf32>
    %215 = vector.broadcast %214 : vector<1x64xf32> to vector<32x64xf32>
    %216 = arith.addf %212, %215 : vector<32x64xf32>
    %cst_129 = arith.constant 0.000000e+00 : f32
    %217 = vector.broadcast %cst_129 : f32 to vector<32x64xf32>
    %218 = arith.maximumf %216, %217 : vector<32x64xf32>
    %c1_130 = arith.constant 1 : index
    %c0_131 = arith.constant 0 : index
    %c0_132 = arith.constant 0 : index
    %219 = vector.load %arg15[%c1_130, %c0_131, %c0_132] : memref<2x64x32xf32, #tpu.memory_space<vmem>>, vector<1x64x32xf32>
    %220 = vector.shape_cast %219 : vector<1x64x32xf32> to vector<64x32xf32>
    %cst_133 = arith.constant dense<0.000000e+00> : vector<32x32xf32>
    %221 = tpu.matmul %218, %220, %cst_133 {dimension_numbers = #tpu.dot_dimension_numbers<[1], [0], [0], [1], [0, 0, 1, 1], [], []>} : vector<32x64xf32>, vector<64x32xf32>, vector<32x32xf32> -> vector<32x32xf32>
    %c1_134 = arith.constant 1 : index
    %c0_135 = arith.constant 0 : index
    %c0_136 = arith.constant 0 : index
    %222 = vector.load %arg16[%c1_134, %c0_135, %c0_136] : memref<2x1x32xf32, #tpu.memory_space<vmem>>, vector<1x1x32xf32>
    %223 = vector.shape_cast %222 : vector<1x1x32xf32> to vector<1x32xf32>
    %224 = vector.broadcast %223 : vector<1x32xf32> to vector<32x32xf32>
    %225 = arith.addf %221, %224 : vector<32x32xf32>
    %226 = arith.addf %209, %225 : vector<32x32xf32>
    %c1_137 = arith.constant 1 : index
    %c0_138 = arith.constant 0 : index
    %c0_139 = arith.constant 0 : index
    %227 = vector.load %arg19[%c1_137, %c0_138, %c0_139] : memref<2x1x32xf32, #tpu.memory_space<vmem>>, vector<1x1x32xf32>
    %228 = vector.shape_cast %227 : vector<1x1x32xf32> to vector<1x32xf32>
    %c1_140 = arith.constant 1 : index
    %c0_141 = arith.constant 0 : index
    %c0_142 = arith.constant 0 : index
    %229 = vector.load %arg20[%c1_140, %c0_141, %c0_142] : memref<2x1x32xf32, #tpu.memory_space<vmem>>, vector<1x1x32xf32>
    %230 = vector.shape_cast %229 : vector<1x1x32xf32> to vector<1x32xf32>
    %cst_143 = arith.constant dense<0.000000e+00> : vector<32xf32>
    %231 = vector.multi_reduction <add>, %226, %cst_143 [1] : vector<32x32xf32> to vector<32xf32>
    %232 = vector.shape_cast %231 : vector<32xf32> to vector<32x1xf32>
    %cst_144 = arith.constant 3.200000e+01 : f32
    %233 = vector.broadcast %cst_144 : f32 to vector<32x1xf32>
    %234 = arith.divf %232, %233 : vector<32x1xf32>
    %235 = vector.broadcast %234 : vector<32x1xf32> to vector<32x32xf32>
    %236 = arith.subf %226, %235 : vector<32x32xf32>
    %237 = arith.mulf %236, %236 : vector<32x32xf32>
    %cst_145 = arith.constant dense<0.000000e+00> : vector<32xf32>
    %238 = vector.multi_reduction <add>, %237, %cst_145 [1] : vector<32x32xf32> to vector<32xf32>
    %239 = vector.shape_cast %238 : vector<32xf32> to vector<32x1xf32>
    %cst_146 = arith.constant 3.200000e+01 : f32
    %240 = vector.broadcast %cst_146 : f32 to vector<32x1xf32>
    %241 = arith.divf %239, %240 : vector<32x1xf32>
    %cst_147 = arith.constant 9.99999974E-6 : f32
    %242 = vector.broadcast %cst_147 : f32 to vector<32x1xf32>
    %243 = arith.addf %241, %242 : vector<32x1xf32>
    %244 = math.rsqrt %243 : vector<32x1xf32>
    %245 = vector.broadcast %244 : vector<32x1xf32> to vector<32x32xf32>
    %246 = arith.mulf %236, %245 : vector<32x32xf32>
    %247 = vector.broadcast %228 : vector<1x32xf32> to vector<32x32xf32>
    %248 = arith.mulf %246, %247 : vector<32x32xf32>
    %249 = vector.broadcast %230 : vector<1x32xf32> to vector<32x32xf32>
    %250 = arith.addf %248, %249 : vector<32x32xf32>
    %251 = vector.shape_cast %250 : vector<32x32xf32> to vector<2x16x32xf32>
    %c0_148 = arith.constant 0 : index
    %c0_149 = arith.constant 0 : index
    %c0_150 = arith.constant 0 : index
    %252 = vector.load %arg21[%c0_148, %c0_149, %c0_150] : memref<3x16x32xf32, #tpu.memory_space<vmem>>, vector<1x16x32xf32>
    %253 = vector.shape_cast %252 : vector<1x16x32xf32> to vector<16x32xf32>
    %254 = vector.shape_cast %253 : vector<16x32xf32> to vector<1x16x32xf32>
    %255 = vector.broadcast %254 : vector<1x16x32xf32> to vector<2x16x32xf32>
    %256 = arith.mulf %251, %255 : vector<2x16x32xf32>
    %cst_151 = arith.constant dense<0.000000e+00> : vector<2x16xf32>
    %257 = vector.multi_reduction <add>, %256, %cst_151 [2] : vector<2x16x32xf32> to vector<2x16xf32>
    %258 = vector.shape_cast %257 : vector<2x16xf32> to vector<2x16x1xf32>
    %cst_152 = arith.constant dense<0.000000e+00> : vector<2x1xf32>
    %259 = vector.multi_reduction <add>, %258, %cst_152 [1] : vector<2x16x1xf32> to vector<2x1xf32>
    %c1_153 = arith.constant 1 : index
    %c0_154 = arith.constant 0 : index
    %c0_155 = arith.constant 0 : index
    %260 = vector.load %arg21[%c1_153, %c0_154, %c0_155] : memref<3x16x32xf32, #tpu.memory_space<vmem>>, vector<1x16x32xf32>
    %261 = vector.shape_cast %260 : vector<1x16x32xf32> to vector<16x32xf32>
    %262 = vector.shape_cast %261 : vector<16x32xf32> to vector<1x16x32xf32>
    %263 = vector.broadcast %262 : vector<1x16x32xf32> to vector<2x16x32xf32>
    %264 = arith.mulf %251, %263 : vector<2x16x32xf32>
    %cst_156 = arith.constant dense<0.000000e+00> : vector<2x16xf32>
    %265 = vector.multi_reduction <add>, %264, %cst_156 [2] : vector<2x16x32xf32> to vector<2x16xf32>
    %266 = vector.shape_cast %265 : vector<2x16xf32> to vector<2x16x1xf32>
    %cst_157 = arith.constant dense<0.000000e+00> : vector<2x1xf32>
    %267 = vector.multi_reduction <add>, %266, %cst_157 [1] : vector<2x16x1xf32> to vector<2x1xf32>
    %c2 = arith.constant 2 : index
    %c0_158 = arith.constant 0 : index
    %c0_159 = arith.constant 0 : index
    %268 = vector.load %arg21[%c2, %c0_158, %c0_159] : memref<3x16x32xf32, #tpu.memory_space<vmem>>, vector<1x16x32xf32>
    %269 = vector.shape_cast %268 : vector<1x16x32xf32> to vector<16x32xf32>
    %270 = vector.shape_cast %269 : vector<16x32xf32> to vector<1x16x32xf32>
    %271 = vector.broadcast %270 : vector<1x16x32xf32> to vector<2x16x32xf32>
    %272 = arith.mulf %251, %271 : vector<2x16x32xf32>
    %cst_160 = arith.constant dense<0.000000e+00> : vector<2x16xf32>
    %273 = vector.multi_reduction <add>, %272, %cst_160 [2] : vector<2x16x32xf32> to vector<2x16xf32>
    %274 = vector.shape_cast %273 : vector<2x16xf32> to vector<2x16x1xf32>
    %cst_161 = arith.constant dense<0.000000e+00> : vector<2x1xf32>
    %275 = vector.multi_reduction <add>, %274, %cst_161 [1] : vector<2x16x1xf32> to vector<2x1xf32>
    %276 = tpu.concatenate %259, %267, %275 in 1 : vector<2x1xf32>, vector<2x1xf32>, vector<2x1xf32> -> vector<2x3xf32>
    %c0_162 = arith.constant 0 : index
    %c0_163 = arith.constant 0 : index
    %277 = vector.load %arg22[%c0_162, %c0_163] : memref<1x3xf32, #tpu.memory_space<vmem>>, vector<1x3xf32>
    %278 = vector.broadcast %277 : vector<1x3xf32> to vector<2x3xf32>
    %279 = arith.addf %276, %278 : vector<2x3xf32>
    %c0_164 = arith.constant 0 : index
    %c0_165 = arith.constant 0 : index
    %c0_166 = arith.constant 0 : index
    %280 = vector.load %arg23[%c0_164, %c0_165, %c0_166] : memref<1x2x3xf32, #tpu.memory_space<vmem>>, vector<1x2x3xf32>
    %281 = vector.shape_cast %280 : vector<1x2x3xf32> to vector<2x3xf32>
    %282 = vector.shape_cast %279 : vector<2x3xf32> to vector<1x2x3xf32>
    tpu.vector_store %arg23[%c0_164, %c0_165, %c0_166], %282 {strides = array<i32>} : memref<1x2x3xf32, #tpu.memory_space<vmem>>, vector<1x2x3xf32>,
    return
  }
  func.func @transform_0(%arg0: i32) -> (i32, i32, i32) {
    %c0_i32 = arith.constant 0 : i32
    %c0_i32_0 = arith.constant 0 : i32
    %c0_i32_1 = arith.constant 0 : i32
    return %arg0, %c0_i32, %c0_i32_0 : i32, i32, i32
  }
  func.func @transform_1(%arg0: i32) -> (i32, i32) {
    %c0_i32 = arith.constant 0 : i32
    %c0_i32_0 = arith.constant 0 : i32
    %c0_i32_1 = arith.constant 0 : i32
    return %c0_i32, %c0_i32_0 : i32, i32
  }
  func.func @transform_2(%arg0: i32) -> (i32, i32, i32) {
    %c0_i32 = arith.constant 0 : i32
    %c0_i32_0 = arith.constant 0 : i32
    %c0_i32_1 = arith.constant 0 : i32
    %c0_i32_2 = arith.constant 0 : i32
    return %c0_i32, %c0_i32_0, %c0_i32_1 : i32, i32, i32
  }
  func.func @transform_3(%arg0: i32) -> (i32, i32) {
    %c0_i32 = arith.constant 0 : i32
    %c0_i32_0 = arith.constant 0 : i32
    %c0_i32_1 = arith.constant 0 : i32
    return %c0_i32, %c0_i32_0 : i32, i32
  }
  func.func @transform_4(%arg0: i32) -> (i32, i32, i32) {
    %c0_i32 = arith.constant 0 : i32
    %c0_i32_0 = arith.constant 0 : i32
    %c0_i32_1 = arith.constant 0 : i32
    %c0_i32_2 = arith.constant 0 : i32
    return %c0_i32, %c0_i32_0, %c0_i32_1 : i32, i32, i32
  }
  func.func @transform_5(%arg0: i32) -> (i32, i32, i32) {
    %c0_i32 = arith.constant 0 : i32
    %c0_i32_0 = arith.constant 0 : i32
    %c0_i32_1 = arith.constant 0 : i32
    %c0_i32_2 = arith.constant 0 : i32
    return %c0_i32, %c0_i32_0, %c0_i32_1 : i32, i32, i32
  }
  func.func @transform_6(%arg0: i32) -> (i32, i32, i32) {
    %c0_i32 = arith.constant 0 : i32
    %c0_i32_0 = arith.constant 0 : i32
    %c0_i32_1 = arith.constant 0 : i32
    %c0_i32_2 = arith.constant 0 : i32
    return %c0_i32, %c0_i32_0, %c0_i32_1 : i32, i32, i32
  }
  func.func @transform_7(%arg0: i32) -> (i32, i32, i32) {
    %c0_i32 = arith.constant 0 : i32
    %c0_i32_0 = arith.constant 0 : i32
    %c0_i32_1 = arith.constant 0 : i32
    %c0_i32_2 = arith.constant 0 : i32
    return %c0_i32, %c0_i32_0, %c0_i32_1 : i32, i32, i32
  }
  func.func @transform_8(%arg0: i32) -> (i32, i32, i32) {
    %c0_i32 = arith.constant 0 : i32
    %c0_i32_0 = arith.constant 0 : i32
    %c0_i32_1 = arith.constant 0 : i32
    %c0_i32_2 = arith.constant 0 : i32
    return %c0_i32, %c0_i32_0, %c0_i32_1 : i32, i32, i32
  }
  func.func @transform_9(%arg0: i32) -> (i32, i32, i32) {
    %c0_i32 = arith.constant 0 : i32
    %c0_i32_0 = arith.constant 0 : i32
    %c0_i32_1 = arith.constant 0 : i32
    %c0_i32_2 = arith.constant 0 : i32
    return %c0_i32, %c0_i32_0, %c0_i32_1 : i32, i32, i32
  }
  func.func @transform_10(%arg0: i32) -> (i32, i32, i32) {
    %c0_i32 = arith.constant 0 : i32
    %c0_i32_0 = arith.constant 0 : i32
    %c0_i32_1 = arith.constant 0 : i32
    %c0_i32_2 = arith.constant 0 : i32
    return %c0_i32, %c0_i32_0, %c0_i32_1 : i32, i32, i32
  }
  func.func @transform_11(%arg0: i32) -> (i32, i32, i32) {
    %c0_i32 = arith.constant 0 : i32
    %c0_i32_0 = arith.constant 0 : i32
    %c0_i32_1 = arith.constant 0 : i32
    %c0_i32_2 = arith.constant 0 : i32
    return %c0_i32, %c0_i32_0, %c0_i32_1 : i32, i32, i32
  }
  func.func @transform_12(%arg0: i32) -> (i32, i32, i32) {
    %c0_i32 = arith.constant 0 : i32
    %c0_i32_0 = arith.constant 0 : i32
    %c0_i32_1 = arith.constant 0 : i32
    %c0_i32_2 = arith.constant 0 : i32
    return %c0_i32, %c0_i32_0, %c0_i32_1 : i32, i32, i32
  }
  func.func @transform_13(%arg0: i32) -> (i32, i32, i32) {
    %c0_i32 = arith.constant 0 : i32
    %c0_i32_0 = arith.constant 0 : i32
    %c0_i32_1 = arith.constant 0 : i32
    %c0_i32_2 = arith.constant 0 : i32
    return %c0_i32, %c0_i32_0, %c0_i32_1 : i32, i32, i32
  }
  func.func @transform_14(%arg0: i32) -> (i32, i32, i32) {
    %c0_i32 = arith.constant 0 : i32
    %c0_i32_0 = arith.constant 0 : i32
    %c0_i32_1 = arith.constant 0 : i32
    %c0_i32_2 = arith.constant 0 : i32
    return %c0_i32, %c0_i32_0, %c0_i32_1 : i32, i32, i32
  }
  func.func @transform_15(%arg0: i32) -> (i32, i32, i32) {
    %c0_i32 = arith.constant 0 : i32
    %c0_i32_0 = arith.constant 0 : i32
    %c0_i32_1 = arith.constant 0 : i32
    %c0_i32_2 = arith.constant 0 : i32
    return %c0_i32, %c0_i32_0, %c0_i32_1 : i32, i32, i32
  }
  func.func @transform_16(%arg0: i32) -> (i32, i32, i32) {
    %c0_i32 = arith.constant 0 : i32
    %c0_i32_0 = arith.constant 0 : i32
    %c0_i32_1 = arith.constant 0 : i32
    %c0_i32_2 = arith.constant 0 : i32
    return %c0_i32, %c0_i32_0, %c0_i32_1 : i32, i32, i32
  }
  func.func @transform_17(%arg0: i32) -> (i32, i32, i32) {
    %c0_i32 = arith.constant 0 : i32
    %c0_i32_0 = arith.constant 0 : i32
    %c0_i32_1 = arith.constant 0 : i32
    %c0_i32_2 = arith.constant 0 : i32
    return %c0_i32, %c0_i32_0, %c0_i32_1 : i32, i32, i32
  }
  func.func @transform_18(%arg0: i32) -> (i32, i32, i32) {
    %c0_i32 = arith.constant 0 : i32
    %c0_i32_0 = arith.constant 0 : i32
    %c0_i32_1 = arith.constant 0 : i32
    %c0_i32_2 = arith.constant 0 : i32
    return %c0_i32, %c0_i32_0, %c0_i32_1 : i32, i32, i32
  }
  func.func @transform_19(%arg0: i32) -> (i32, i32, i32) {
    %c0_i32 = arith.constant 0 : i32
    %c0_i32_0 = arith.constant 0 : i32
    %c0_i32_1 = arith.constant 0 : i32
    %c0_i32_2 = arith.constant 0 : i32
    return %c0_i32, %c0_i32_0, %c0_i32_1 : i32, i32, i32
  }
  func.func @transform_20(%arg0: i32) -> (i32, i32, i32) {
    %c0_i32 = arith.constant 0 : i32
    %c0_i32_0 = arith.constant 0 : i32
    %c0_i32_1 = arith.constant 0 : i32
    %c0_i32_2 = arith.constant 0 : i32
    return %c0_i32, %c0_i32_0, %c0_i32_1 : i32, i32, i32
  }
  func.func @transform_21(%arg0: i32) -> (i32, i32) {
    %c0_i32 = arith.constant 0 : i32
    %c0_i32_0 = arith.constant 0 : i32
    %c0_i32_1 = arith.constant 0 : i32
    return %c0_i32, %c0_i32_0 : i32, i32
  }
  func.func @transform_22(%arg0: i32) -> (i32, i32, i32) {
    %c0_i32 = arith.constant 0 : i32
    %c0_i32_0 = arith.constant 0 : i32
    %c0_i32_1 = arith.constant 0 : i32
    return %arg0, %c0_i32, %c0_i32_0 : i32, i32, i32
  }
}

</mosaic_0001>

<bundles_post_ra>
// kernel: ecg_transformer_forward.1
= control target key start
LH: loop header
LB: loop body
LE: loop exit
PB: predicated region body
PF: predicated region fallthrough
CT: control target
= control target key end

     0   :  { %s4565_s0 = inlined_call_operand.vmem [shape: f32[2,16,20], index: 0, kind: input, shape index: {}]   ;;  %s4566_s1 = inlined_call_operand.vmem [shape: f32[16,32], index: 1, kind: input, shape index: {}]   ;;  %s4567_s2 = inlined_call_operand.vmem [shape: f32[4,1,32], index: 2, kind: input, shape index: {}]   ;;  %s4568_s3 = inlined_call_operand.vmem [shape: f32[20,32], index: 3, kind: input, shape index: {}]   ;;  %s4569_s4 = inlined_call_operand.vmem [shape: f32[2,32,32], index: 4, kind: input, shape index: {}]   ;;  %s4570_s5 = inlined_call_operand.vmem [shape: f32[2,32,32], index: 5, kind: input, shape index: {}]   ;;  %s4571_s6 = inlined_call_operand.vmem [shape: f32[2,32,32], index: 6, kind: input, shape index: {}]   ;;  %s4572_s7 = inlined_call_operand.vmem [shape: f32[2,1,32], index: 7, kind: input, shape index: {}]   ;;  %s4573_s8 = inlined_call_operand.vmem [shape: f32[2,1,32], index: 8, kind: input, shape index: {}]   ;;  %s4574_s9 = inlined_call_operand.vmem [shape: f32[2,1,32], index: 9, kind: input, shape index: {}]   ;;  %s4575_s10 = inlined_call_operand.vmem [shape: f32[2,32,32], index: 10, kind: input, shape index: {}]   ;;  %s4576_s11 = inlined_call_operand.vmem [shape: f32[2,1,32], index: 11, kind: input, shape index: {}]   ;;  %s4577_s12 = inlined_call_operand.vmem [shape: f32[2,32,64], index: 12, kind: input, shape index: {}]   ;;  %s4578_s13 = inlined_call_operand.vmem [shape: f32[2,1,64], index: 13, kind: input, shape index: {}]   ;;  %s4579_s14 = inlined_call_operand.vmem [shape: f32[2,64,32], index: 14, kind: input, shape index: {}]   ;;  %s4580_s15 = inlined_call_operand.vmem [shape: f32[2,1,32], index: 15, kind: input, shape index: {}]   ;;  %s4581_s16 = inlined_call_operand.vmem [shape: f32[2,1,32], index: 16, kind: input, shape index: {}]   ;;  %s4582_s17 = inlined_call_operand.vmem [shape: f32[2,1,32], index: 17, kind: input, shape index: {}]   ;;  %s4583_s18 = inlined_call_operand.vmem [shape: f32[2,1,32], index: 18, kind: input, shape index: {}]   ;;  %s4584_s19 = inlined_call_operand.vmem [shape: f32[2,1,32], index: 19, kind: input, shape index: {}]   ;;  %s4585_s20 = inlined_call_operand.vmem [shape: f32[3,16,32], index: 20, kind: input, shape index: {}]   ;;  %s4586_s21 = inlined_call_operand.vmem [shape: f32[1,3], index: 21, kind: input, shape index: {}]   ;;  %s4587_s22 = inlined_call_operand.hbm [shape: f32[1,2,3], index: 22, kind: output, shape index: {}]  }
   0x1   :  { %4595 = sst [smem:[#allocation5_spill]] %s4565_s0 }
   0x2   :  { %4596 = sst [smem:[#allocation6_spill]] %s4566_s1 }
   0x3   :  { %4597 = sst [smem:[#allocation7_spill]] %s4567_s2 }
   0x4   :  { %4598 = sst [smem:[#allocation8_spill]] %s4568_s3 }
   0x5   :  { %4599 = sst [smem:[#allocation9_spill]] %s4569_s4 }
   0x6   :  { %4600 = sst [smem:[#allocation10_spill]] %s4570_s5 }
   0x7   :  { %4601 = sst [smem:[#allocation11_spill]] %s4571_s6 }
   0x8   :  { %s4602_s29 = sld [smem:[#allocation8_spill]]  ;;  %vm92_vm0 = vcmask 1043456   ;;  %vm79_vm1 = vcmask 162816  }
   0x9   :  { %s4603_s24 = sld [smem:[#allocation5_spill]] }
   0xa   :  { %s4604_s30 = sld [smem:[#allocation9_spill]] }
   0xb   :  { %s4605_s23 = sld [smem:[#allocation10_spill]] }
   0xc   :  { %s4606_s6 = sld [smem:[#allocation11_spill]] }
   0xe   :  { %v78_v0 = vld [vmem:[%s4602_s29 + $0x10] sm:$0xf]  ;;  %v77_v1 = vld [vmem:[%s4602_s29 + $0x8] sm:$0xff]  ;;  %v76_v2 = vld [vmem:[%s4602_s29] sm:$0xff] }
   0xf   :  { %2731 = vmatpush.msk.msra.mxu0 %vm92_vm0, %v78_v0  ;;  %2898 = vmatpush.msk.msra.mxu1 %vm92_vm0, %v78_v0  ;;  %v72_v3 = vld [vmem:[%s4603_s24] sm:$0xff]  ;;  %v73_v4 = vld [vmem:[%s4603_s24 + $0x8] sm:$0xff]  ;;  %v74_v5 = vld [vmem:[%s4603_s24 + $0x10] sm:$0xff] }
  0x10   :  { %2899 = vmatpush.msk.msra.mxu2 %vm92_vm0, %v78_v0  ;;  %2900 = vmatpush.msk.msra.mxu3 %vm92_vm0, %v78_v0  ;;  %v75_v6 = vld [vmem:[%s4603_s24 + $0x18] sm:$0xff]  ;;  %v137_v10 = vld [vmem:[%s4604_s30 + $0x10] sm:$0xff] }
  0x11   :  { %110 = vmatpush.msra.mxu0 %v77_v1  ;;  %2901 = vmatpush.msra.mxu1 %v77_v1  ;;  %v138_v7 = vld [vmem:[%s4604_s30 + $0x18] sm:$0xff]  ;;  %v187_v11 = vld [vmem:[%s4605_s23 + $0x10] sm:$0xff] }
  0x12   :  { %2902 = vmatpush.msra.mxu2 %v77_v1  ;;  %2903 = vmatpush.msra.mxu3 %v77_v1  ;;  %v188_v8 = vld [vmem:[%s4605_s23 + $0x18] sm:$0xff]  ;;  %v224_v12 = vld [vmem:[%s4606_s6 + $0x10] sm:$0xff] }
  0x13   :  { %111 = vmatpush.msra.mxu0 %v76_v2  ;;  %2904 = vmatpush.msra.mxu1 %v76_v2  ;;  %v225_v9 = vld [vmem:[%s4606_s6 + $0x18] sm:$0xff] }
  0x14   :  { %2732 = vmatmul.msk.f32.vlgmr.msra.gmra.mxu0 %vm79_vm1, %v72_v3  ;;  %2733 = vmatmul.msk.f32.vlgmr.msra.gmra.mxu1 %vm79_vm1, %v73_v4 }
  0x15   :  { %2905 = vmatpush.msra.mxu2 %v76_v2  ;;  %2906 = vmatpush.msra.mxu3 %v76_v2 }
  0x16   :  { %2734 = vmatmul.msk.f32.vlgmr.msra.gmra.mxu2 %vm79_vm1, %v74_v5  ;;  %2735 = vmatmul.msk.f32.vlgmr.msra.gmra.mxu3 %vm79_vm1, %v75_v6 }
  0x17   :  { %168 = vmatpush.msrb.mxu1 %v138_v7  ;;  %205 = vmatpush.msrb.mxu2 %v188_v8 }
  0x18   :  { %242 = vmatpush.msrb.mxu3 %v225_v9 }
  0x19   :  { %169 = vmatpush.msrb.mxu1 %v137_v10  ;;  %206 = vmatpush.msrb.mxu2 %v187_v11 }
  0x1a   :  { %243 = vmatpush.msrb.mxu3 %v224_v12 }
  0x1b   :  { %27 = vsyncpa [#allocation3], 0  ;;  %v136_v13 = vld [vmem:[%s4604_s30 + $0x8] sm:$0xff]  ;;  %v135_v16 = vld [vmem:[%s4604_s30] sm:$0xff]  ;;  %s4607_s4 = sld [smem:[#allocation6_spill]]  ;;  %vm143_vm2 = vcmask 261120  }
  0x1c   :  { %v186_v14 = vld [vmem:[%s4605_s23 + $0x8] sm:$0xff]  ;;  %170 = vmatpush.msrb.mxu1 %v136_v13  ;;  %v185_v17 = vld [vmem:[%s4605_s23] sm:$0xff]  ;;  %s4608_s29 = sld [smem:[#allocation7_spill]]  ;;  %vm429_vm3 = vcmask 130048  }
  0x1d   :  { %v223_v15 = vld [vmem:[%s4606_s6 + $0x8] sm:$0xff]  ;;  %207 = vmatpush.msrb.mxu2 %v186_v14  ;;  %v222_v18 = vld [vmem:[%s4606_s6] sm:$0xff] }
  0x1e   :  { %244 = vmatpush.msrb.mxu3 %v223_v15  ;;  %171 = vmatpush.msrb.mxu1 %v135_v16  ;;  %v2910_v32 = vld [vmem:[%s4573_s8] ss:$0 sm:$0xff] }
  0x1f   :  { %208 = vmatpush.msrb.mxu2 %v185_v17  ;;  %v2909_v33 = vld [vmem:[%s4572_s7] ss:$0 sm:$0xff] }
  0x20   :  { %245 = vmatpush.msrb.mxu3 %v222_v18  ;;  %v2911_v34 = vld [vmem:[%s4574_s9] ss:$0 sm:$0xff] }
  0x21   :  { %v125_v19 = vld [vmem:[%s4607_s4] sm:$0xff]  ;;  %v126_v23 = vld [vmem:[%s4607_s4 + $0x8] sm:$0xff] }
  0x22   :  { %v2912_v41 = vld [vmem:[%s4608_s29] ss:$0 sm:$0xff]  ;;  %v3366_v56 = vld [vmem:[%s4608_s29 + $0x1] ss:$0 sm:$0xff]  ;;  %v3378_v0 = vld [vmem:[%s4608_s29 + $0x2] ss:$0 sm:$0xff] }
  0x23   :  { %v3391_v5 = vld [vmem:[%s4608_s29 + $0x3] ss:$0 sm:$0xff] }
  0x91   :  { %v113_v20 = vpop.f32.mrf.mxu0  ;;  %v116_v22 = vpop.f32.mrf.mxu1 }
  0x92   :  { %v3311_v21 = vadd.f32 %v125_v19, %v113_v20  ;;  %v3322_v24 = vadd.f32 %v126_v23, %v116_v22 }
  0x94   :  { %2736 = vmatmul.msk.f32.vlgmr.msrb.gmra.mxu1 %vm143_vm2, %v3311_v21  ;;  %2740 = vmatmul.msk.f32.vlgmr.msrb.gmra.mxu2 %vm143_vm2, %v3311_v21 }
  0x95   :  { %2744 = vmatmul.msk.f32.vlgmr.msrb.gmra.mxu3 %vm143_vm2, %v3311_v21 }
  0x99   :  { %v119_v25 = vpop.f32.mrf.mxu2  ;;  %v122_v27 = vpop.f32.mrf.mxu3 }
  0x9a   :  { %v3330_v26 = vadd.f32 %v125_v19, %v119_v25  ;;  %v3338_v28 = vadd.f32 %v126_v23, %v122_v27 }
  0x9c   :  { %2737 = vmatmul.msk.f32.gmra.mxu1 %vm143_vm2, %v3322_v24  ;;  %2741 = vmatmul.msk.f32.gmra.mxu2 %vm143_vm2, %v3322_v24 }
  0x9d   :  { %2745 = vmatmul.msk.f32.gmra.mxu3 %vm143_vm2, %v3322_v24 }
  0xa4   :  { %2742 = vmatmul.msk.f32.gmra.mxu2 %vm143_vm2, %v3330_v26  ;;  %2738 = vmatmul.msk.f32.gmra.mxu1 %vm143_vm2, %v3330_v26 }
  0xa5   :  { %2746 = vmatmul.msk.f32.gmra.mxu3 %vm143_vm2, %v3330_v26 }
  0xac   :  { %2743 = vmatmul.msk.f32.gmra.mxu2 %vm143_vm2, %v3338_v28  ;;  %2739 = vmatmul.msk.f32.gmra.mxu1 %vm143_vm2, %v3338_v28 }
  0xad   :  { %2747 = vmatmul.msk.f32.gmra.mxu3 %vm143_vm2, %v3338_v28 }
 0x111   :  { %v173_v31 = vpop.f32.mrf.mxu1 }
 0x112   :  { %v174_v39 = vadd.f32 %v2909_v33, %v173_v31 }
 0x114   :  { %v271_v45 = vmul.f32 %v2912_v41, %v174_v39  ;;  %v273_v59 = vmul.f32 %v3366_v56, %v174_v39  ;;  %v275_v1 = vmul.f32 %v3378_v0, %v174_v39  ;;  %v277_v6 = vmul.f32 %v3391_v5, %v174_v39 }
 0x117   :  { %v210_v29 = vpop.f32.mrf.mxu2 }
 0x118   :  { %v247_v30 = vpop.f32.mrf.mxu3  ;;  %v211_v42 = vadd.f32 %v2910_v32, %v210_v29 }
 0x119   :  { %v248_v40 = vadd.f32 %v2911_v34, %v247_v30  ;;  %v176_v43 = vpop.f32.mrf.mxu1 }
 0x11a   :  { %v177_v47 = vadd.f32 %v2909_v33, %v176_v43 }
 0x11c   :  { %v272_v50 = vmul.f32 %v2912_v41, %v177_v47  ;;  %v274_v62 = vmul.f32 %v3366_v56, %v177_v47  ;;  %v276_v3 = vmul.f32 %v3378_v0, %v177_v47  ;;  %v278_v8 = vmul.f32 %v3391_v5, %v177_v47 }
 0x11f   :  { %v213_v35 = vpop.f32.mrf.mxu2 }
 0x120   :  { %v214_v36 = vadd.f32 %v2910_v32, %v213_v35  ;;  %v250_v37 = vpop.f32.mrf.mxu3 }
 0x121   :  { %v251_v38 = vadd.f32 %v2911_v34, %v250_v37  ;;  %v179_v48 = vpop.f32.mrf.mxu1 }
 0x122   :  { %2748 = vmatpush.xpose.msk.msrb.mxu0 %vm143_vm2, %v214_v36  ;;  %v180_v55 = vadd.f32 %v2909_v33, %v179_v48 }
 0x123   :  { %852 = vmatpush.msra.mxu2 %v251_v38 }
 0x124   :  { %v279_v58 = vmul.f32 %v2912_v41, %v180_v55  ;;  %v281_v2 = vmul.f32 %v3366_v56, %v180_v55  ;;  %v283_v7 = vmul.f32 %v3378_v0, %v180_v55  ;;  %v285_v10 = vmul.f32 %v3391_v5, %v180_v55 }
 0x125   :  { %853 = vmatpush.msra.mxu2 %v248_v40 }
 0x126   :  { %2749 = vmatpush.xpose.msk.msrb.mxu0 %vm143_vm2, %v211_v42 }
 0x127   :  { %v216_v44 = vpop.f32.mrf.mxu2 }
 0x128   :  { %v253_v46 = vpop.f32.mrf.mxu3  ;;  %v217_v57 = vadd.f32 %v2910_v32, %v216_v44 }
 0x129   :  { %2750 = vmatmul.msk.f32.vlgmr.msrb.gmra.mxu0 %vm143_vm2, %v271_v45  ;;  %v254_v54 = vadd.f32 %v2911_v34, %v253_v46  ;;  %v182_v60 = vpop.f32.mrf.mxu1 }
 0x12a   :  { %v183_v61 = vadd.f32 %v2909_v33, %v182_v60 }
 0x12c   :  { %v280_v63 = vmul.f32 %v2912_v41, %v183_v61  ;;  %v282_v4 = vmul.f32 %v3366_v56, %v183_v61  ;;  %v284_v9 = vmul.f32 %v3378_v0, %v183_v61  ;;  %v286_v11 = vmul.f32 %v3391_v5, %v183_v61 }
 0x12f   :  { %v219_v49 = vpop.f32.mrf.mxu2 }
 0x130   :  { %v220_v51 = vadd.f32 %v2910_v32, %v219_v49  ;;  %v256_v52 = vpop.f32.mrf.mxu3 }
 0x131   :  { %v257_v53 = vadd.f32 %v2911_v34, %v256_v52  ;;  %2751 = vmatmul.msk.f32.gmra.mxu0 %vm143_vm2, %v272_v50 }
 0x132   :  { %2758 = vmatpush.xpose.msk.msra.mxu1 %vm143_vm2, %v220_v51 }
 0x133   :  { %917 = vmatpush.msra.mxu3 %v257_v53 }
 0x135   :  { %918 = vmatpush.msra.mxu3 %v254_v54 }
 0x136   :  { %2759 = vmatpush.xpose.msk.msra.mxu1 %vm143_vm2, %v217_v57 }
 0x139   :  { %2752 = vmatmul.msk.f32.gmra.mxu0 %vm143_vm2, %v273_v59  ;;  %2760 = vmatmul.msk.f32.vlgmr.msra.gmra.mxu1 %vm143_vm2, %v279_v58 }
 0x141   :  { %2753 = vmatmul.msk.f32.gmra.mxu0 %vm143_vm2, %v274_v62  ;;  %2761 = vmatmul.msk.f32.gmra.mxu1 %vm143_vm2, %v280_v63 }
 0x149   :  { %2754 = vmatmul.msk.f32.gmra.mxu0 %vm143_vm2, %v275_v1  ;;  %2762 = vmatmul.msk.f32.gmra.mxu1 %vm143_vm2, %v281_v2 }
 0x151   :  { %2755 = vmatmul.msk.f32.gmra.mxu0 %vm143_vm2, %v276_v3  ;;  %2763 = vmatmul.msk.f32.gmra.mxu1 %vm143_vm2, %v282_v4 }
 0x159   :  { %2756 = vmatmul.msk.f32.gmra.mxu0 %vm143_vm2, %v277_v6  ;;  %2764 = vmatmul.msk.f32.gmra.mxu1 %vm143_vm2, %v283_v7 }
 0x161   :  { %2757 = vmatmul.msk.f32.gmra.mxu0 %vm143_vm2, %v278_v8  ;;  %2765 = vmatmul.msk.f32.gmra.mxu1 %vm143_vm2, %v284_v9 }
 0x169   :  { %2766 = vmatmul.msk.f32.gmra.mxu1 %vm143_vm2, %v285_v10 }
 0x171   :  { %2767 = vmatmul.msk.f32.gmra.mxu1 %vm143_vm2, %v286_v11 }
 0x1a6   :  { %v334_v12 = vpop.f32.mrf.mxu0 }
 0x1a7   :  { %v430_v13 = vsel %vm429_vm3, %v334_v12, -inf }
 0x1a8   :  { %431 = vmax.xlane.f32.xlu0 %v430_v13 }
 0x1ae   :  { %v337_v14 = vpop.f32.mrf.mxu0 }
 0x1af   :  { %v433_v15 = vsel %vm429_vm3, %v337_v14, -inf }
 0x1b0   :  { %434 = vmax.xlane.f32.xlu0 %v433_v15 }
 0x1b6   :  { %v340_v16 = vpop.f32.mrf.mxu0  ;;  %v3407_v17 = vpop.f32.mrf.mxu1 }
 0x1b7   :  { %v436_v18 = vsel %vm429_vm3, %v340_v16, -inf  ;;  %v454_v22 = vsel %vm429_vm3, %v3407_v17, -inf }
 0x1b8   :  { %437 = vmax.xlane.f32.xlu1 %v436_v18 }
 0x1be   :  { %v343_v19 = vpop.f32.mrf.mxu0  ;;  %v3410_v20 = vpop.f32.mrf.mxu1 }
 0x1bf   :  { %v439_v23 = vsel %vm429_vm3, %v343_v19, -inf  ;;  %v457_v30 = vsel %vm429_vm3, %v3410_v20, -inf }
 0x1c0   :  { %455 = vmax.xlane.f32.xlu1 %v454_v22  ;;  %440 = vmax.xlane.f32.xlu2 %v439_v23 }
 0x1c6   :  { %v3415_v25 = vpop.f32.mrf.mxu0  ;;  %v3417_v27 = vpop.f32.mrf.mxu1 }
 0x1c7   :  { %v460_v29 = vsel %vm429_vm3, %v3417_v27, -inf  ;;  %v442_v31 = vsel %vm429_vm3, %v3415_v25, -inf }
 0x1c8   :  { %461 = vmax.xlane.f32.xlu1 %v460_v29  ;;  %458 = vmax.xlane.f32.xlu2 %v457_v30 }
 0x1c9   :  { %443 = vmax.xlane.f32.xlu0 %v442_v31 }
 0x1ce   :  { %v3425_v32 = vpop.f32.mrf.mxu0  ;;  %v3427_v33 = vpop.f32.mrf.mxu1 }
 0x1cf   :  { %v463_v34 = vsel %vm429_vm3, %v3427_v33, -inf  ;;  %v445_v35 = vsel %vm429_vm3, %v3425_v32, -inf }
 0x1d0   :  { %446 = vmax.xlane.f32.xlu2 %v445_v35 }
 0x1d1   :  { %464 = vmax.xlane.f32.xlu0 %v463_v34 }
 0x1d6   :  { %v3433_v36 = vpop.f32.mrf.mxu0  ;;  %v3435_v37 = vpop.f32.mrf.mxu1 }
 0x1d7   :  { %v466_v38 = vsel %vm429_vm3, %v3435_v37, -inf  ;;  %v448_v39 = vsel %vm429_vm3, %v3433_v36, -inf }
 0x1d8   :  { %467 = vmax.xlane.f32.xlu2 %v466_v38  ;;  %449 = vmax.xlane.f32.xlu1 %v448_v39 }
 0x1de   :  { %v3441_v40 = vpop.f32.mrf.mxu0  ;;  %v3443_v41 = vpop.f32.mrf.mxu1 }
 0x1df   :  { %v469_v42 = vsel %vm429_vm3, %v3443_v41, -inf  ;;  %v451_v43 = vsel %vm429_vm3, %v3441_v40, -inf }
 0x1e0   :  { %470 = vmax.xlane.f32.xlu2 %v469_v42  ;;  %452 = vmax.xlane.f32.xlu1 %v451_v43 }
 0x1e6   :  { %v3449_v44 = vpop.f32.mrf.mxu1 }
 0x1e7   :  { %v472_v45 = vsel %vm429_vm3, %v3449_v44, -inf }
 0x1e8   :  { %473 = vmax.xlane.f32.xlu1 %v472_v45 }
 0x1ee   :  { %v3453_v46 = vpop.f32.mrf.mxu1 }
 0x1ef   :  { %v475_v47 = vsel %vm429_vm3, %v3453_v46, -inf }
 0x1f0   :  { %476 = vmax.xlane.f32.xlu1 %v475_v47 }
 0x21b   :  { %v432_v48 = vpop.xlane.xlu0 %431 }
 0x21c   :  { %v478_v49 = vsub.f32 %v334_v12, %v432_v48 }
 0x21e   :  { %v494_v50 = vmul.f32 1.442695, %v478_v49 }
 0x220   :  { %2934 = vpow2.f32 %v494_v50 }
 0x223   :  { %v435_v51 = vpop.xlane.xlu0 %434 }
 0x224   :  { %v479_v52 = vsub.f32 %v337_v14, %v435_v51 }
 0x226   :  { %v3457_v53 = vpop.eup %2934  ;;  %v496_v54 = vmul.f32 1.442695, %v479_v52 }
 0x227   :  { %v526_v55 = vsel %vm429_vm3, %v3457_v53, 0.0 }
 0x228   :  { %2936 = vpow2.f32 %v496_v54  ;;  %527 = vadd.xlane.f32.xlu0 %v526_v55 }
 0x22b   :  { %v438_v57 = vpop.xlane.xlu1 %437 }
 0x22c   :  { %v480_v58 = vsub.f32 %v340_v16, %v438_v57 }
 0x22e   :  { %v3461_v59 = vpop.eup %2936  ;;  %v498_v60 = vmul.f32 1.442695, %v480_v58 }
 0x22f   :  { %v529_v61 = vsel %vm429_vm3, %v3461_v59, 0.0 }
 0x230   :  { %2938 = vpow2.f32 %v498_v60  ;;  %530 = vadd.xlane.f32.xlu0 %v529_v61 }
 0x233   :  { %v456_v62 = vpop.xlane.xlu1 %455  ;;  %v441_v63 = vpop.xlane.xlu2 %440 }
 0x234   :  { %v486_v1 = vsub.f32 %v3407_v17, %v456_v62  ;;  %v481_v2 = vsub.f32 %v343_v19, %v441_v63 }
 0x236   :  { %v3466_v3 = vpop.eup %2938  ;;  %v510_v4 = vmul.f32 1.442695, %v486_v1  ;;  %v500_v6 = vmul.f32 1.442695, %v481_v2 }
 0x237   :  { %v532_v7 = vsel %vm429_vm3, %v3466_v3, 0.0 }
 0x238   :  { %2940 = vpow2.f32 %v510_v4  ;;  %533 = vadd.xlane.f32.xlu2 %v532_v7 }
 0x239   :  { %2942 = vpow2.f32 %v500_v6 }
 0x23b   :  { %v462_v8 = vpop.xlane.xlu1 %461  ;;  %v459_v9 = vpop.xlane.xlu2 %458 }
 0x23c   :  { %v488_v10 = vsub.f32 %v3417_v27, %v462_v8  ;;  %v487_v11 = vsub.f32 %v3410_v20, %v459_v9  ;;  %v444_v12 = vpop.xlane.xlu0 %443 }
 0x23d   :  { %v482_v13 = vsub.f32 %v3415_v25, %v444_v12 }
 0x23e   :  { %v3473_v14 = vpop.eup %2940  ;;  %v514_v15 = vmul.f32 1.442695, %v488_v10  ;;  %v512_v16 = vmul.f32 1.442695, %v487_v11 }
 0x23f   :  { %v3475_v17 = vpop.eup %2942  ;;  %v502_v18 = vmul.f32 1.442695, %v482_v13  ;;  %v550_v19 = vsel %vm429_vm3, %v3473_v14, 0.0 }
 0x240   :  { %2944 = vpow2.f32 %v514_v15  ;;  %551 = vadd.xlane.f32.xlu0 %v550_v19  ;;  %v535_v22 = vsel %vm429_vm3, %v3475_v17, 0.0 }
 0x241   :  { %2946 = vpow2.f32 %v512_v16  ;;  %536 = vadd.xlane.f32.xlu2 %v535_v22 }
 0x242   :  { %2948 = vpow2.f32 %v502_v18 }
 0x243   :  { %v447_v20 = vpop.xlane.xlu2 %446 }
 0x244   :  { %v465_v23 = vpop.xlane.xlu0 %464  ;;  %v483_v25 = vsub.f32 %v3425_v32, %v447_v20 }
 0x245   :  { %v489_v27 = vsub.f32 %v3427_v33, %v465_v23 }
 0x246   :  { %v3483_v29 = vpop.eup %2944  ;;  %v504_v30 = vmul.f32 1.442695, %v483_v25 }
 0x247   :  { %v3485_v31 = vpop.eup %2946  ;;  %v516_v34 = vmul.f32 1.442695, %v489_v27  ;;  %v556_v35 = vsel %vm429_vm3, %v3483_v29, 0.0 }
 0x248   :  { %v3489_v38 = vpop.eup %2948  ;;  %2950 = vpow2.f32 %v504_v30  ;;  %v553_v39 = vsel %vm429_vm3, %v3485_v31, 0.0 }
 0x249   :  { %2952 = vpow2.f32 %v516_v34  ;;  %554 = vadd.xlane.f32.xlu0 %v553_v39  ;;  %557 = vadd.xlane.f32.xlu2 %v556_v35  ;;  %v538_v32 = vsel %vm429_vm3, %v3489_v38, 0.0 }
 0x24a   :  { %539 = vadd.xlane.f32.xlu1 %v538_v32 }
 0x24b   :  { %v468_v33 = vpop.xlane.xlu2 %467  ;;  %v450_v42 = vpop.xlane.xlu1 %449 }
 0x24c   :  { %v490_v43 = vsub.f32 %v3435_v37, %v468_v33  ;;  %v484_v45 = vsub.f32 %v3433_v36, %v450_v42 }
 0x24e   :  { %v3497_v47 = vpop.eup %2950  ;;  %v518_v48 = vmul.f32 1.442695, %v490_v43  ;;  %v506_v49 = vmul.f32 1.442695, %v484_v45 }
 0x24f   :  { %v3499_v50 = vpop.eup %2952  ;;  %v541_v51 = vsel %vm429_vm3, %v3497_v47, 0.0 }
 0x250   :  { %2954 = vpow2.f32 %v518_v48  ;;  %v559_v52 = vsel %vm429_vm3, %v3499_v50, 0.0 }
 0x251   :  { %2956 = vpow2.f32 %v506_v49  ;;  %542 = vadd.xlane.f32.xlu0 %v541_v51 }
 0x252   :  { %560 = vadd.xlane.f32.xlu1 %v559_v52 }
 0x253   :  { %v471_v54 = vpop.xlane.xlu2 %470  ;;  %v453_v37 = vpop.xlane.xlu1 %452 }
 0x254   :  { %v491_v36 = vsub.f32 %v3443_v41, %v471_v54  ;;  %v485_v55 = vsub.f32 %v3441_v40, %v453_v37 }
 0x256   :  { %v3507_v57 = vpop.eup %2954  ;;  %v520_v58 = vmul.f32 1.442695, %v491_v36  ;;  %v508_v60 = vmul.f32 1.442695, %v485_v55 }
 0x257   :  { %v3509_v61 = vpop.eup %2956  ;;  %v562_v62 = vsel %vm429_vm3, %v3507_v57, 0.0 }
 0x258   :  { %2958 = vpow2.f32 %v520_v58  ;;  %v544_v63 = vsel %vm429_vm3, %v3509_v61, 0.0 }
 0x259   :  { %2960 = vpow2.f32 %v508_v60  ;;  %563 = vadd.xlane.f32.xlu0 %v562_v62  ;;  %545 = vadd.xlane.f32.xlu2 %v544_v63 }
 0x25b   :  { %v474_v1 = vpop.xlane.xlu1 %473 }
 0x25c   :  { %v492_v41 = vsub.f32 %v3449_v44, %v474_v1 }
 0x25e   :  { %v3516_v40 = vpop.eup %2958  ;;  %v522_v2 = vmul.f32 1.442695, %v492_v41 }
 0x25f   :  { %v3518_v4 = vpop.eup %2960  ;;  %v565_v6 = vsel %vm429_vm3, %v3516_v40, 0.0 }
 0x260   :  { %2962 = vpow2.f32 %v522_v2  ;;  %v547_v7 = vsel %vm429_vm3, %v3518_v4, 0.0 }
 0x261   :  { %566 = vadd.xlane.f32.xlu2 %v565_v6  ;;  %548 = vadd.xlane.f32.xlu1 %v547_v7 }
 0x263   :  { %v477_v8 = vpop.xlane.xlu1 %476 }
 0x264   :  { %v493_v9 = vsub.f32 %v3453_v46, %v477_v8 }
 0x266   :  { %v3525_v10 = vpop.eup %2962  ;;  %v524_v44 = vmul.f32 1.442695, %v493_v9 }
 0x267   :  { %v568_v11 = vsel %vm429_vm3, %v3525_v10, 0.0 }
 0x268   :  { %2964 = vpow2.f32 %v524_v44  ;;  %569 = vadd.xlane.f32.xlu0 %v568_v11 }
 0x26e   :  { %v3529_v12 = vpop.eup %2964 }
 0x26f   :  { %v571_v13 = vsel %vm429_vm3, %v3529_v12, 0.0 }
 0x270   :  { %572 = vadd.xlane.f32.xlu1 %v571_v13 }
 0x29b   :  { %v528_v15 = vpop.xlane.xlu0 %527 }
 0x29c   :  { %2966 = vrcp.f32 %v528_v15  ;;  %v585_v22 = vand.u32 2147483648, %v528_v15  ;;  %v583_v23 = vand.u32 2147483647, %v528_v15  ;;  %vm579_vm5 = vweird.f32 %v528_v15 }
 0x29e   :  { %v586_v30 = vor.u32 1.1754944e-38, %v585_v22  ;;  %vm584_vm7 = vcmp.eq.f32.partialorder %v583_v23, 8.507059e+37 }
 0x2a2   :  { %v2967_v16 = vpop.eup %2966 }
 0x2a3   :  { %v575_v18 = vmul.f32 %v2967_v16, %v528_v15  ;;  %v531_v19 = vpop.xlane.xlu0 %530  ;;  %vm580_vm4 = vweird.f32 %v2967_v16 }
 0x2a4   :  { %2968 = vrcp.f32 %v531_v19  ;;  %vm581_vm6 = vmor %vm579_vm5, %vm580_vm4  ;;  %v600_v45 = vand.u32 2147483648, %v531_v19  ;;  %vm594_vm9 = vweird.f32 %v531_v19  ;;  %v598_v49 = vand.u32 2147483647, %v531_v19 }
 0x2a5   :  { %v576_v46 = vsub.f32 1.0, %v575_v18 }
 0x2a6   :  { %v601_v36 = vor.u32 1.1754944e-38, %v600_v45  ;;  %vm599_vm11 = vcmp.eq.f32.partialorder %v598_v49, 8.507059e+37 }
 0x2a7   :  { %v577_v20 = vmul.f32 %v2967_v16, %v576_v46 }
 0x2a9   :  { %v578_v25 = vadd.f32 %v2967_v16, %v577_v20 }
 0x2aa   :  { %v2969_v27 = vpop.eup %2968 }
 0x2ab   :  { %v582_v34 = vsel %vm581_vm6, %v2967_v16, %v578_v25  ;;  %v590_v35 = vmul.f32 %v2969_v27, %v531_v19  ;;  %v534_v39 = vpop.xlane.xlu2 %533  ;;  %vm595_vm8 = vweird.f32 %v2969_v27 }
 0x2ac   :  { %v587_v32 = vsel %vm584_vm7, %v586_v30, %v582_v34  ;;  %2970 = vrcp.f32 %v534_v39  ;;  %vm596_vm10 = vmor %vm594_vm9, %vm595_vm8  ;;  %v615_v62 = vand.u32 2147483648, %v534_v39  ;;  %v613_v1 = vand.u32 2147483647, %v534_v39 }
 0x2ad   :  { %v591_v33 = vsub.f32 1.0, %v590_v35  ;;  %v588_v42 = vmul.f32 %v3457_v53, %v587_v32  ;;  %vm609_vm13 = vweird.f32 %v534_v39 }
 0x2ae   :  { %v616_v7 = vor.u32 1.1754944e-38, %v615_v62  ;;  %vm614_vm15 = vcmp.eq.f32.partialorder %v613_v1, 8.507059e+37 }
 0x2af   :  { %v592_v43 = vmul.f32 %v2969_v27, %v591_v33  ;;  %2768 = vmatmul.msk.f32.vlgmr.msra.gmra.mxu2 %vm429_vm3, %v588_v42 }
 0x2b1   :  { %v593_v48 = vadd.f32 %v2969_v27, %v592_v43 }
 0x2b2   :  { %v2971_v51 = vpop.eup %2970 }
 0x2b3   :  { %v605_v52 = vmul.f32 %v2971_v51, %v534_v39  ;;  %v552_v54 = vpop.xlane.xlu0 %551  ;;  %v597_v37 = vsel %vm596_vm10, %v2969_v27, %v593_v48  ;;  %vm610_vm12 = vweird.f32 %v2971_v51 }
 0x2b4   :  { %2972 = vrcp.f32 %v552_v54  ;;  %v537_v55 = vpop.xlane.xlu2 %536  ;;  %v602_v53 = vsel %vm599_vm11, %v601_v36, %v597_v37  ;;  %vm611_vm14 = vmor %vm609_vm13, %vm610_vm12  ;;  %v703_v18 = vand.u32 2147483647, %v552_v54  ;;  %v705_v22 = vand.u32 2147483648, %v552_v54 }
 0x2b5   :  { %v606_v58 = vsub.f32 1.0, %v605_v52  ;;  %2974 = vrcp.f32 %v537_v55  ;;  %v603_v63 = vmul.f32 %v3461_v59, %v602_v53  ;;  %v630_v23 = vand.u32 2147483648, %v537_v55 }
 0x2b6   :  { %vm699_vm4 = vweird.f32 %v552_v54  ;;  %v628_v30 = vand.u32 2147483647, %v537_v55  ;;  %vm624_vm6 = vweird.f32 %v537_v55  ;;  %v706_v33 = vor.u32 1.1754944e-38, %v705_v22 }
 0x2b7   :  { %v607_v60 = vmul.f32 %v2971_v51, %v606_v58  ;;  %2769 = vmatmul.msk.f32.gmra.mxu2 %vm429_vm3, %v603_v63  ;;  %vm704_vm8 = vcmp.eq.f32.partialorder %v703_v18, 8.507059e+37  ;;  %v631_v43 = vor.u32 1.1754944e-38, %v630_v23 }
 0x2b8   :  { %vm629_vm9 = vcmp.eq.f32.partialorder %v628_v30, 8.507059e+37 }
 0x2b9   :  { %v608_v41 = vadd.f32 %v2971_v51, %v607_v60 }
 0x2ba   :  { %v2973_v2 = vpop.eup %2972 }
 0x2bb   :  { %v2975_v6 = vpop.eup %2974  ;;  %v695_v8 = vmul.f32 %v2973_v2, %v552_v54  ;;  %v612_v9 = vsel %vm611_vm14, %v2971_v51, %v608_v41  ;;  %vm700_vm0 = vweird.f32 %v2973_v2 }
 0x2bc   :  { %v620_v44 = vmul.f32 %v2975_v6, %v537_v55  ;;  %v3537_v11 = vpop.xlane.xlu0 %554  ;;  %v3539_v13 = vpop.xlane.xlu2 %557  ;;  %v617_v16 = vsel %vm614_vm15, %v616_v7, %v612_v9  ;;  %vm625_vm1 = vweird.f32 %v2975_v6  ;;  %vm3547_vm5 = vmor %vm699_vm4, %vm700_vm0 }
 0x2bd   :  { %v696_v15 = vsub.f32 1.0, %v695_v8  ;;  %2976 = vrcp.f32 %v3537_v11  ;;  %v3542_v59 = vpop.xlane.xlu1 %539  ;;  %v618_v25 = vmul.f32 %v3466_v3, %v617_v16  ;;  %vm3556_vm7 = vmor %vm624_vm6, %vm625_vm1  ;;  %v720_v55 = vand.u32 2147483648, %v3537_v11 }
 0x2be   :  { %v621_v19 = vsub.f32 1.0, %v620_v44  ;;  %2978 = vrcp.f32 %v3539_v13  ;;  %v645_v60 = vand.u32 2147483648, %v3542_v59  ;;  %vm714_vm11 = vweird.f32 %v3537_v11 }
 0x2bf   :  { %v697_v46 = vmul.f32 %v2973_v2, %v696_v15  ;;  %2980 = vrcp.f32 %v3542_v59  ;;  %2770 = vmatmul.msk.f32.gmra.mxu2 %vm429_vm3, %v618_v25  ;;  %vm729_vm12 = vweird.f32 %v3539_v13  ;;  %v718_v7 = vand.u32 2147483647, %v3537_v11 }
 0x2c0   :  { %v622_v20 = vmul.f32 %v2975_v6, %v621_v19  ;;  %v735_v9 = vand.u32 2147483648, %v3539_v13  ;;  %v721_v15 = vor.u32 1.1754944e-38, %v720_v55  ;;  %vm639_vm13 = vweird.f32 %v3542_v59 }
 0x2c1   :  { %v698_v27 = vadd.f32 %v2973_v2, %v697_v46  ;;  %v733_v16 = vand.u32 2147483647, %v3539_v13  ;;  %v646_v19 = vor.u32 1.1754944e-38, %v645_v60  ;;  %vm719_vm1 = vcmp.eq.f32.partialorder %v718_v7, 8.507059e+37 }
 0x2c2   :  { %v623_v35 = vadd.f32 %v2975_v6, %v622_v20 }
 0x2c3   :  { %v3552_v39 = vpop.eup %2976  ;;  %v702_v32 = vsel %vm3547_vm5, %v2973_v2, %v698_v27 }
 0x2c4   :  { %v3560_v42 = vpop.eup %2978  ;;  %v710_v45 = vmul.f32 %v3552_v39, %v3537_v11  ;;  %v3564_v48 = vpop.xlane.xlu0 %542  ;;  %v627_v49 = vsel %vm3556_vm7, %v2975_v6, %v623_v35  ;;  %v707_v52 = vsel %vm704_vm8, %v706_v33, %v702_v32  ;;  %vm715_vm10 = vweird.f32 %v3552_v39 }
 0x2c5   :  { %v2981_v51 = vpop.eup %2980  ;;  %v725_v54 = vmul.f32 %v3560_v42, %v3539_v13  ;;  %2982 = vrcp.f32 %v3564_v48  ;;  %v3571_v37 = vpop.xlane.xlu1 %560  ;;  %v632_v62 = vsel %vm629_vm9, %v631_v43, %v627_v49  ;;  %v708_v2 = vmul.f32 %v3473_v14, %v707_v52  ;;  %vm3593_vm15 = vmor %vm714_vm11, %vm715_vm10 }
 0x2c6   :  { %v711_v36 = vsub.f32 1.0, %v710_v45  ;;  %v635_v58 = vmul.f32 %v2981_v51, %v3542_v59  ;;  %2984 = vrcp.f32 %v3571_v37  ;;  %v633_v41 = vmul.f32 %v3475_v17, %v632_v62 }
 0x2c7   :  { %v726_v53 = vsub.f32 1.0, %v725_v54  ;;  %v643_v6 = vand.u32 2147483647, %v3542_v59  ;;  %2776 = vmatmul.msk.f32.vlgmr.msra.gmra.mxu3 %vm429_vm3, %v708_v2  ;;  %vm640_vm14 = vweird.f32 %v2981_v51  ;;  %vm730_vm5 = vweird.f32 %v3560_v42 }
 0x2c8   :  { %v712_v63 = vmul.f32 %v3552_v39, %v711_v36  ;;  %v636_v1 = vsub.f32 1.0, %v635_v58  ;;  %2771 = vmatmul.msk.f32.gmra.mxu2 %vm429_vm3, %v633_v41  ;;  %vm641_vm4 = vmor %vm639_vm13, %vm640_vm14  ;;  %v660_v35 = vand.u32 2147483648, %v3564_v48  ;;  %v658_v52 = vand.u32 2147483647, %v3564_v48 }
 0x2c9   :  { %v727_v8 = vmul.f32 %v3560_v42, %v726_v53  ;;  %vm644_vm0 = vcmp.eq.f32.partialorder %v643_v6, 8.507059e+37  ;;  %vm3623_vm7 = vmor %vm729_vm12, %vm730_vm5  ;;  %vm654_vm8 = vweird.f32 %v3564_v48  ;;  %v736_v36 = vor.u32 1.1754944e-38, %v735_v9 }
 0x2ca   :  { %v637_v44 = vmul.f32 %v2981_v51, %v636_v1  ;;  %v713_v17 = vadd.f32 %v3552_v39, %v712_v63  ;;  %vm734_vm10 = vcmp.eq.f32.partialorder %v733_v16, 8.507059e+37  ;;  %vm659_vm11 = vcmp.eq.f32.partialorder %v658_v52, 8.507059e+37 }
 0x2cb   :  { %v2983_v14 = vpop.eup %2982  ;;  %v728_v34 = vadd.f32 %v3560_v42, %v727_v8  ;;  %vm744_vm13 = vweird.f32 %v3571_v37  ;;  %v750_v2 = vand.u32 2147483648, %v3571_v37 }
 0x2cc   :  { %v3598_v18 = vpop.eup %2984  ;;  %v650_v46 = vmul.f32 %v2983_v14, %v3564_v48  ;;  %v3601_v22 = vpop.xlane.xlu0 %563  ;;  %v638_v23 = vadd.f32 %v2981_v51, %v637_v44  ;;  %v717_v25 = vsel %vm3593_vm15, %v3552_v39, %v713_v17  ;;  %vm655_vm6 = vweird.f32 %v2983_v14 }
 0x2cd   :  { %v3603_v20 = vpop.xlane.xlu2 %545  ;;  %v740_v27 = vmul.f32 %v3598_v18, %v3571_v37  ;;  %2986 = vrcp.f32 %v3601_v22  ;;  %v722_v33 = vsel %vm719_vm1, %v721_v15, %v717_v25  ;;  %vm3636_vm9 = vmor %vm654_vm8, %vm655_vm6  ;;  %v661_v48 = vor.u32 1.1754944e-38, %v660_v35 }
 0x2ce   :  { %v651_v30 = vsub.f32 1.0, %v650_v46  ;;  %2988 = vrcp.f32 %v3603_v20  ;;  %v642_v32 = vsel %vm641_vm4, %v2981_v51, %v638_v23  ;;  %v723_v45 = vmul.f32 %v3485_v31, %v722_v33 }
 0x2cf   :  { %v741_v39 = vsub.f32 1.0, %v740_v27  ;;  %v647_v43 = vsel %vm644_vm0, %v646_v19, %v642_v32  ;;  %v732_v31 = vsel %vm3623_vm7, %v3560_v42, %v728_v34  ;;  %vm745_vm12 = vweird.f32 %v3598_v18 }
 0x2d0   :  { %v652_v3 = vmul.f32 %v2983_v14, %v651_v30  ;;  %v648_v49 = vmul.f32 %v3489_v38, %v647_v43  ;;  %2777 = vmatmul.msk.f32.gmra.mxu3 %vm429_vm3, %v723_v45  ;;  %v737_v63 = vsel %vm734_vm10, %v736_v36, %v732_v31  ;;  %v675_v8 = vand.u32 2147483648, %v3603_v20  ;;  %vm3660_vm15 = vmor %vm744_vm13, %vm745_vm12 }
 0x2d1   :  { %v742_v51 = vmul.f32 %v3598_v18, %v741_v39  ;;  %v738_v44 = vmul.f32 %v3483_v29, %v737_v63  ;;  %v748_v17 = vand.u32 2147483647, %v3571_v37  ;;  %v673_v15 = vand.u32 2147483647, %v3603_v20 }
 0x2d2   :  { %v653_v54 = vadd.f32 %v2983_v14, %v652_v3  ;;  %2772 = vmatmul.msk.f32.gmra.mxu2 %vm429_vm3, %v648_v49  ;;  %v751_v29 = vor.u32 1.1754944e-38, %v750_v2  ;;  %vm669_vm0 = vweird.f32 %v3603_v20  ;;  %v676_v25 = vor.u32 1.1754944e-38, %v675_v8 }
 0x2d3   :  { %v3633_v38 = vpop.eup %2986  ;;  %v743_v41 = vadd.f32 %v3598_v18, %v742_v51  ;;  %vm749_vm4 = vcmp.eq.f32.partialorder %v748_v17, 8.507059e+37  ;;  %vm674_vm5 = vcmp.eq.f32.partialorder %v673_v15, 8.507059e+37  ;;  %v765_v32 = vand.u32 2147483648, %v3601_v22 }
 0x2d4   :  { %v2989_v55 = vpop.eup %2988  ;;  %v755_v58 = vmul.f32 %v3633_v38, %v3601_v22  ;;  %v3644_v60 = vpop.xlane.xlu1 %548  ;;  %v657_v42 = vsel %vm3636_vm9, %v2983_v14, %v653_v54  ;;  %vm760_vm6 = vweird.f32 %v3633_v38  ;;  %vm759_vm7 = vweird.f32 %v3601_v22 }
 0x2d5   :  { %v3642_v53 = vpop.xlane.xlu2 %566  ;;  %v665_v62 = vmul.f32 %v2989_v55, %v3603_v20  ;;  %v662_v7 = vsel %vm659_vm11, %v661_v48, %v657_v42  ;;  %vm670_vm14 = vweird.f32 %v2989_v55  ;;  %v690_v43 = vand.u32 2147483648, %v3644_v60  ;;  %vm3689_vm9 = vmor %vm759_vm7, %vm760_vm6 }
 0x2d6   :  { %2990 = vrcp.f32 %v3642_v53  ;;  %v756_v1 = vsub.f32 1.0, %v755_v58  ;;  %v663_v9 = vmul.f32 %v3497_v47, %v662_v7  ;;  %v747_v47 = vsel %vm3660_vm15, %v3598_v18, %v743_v41  ;;  %vm671_vm1 = vmor %vm669_vm0, %vm670_vm14 }
 0x2d7   :  { %2992 = vrcp.f32 %v3644_v60  ;;  %v666_v6 = vsub.f32 1.0, %v665_v62  ;;  %v752_v20 = vsel %vm749_vm4, %v751_v29, %v747_v47  ;;  %v763_v49 = vand.u32 2147483647, %v3601_v22 }
 0x2d8   :  { %v757_v16 = vmul.f32 %v3633_v38, %v756_v1  ;;  %2778 = vmatmul.msk.f32.gmra.mxu3 %vm429_vm3, %v738_v44  ;;  %v753_v45 = vmul.f32 %v3499_v50, %v752_v20  ;;  %v688_v59 = vand.u32 2147483647, %v3644_v60  ;;  %v766_v50 = vor.u32 1.1754944e-38, %v765_v32 }
 0x2d9   :  { %v667_v14 = vmul.f32 %v2989_v55, %v666_v6  ;;  %vm684_vm10 = vweird.f32 %v3644_v60  ;;  %vm764_vm12 = vcmp.eq.f32.partialorder %v763_v49, 8.507059e+37  ;;  %vm774_vm15 = vweird.f32 %v3642_v53 }
 0x2da   :  { %2773 = vmatmul.msk.f32.gmra.mxu2 %vm429_vm3, %v663_v9  ;;  %v758_v39 = vadd.f32 %v3633_v38, %v757_v16  ;;  %vm689_vm13 = vcmp.eq.f32.partialorder %v688_v59, 8.507059e+37  ;;  %v778_v41 = vand.u32 2147483647, %v3642_v53 }
 0x2db   :  { %v3673_v37 = vpop.xlane.xlu0 %569  ;;  %v668_v46 = vadd.f32 %v2989_v55, %v667_v14 }
 0x2dc   :  { %v3669_v19 = vpop.eup %2990  ;;  %2994 = vrcp.f32 %v3673_v37  ;;  %v793_v14 = vand.u32 2147483647, %v3673_v37 }
 0x2dd   :  { %v2993_v23 = vpop.eup %2992  ;;  %v770_v27 = vmul.f32 %v3669_v19, %v3642_v53  ;;  %v672_v30 = vsel %vm671_vm1, %v2989_v55, %v668_v46  ;;  %v691_v55 = vor.u32 1.1754944e-38, %v690_v43  ;;  %vm775_vm14 = vweird.f32 %v3669_v19 }
 0x2de   :  { %v680_v18 = vmul.f32 %v2993_v23, %v3644_v60  ;;  %v677_v35 = vsel %vm674_vm5, %v676_v25, %v672_v30  ;;  %vm685_vm8 = vweird.f32 %v2993_v23  ;;  %v780_v60 = vand.u32 2147483648, %v3642_v53  ;;  %vm776_vm0 = vmor %vm774_vm15, %vm775_vm14 }
 0x2df   :  { %v771_v34 = vsub.f32 1.0, %v770_v27  ;;  %v678_v3 = vmul.f32 %v3509_v61, %v677_v35  ;;  %v762_v61 = vsel %vm3689_vm9, %v3633_v38, %v758_v39  ;;  %vm686_vm11 = vmor %vm684_vm10, %vm685_vm8  ;;  %vm779_vm1 = vcmp.eq.f32.partialorder %v778_v41, 8.507059e+37  ;;  %v989_v35 = vld [vmem:[%s4575_s10 + $0x8] sm:$0xff] }
 0x2e0   :  { %v681_v33 = vsub.f32 1.0, %v680_v18  ;;  %2779 = vmatmul.msk.f32.gmra.mxu3 %vm429_vm3, %v753_v45  ;;  %v767_v58 = vsel %vm764_vm12, %v766_v50, %v762_v61  ;;  %v781_v8 = vor.u32 1.1754944e-38, %v780_v60  ;;  %vm789_vm5 = vweird.f32 %v3673_v37  ;;  %v991_v18 = vld [vmem:[%s4575_s10 + $0x18] sm:$0xff] }
 0x2e1   :  { %v772_v31 = vmul.f32 %v3669_v19, %v771_v34  ;;  %v768_v1 = vmul.f32 %v3507_v57, %v767_v58  ;;  %v795_v57 = vand.u32 2147483648, %v3673_v37  ;;  %vm794_vm7 = vcmp.eq.f32.partialorder %v793_v14, 8.507059e+37  ;;  %1020 = vmatpush.msra.mxu0 %v991_v18 }
 0x2e2   :  { %v682_v52 = vmul.f32 %v2993_v23, %v681_v33  ;;  %v2995_v54 = vpop.eup %2994  ;;  %2774 = vmatmul.msk.f32.gmra.mxu2 %vm429_vm3, %v678_v3 }
 0x2e3   :  { %v785_v22 = vmul.f32 %v2995_v54, %v3673_v37  ;;  %v573_v36 = vpop.xlane.xlu1 %572  ;;  %v773_v38 = vadd.f32 %v3669_v19, %v772_v31  ;;  %vm790_vm4 = vweird.f32 %v2995_v54  ;;  %v796_v16 = vor.u32 1.1754944e-38, %v795_v57 }
 0x2e4   :  { %v683_v13 = vadd.f32 %v2993_v23, %v682_v52  ;;  %2996 = vrcp.f32 %v573_v36  ;;  %vm791_vm6 = vmor %vm789_vm5, %vm790_vm4  ;;  %v810_v29 = vand.u32 2147483648, %v573_v36  ;;  %vm804_vm9 = vweird.f32 %v573_v36  ;;  %v3737_v52 = vld [vmem:[%s4608_s29] ss:$0 sm:$0xff] }
 0x2e5   :  { %v786_v42 = vsub.f32 1.0, %v785_v22  ;;  %v777_v7 = vsel %vm776_vm0, %v3669_v19, %v773_v38 }
 0x2e6   :  { %v687_v48 = vsel %vm686_vm11, %v2993_v23, %v683_v13  ;;  %v782_v44 = vsel %vm779_vm1, %v781_v8, %v777_v7  ;;  %v808_v23 = vand.u32 2147483647, %v573_v36  ;;  %v811_v37 = vor.u32 1.1754944e-38, %v810_v29 }
 0x2e7   :  { %v692_v62 = vsel %vm689_vm13, %v691_v55, %v687_v48  ;;  %v787_v6 = vmul.f32 %v2995_v54, %v786_v42  ;;  %v783_v53 = vmul.f32 %v3516_v40, %v782_v44  ;;  %v3759_v44 = vld [vmem:[%s4608_s29 + $0x1] ss:$0 sm:$0xff] }
 0x2e8   :  { %v693_v63 = vmul.f32 %v3518_v4, %v692_v62  ;;  %2780 = vmatmul.msk.f32.gmra.mxu3 %vm429_vm3, %v768_v1  ;;  %vm809_vm11 = vcmp.eq.f32.partialorder %v808_v23, 8.507059e+37 }
 0x2e9   :  { %v788_v17 = vadd.f32 %v2995_v54, %v787_v6 }
 0x2ea   :  { %v2997_v2 = vpop.eup %2996  ;;  %2775 = vmatmul.msk.f32.gmra.mxu2 %vm429_vm3, %v693_v63 }
 0x2eb   :  { %v800_v9 = vmul.f32 %v2997_v2, %v573_v36  ;;  %v792_v11 = vsel %vm791_vm6, %v2995_v54, %v788_v17  ;;  %vm805_vm8 = vweird.f32 %v2997_v2 }
 0x2ec   :  { %v797_v47 = vsel %vm794_vm7, %v796_v16, %v792_v11  ;;  %vm806_vm10 = vmor %vm804_vm9, %vm805_vm8 }
 0x2ed   :  { %v801_v4 = vsub.f32 1.0, %v800_v9  ;;  %v798_v46 = vmul.f32 %v3525_v10, %v797_v47  ;;  %v990_v10 = vld [vmem:[%s4575_s10 + $0x10] sm:$0xff] }
 0x2ee   :  { %1021 = vmatpush.msra.mxu0 %v990_v10 }
 0x2ef   :  { %v802_v15 = vmul.f32 %v2997_v2, %v801_v4 }
 0x2f0   :  { %2781 = vmatmul.msk.f32.gmra.mxu3 %vm429_vm3, %v783_v53  ;;  %1022 = vmatpush.msra.mxu0 %v989_v35 }
 0x2f1   :  { %v803_v19 = vadd.f32 %v2997_v2, %v802_v15 }
 0x2f3   :  { %v807_v40 = vsel %vm806_vm10, %v2997_v2, %v803_v19  ;;  %v3776_v19 = vld [vmem:[%s4608_s29 + $0x3] ss:$0 sm:$0xff] }
 0x2f4   :  { %v812_v25 = vsel %vm809_vm11, %v811_v37, %v807_v40  ;;  %vm1217_vm11 = vcmask 523264  }
 0x2f5   :  { %v813_v27 = vmul.f32 %v3529_v12, %v812_v25  ;;  %v988_v12 = vld [vmem:[%s4575_s10] sm:$0xff] }
 0x2f6   :  { %1023 = vmatpush.msra.mxu0 %v988_v12 }
 0x2f8   :  { %2782 = vmatmul.msk.f32.gmra.mxu3 %vm429_vm3, %v798_v46 }
 0x300   :  { %2783 = vmatmul.msk.f32.gmra.mxu3 %vm429_vm3, %v813_v27 }
 0x332   :  { %v855_v30 = vpop.f32.mrf.mxu2 }
 0x333   :  { %v944_v59 = vmul.f32 %v3737_v52, %v855_v30 }
 0x335   :  { %v960_v31 = vsel %vm143_vm2, %v944_v59, 0.0 }
 0x33a   :  { %v858_v20 = vpop.f32.mrf.mxu2 }
 0x33b   :  { %v945_v58 = vmul.f32 %v3737_v52, %v858_v20 }
 0x33d   :  { %v967_v63 = vsel %vm143_vm2, %v945_v58, 0.0 }
 0x342   :  { %v861_v34 = vpop.f32.mrf.mxu2 }
 0x343   :  { %v946_v49 = vmul.f32 %v3366_v56, %v861_v34 }
 0x345   :  { %v961_v54 = vsel %vm143_vm2, %v946_v49, 0.0 }
 0x346   :  { %v962_v22 = vadd.f32 %v961_v54, %v960_v31 }
 0x34a   :  { %v920_v32 = vpop.f32.mrf.mxu3 }
 0x34b   :  { %v864_v39 = vpop.f32.mrf.mxu2  ;;  %v952_v17 = vmul.f32 %v3737_v52, %v920_v32  ;;  %v2916_v32 = vld [vmem:[%s4576_s11] ss:$0 sm:$0xff] }
 0x34c   :  { %v947_v13 = vmul.f32 %v3366_v56, %v864_v39 }
 0x34d   :  { %v974_v14 = vsel %vm143_vm2, %v952_v17, 0.0 }
 0x34e   :  { %v968_v60 = vsel %vm143_vm2, %v947_v13, 0.0 }
 0x34f   :  { %v969_v56 = vadd.f32 %v968_v60, %v967_v63 }
 0x353   :  { %v923_v33 = vpop.f32.mrf.mxu3 }
 0x354   :  { %v953_v23 = vmul.f32 %v3737_v52, %v923_v33 }
 0x355   :  { %v867_v3 = vpop.f32.mrf.mxu2 }
 0x356   :  { %v948_v51 = vmul.f32 %v3378_v0, %v867_v3  ;;  %v981_v18 = vsel %vm143_vm2, %v953_v23, 0.0 }
 0x358   :  { %v963_v61 = vsel %vm143_vm2, %v948_v51, 0.0 }
 0x359   :  { %v964_v48 = vadd.f32 %v963_v61, %v962_v22 }
 0x35b   :  { %v926_v43 = vpop.f32.mrf.mxu3 }
 0x35c   :  { %v954_v4 = vmul.f32 %v3759_v44, %v926_v43 }
 0x35d   :  { %v870_v45 = vpop.f32.mrf.mxu2 }
 0x35e   :  { %v949_v42 = vmul.f32 %v3378_v0, %v870_v45  ;;  %v975_v53 = vsel %vm143_vm2, %v954_v4, 0.0 }
 0x35f   :  { %v976_v11 = vadd.f32 %v975_v53, %v974_v14 }
 0x360   :  { %v970_v1 = vsel %vm143_vm2, %v949_v42, 0.0 }
 0x361   :  { %v971_v7 = vadd.f32 %v970_v1, %v969_v56  ;;  %v1155_v56 = vld [vmem:[%s4577_s12 + $0x18] sm:$0xff] }
 0x362   :  { %1184 = vmatpush.msrb.mxu1 %v1155_v56 }
 0x363   :  { %v929_v50 = vpop.f32.mrf.mxu3 }
 0x364   :  { %v955_v47 = vmul.f32 %v3759_v44, %v929_v50 }
 0x365   :  { %v873_v36 = vpop.f32.mrf.mxu2 }
 0x366   :  { %v950_v55 = vmul.f32 %v3391_v5, %v873_v36  ;;  %v982_v27 = vsel %vm143_vm2, %v955_v47, 0.0 }
 0x367   :  { %v983_v10 = vadd.f32 %v982_v27, %v981_v18 }
 0x368   :  { %v965_v62 = vsel %vm143_vm2, %v950_v55, 0.0 }
 0x369   :  { %v966_v38 = vadd.f32 %v965_v62, %v964_v48  ;;  %v3130_v48 = vmov 32.0  }
 0x36a   :  { %2998 = vrcp.f32 %v3130_v48 }
 0x36b   :  { %2784 = vmatmul.msk.f32.vlgmr.msra.gmra.mxu0 %vm143_vm2, %v966_v38  ;;  %v932_v41 = vpop.f32.mrf.mxu3 }
 0x36d   :  { %v876_v2 = vpop.f32.mrf.mxu2 }
 0x36e   :  { %v951_v6 = vmul.f32 %v3391_v5, %v876_v2  ;;  %v3766_v5 = vld [vmem:[%s4608_s29 + $0x2] ss:$0 sm:$0xff] }
 0x36f   :  { %v956_v57 = vmul.f32 %v3766_v5, %v932_v41 }
 0x370   :  { %v972_v8 = vsel %vm143_vm2, %v951_v6, 0.0 }
 0x371   :  { %v973_v0 = vadd.f32 %v972_v8, %v971_v7  ;;  %v977_v15 = vsel %vm143_vm2, %v956_v57, 0.0 }
 0x372   :  { %v978_v46 = vadd.f32 %v977_v15, %v976_v11 }
 0x373   :  { %2785 = vmatmul.msk.f32.gmra.mxu0 %vm143_vm2, %v973_v0  ;;  %v935_v9 = vpop.f32.mrf.mxu3 }
 0x374   :  { %v957_v40 = vmul.f32 %v3766_v5, %v935_v9 }
 0x376   :  { %v984_v30 = vsel %vm143_vm2, %v957_v40, 0.0  ;;  %v1153_v40 = vld [vmem:[%s4577_s12 + $0x8] sm:$0xff] }
 0x377   :  { %v985_v35 = vadd.f32 %v984_v30, %v983_v10 }
 0x37b   :  { %v938_v16 = vpop.f32.mrf.mxu3 }
 0x37c   :  { %v958_v29 = vmul.f32 %v3776_v19, %v938_v16 }
 0x37e   :  { %v979_v37 = vsel %vm143_vm2, %v958_v29, 0.0  ;;  %v1154_v29 = vld [vmem:[%s4577_s12 + $0x10] sm:$0xff] }
 0x37f   :  { %v980_v25 = vadd.f32 %v979_v37, %v978_v46  ;;  %1185 = vmatpush.msrb.mxu1 %v1154_v29 }
 0x381   :  { %2786 = vmatmul.msk.f32.gmra.mxu0 %vm143_vm2, %v980_v25  ;;  %1186 = vmatpush.msrb.mxu1 %v1153_v40  ;;  %v1152_v25 = vld [vmem:[%s4577_s12] sm:$0xff] }
 0x383   :  { %v941_v20 = vpop.f32.mrf.mxu3  ;;  %1187 = vmatpush.msrb.mxu1 %v1152_v25  ;;  %v1206_v25 = vld [vmem:[%s4579_s14 + $0x8] sm:$0xff] }
 0x384   :  { %v959_v34 = vmul.f32 %v3776_v19, %v941_v20 }
 0x386   :  { %v986_v12 = vsel %vm143_vm2, %v959_v34, 0.0 }
 0x387   :  { %v987_v39 = vadd.f32 %v986_v12, %v985_v35 }
 0x389   :  { %2787 = vmatmul.msk.f32.gmra.mxu0 %vm143_vm2, %v987_v39 }
 0x3e8   :  { %v1025_v33 = vpop.f32.mrf.mxu0 }
 0x3e9   :  { %v1026_v3 = vadd.f32 %v2916_v32, %v1025_v33 }
 0x3eb   :  { %v1037_v43 = vadd.f32 %v1026_v3, %v3311_v21  ;;  %v3839_v3 = vld [vmem:[%s4581_s16] ss:$0 sm:$0xff] }
 0x3ed   :  { %v1043_v45 = vsel %vm143_vm2, %v1037_v43, 0.0 }
 0x3ee   :  { %1044 = vadd.xlane.f32.xlu2 %v1043_v45 }
 0x3f0   :  { %v1028_v49 = vpop.f32.mrf.mxu0 }
 0x3f1   :  { %v1029_v59 = vadd.f32 %v2916_v32, %v1028_v49 }
 0x3f3   :  { %v1038_v51 = vadd.f32 %v1029_v59, %v3322_v24  ;;  %v2999_v24 = vpop.eup %2998 }
 0x3f4   :  { %v1056_v58 = vmul.f32 32.0, %v2999_v24  ;;  %vm1060_vm12 = vweird.f32 %v2999_v24 }
 0x3f5   :  { %v1046_v54 = vsel %vm143_vm2, %v1038_v51, 0.0 }
 0x3f6   :  { %1047 = vadd.xlane.f32.xlu0 %v1046_v54  ;;  %v1057_v42 = vsub.f32 1.0, %v1056_v58 }
 0x3f8   :  { %v1058_v62 = vmul.f32 %v2999_v24, %v1057_v42 }
 0x3fa   :  { %v1059_v38 = vadd.f32 %v2999_v24, %v1058_v62 }
 0x3fc   :  { %v3800_v60 = vsel %vm1060_vm12, %v2999_v24, %v1059_v38  ;;  %v1210_v24 = vld [vmem:[%s4579_s14 + $0x28] sm:$0xff]  ;;  %v1209_v38 = vld [vmem:[%s4579_s14 + $0x20] sm:$0xff] }
 0x3fe   :  { %v1031_v31 = vpop.f32.mrf.mxu0 }
 0x3ff   :  { %v1032_v61 = vadd.f32 %v2916_v32, %v1031_v31 }
 0x401   :  { %v1039_v50 = vadd.f32 %v1032_v61, %v3330_v26 }
 0x403   :  { %v1049_v22 = vsel %vm143_vm2, %v1039_v50, 0.0 }
 0x404   :  { %1050 = vadd.xlane.f32.xlu1 %v1049_v22 }
 0x406   :  { %v1034_v36 = vpop.f32.mrf.mxu0 }
 0x407   :  { %v1035_v13 = vadd.f32 %v2916_v32, %v1034_v36 }
 0x409   :  { %v1040_v21 = vadd.f32 %v1035_v13, %v3338_v28 }
 0x40b   :  { %v1052_v55 = vsel %vm143_vm2, %v1040_v21, 0.0 }
 0x40c   :  { %1053 = vadd.xlane.f32.xlu2 %v1052_v55  ;;  %v1211_v55 = vld [vmem:[%s4579_s14 + $0x30] sm:$0xff] }
 0x461   :  { %v1045_v26 = vpop.xlane.xlu2 %1044 }
 0x462   :  { %v1062_v63 = vmul.f32 %v3800_v60, %v1045_v26 }
 0x464   :  { %v1066_v1 = vsub.f32 %v1037_v43, %v1062_v63 }
 0x466   :  { %v1070_v41 = vmul.f32 %v1066_v1, %v1066_v1 }
 0x468   :  { %v1074_v28 = vsel %vm143_vm2, %v1070_v41, 0.0  ;;  %v1208_v41 = vld [vmem:[%s4579_s14 + $0x18] sm:$0xff] }
 0x469   :  { %1075 = vadd.xlane.f32.xlu0 %v1074_v28  ;;  %v1048_v2 = vpop.xlane.xlu0 %1047 }
 0x46a   :  { %v1063_v6 = vmul.f32 %v3800_v60, %v1048_v2 }
 0x46c   :  { %v3808_v7 = vsub.f32 %v1038_v51, %v1063_v6  ;;  %v2918_v51 = vld [vmem:[%s4582_s17] ss:$0 sm:$0xff] }
 0x46e   :  { %v1071_v8 = vmul.f32 %v3808_v7, %v3808_v7 }
 0x470   :  { %v1077_v0 = vsel %vm143_vm2, %v1071_v8, 0.0 }
 0x471   :  { %1078 = vadd.xlane.f32.xlu1 %v1077_v0 }
 0x477   :  { %v1051_v9 = vpop.xlane.xlu1 %1050 }
 0x478   :  { %v1064_v4 = vmul.f32 %v3800_v60, %v1051_v9 }
 0x47a   :  { %v3814_v17 = vsub.f32 %v1039_v50, %v1064_v4 }
 0x47c   :  { %v1072_v57 = vmul.f32 %v3814_v17, %v3814_v17 }
 0x47e   :  { %v1080_v53 = vsel %vm143_vm2, %v1072_v57, 0.0 }
 0x47f   :  { %v1054_v14 = vpop.xlane.xlu2 %1053  ;;  %1081 = vadd.xlane.f32.xlu2 %v1080_v53 }
 0x480   :  { %v1065_v15 = vmul.f32 %v3800_v60, %v1054_v14 }
 0x482   :  { %v3820_v11 = vsub.f32 %v1040_v21, %v1065_v15  ;;  %v1212_v21 = vld [vmem:[%s4579_s14 + $0x38] sm:$0xff] }
 0x483   :  { %1238 = vmatpush.msrb.mxu2 %v1212_v21 }
 0x484   :  { %v1073_v16 = vmul.f32 %v3820_v11, %v3820_v11 }
 0x485   :  { %1239 = vmatpush.msrb.mxu2 %v1211_v55 }
 0x486   :  { %v1083_v47 = vsel %vm143_vm2, %v1073_v16, 0.0 }
 0x487   :  { %1084 = vadd.xlane.f32.xlu0 %v1083_v47  ;;  %1240 = vmatpush.msrb.mxu2 %v1210_v24 }
 0x489   :  { %1241 = vmatpush.msrb.mxu2 %v1209_v38 }
 0x48b   :  { %1242 = vmatpush.msrb.mxu2 %v1208_v41 }
 0x4dc   :  { %v1076_v46 = vpop.xlane.xlu0 %1075 }
 0x4dd   :  { %v1086_v23 = vmul.f32 %v1076_v46, %v3800_v60 }
 0x4df   :  { %v1090_v37 = vadd.f32 1e-05, %v1086_v23 }
 0x4e1   :  { %3000 = vrsqrt.f32 %v1090_v37  ;;  %vm1100_vm14 = vweird.f32 %v1090_v37 }
 0x4e4   :  { %v1079_v27 = vpop.xlane.xlu1 %1078 }
 0x4e5   :  { %v1087_v18 = vmul.f32 %v1079_v27, %v3800_v60  ;;  %v1205_v27 = vld [vmem:[%s4579_s14] sm:$0xff] }
 0x4e7   :  { %v3001_v30 = vpop.eup %3000  ;;  %v1091_v10 = vadd.f32 1e-05, %v1087_v18 }
 0x4e8   :  { %v1095_v20 = vmul.f32 %v3001_v30, %v1090_v37  ;;  %vm1101_vm13 = vweird.f32 %v3001_v30 }
 0x4e9   :  { %3002 = vrsqrt.f32 %v1091_v10  ;;  %vm1102_vm15 = vmor %vm1100_vm14, %vm1101_vm13  ;;  %vm1110_vm1 = vweird.f32 %v1091_v10 }
 0x4ea   :  { %v1096_v34 = vmul.f32 %v3001_v30, %v1095_v20 }
 0x4ec   :  { %v1097_v35 = vmul.f32 0.5, %v1096_v34 }
 0x4ee   :  { %v1098_v12 = vsub.f32 1.5, %v1097_v35 }
 0x4ef   :  { %v3003_v39 = vpop.eup %3002 }
 0x4f0   :  { %v1099_v32 = vmul.f32 %v3001_v30, %v1098_v12  ;;  %v1105_v33 = vmul.f32 %v3003_v39, %v1091_v10  ;;  %vm1111_vm0 = vweird.f32 %v3003_v39 }
 0x4f1   :  { %vm1112_vm4 = vmor %vm1110_vm1, %vm1111_vm0 }
 0x4f2   :  { %v1103_v43 = vsel %vm1102_vm15, %v3001_v30, %v1099_v32  ;;  %v1106_v45 = vmul.f32 %v3003_v39, %v1105_v33  ;;  %v1082_v59 = vpop.xlane.xlu2 %1081 }
 0x4f3   :  { %v1134_v49 = vmul.f32 %v1103_v43, %v1066_v1  ;;  %v1088_v31 = vmul.f32 %v1082_v59, %v3800_v60 }
 0x4f4   :  { %v1107_v54 = vmul.f32 0.5, %v1106_v45  ;;  %v2920_v45 = vld [vmem:[%s4580_s15] ss:$0 sm:$0xff] }
 0x4f5   :  { %v1141_v61 = vmul.f32 %v3839_v3, %v1134_v49  ;;  %v1092_v22 = vadd.f32 1e-05, %v1088_v31 }
 0x4f6   :  { %v1108_v50 = vsub.f32 1.5, %v1107_v54 }
 0x4f7   :  { %v3846_v36 = vadd.f32 %v2918_v51, %v1141_v61  ;;  %3004 = vrsqrt.f32 %v1092_v22  ;;  %vm1120_vm6 = vweird.f32 %v1092_v22 }
 0x4f8   :  { %v1109_v13 = vmul.f32 %v3003_v39, %v1108_v50 }
 0x4f9   :  { %2788 = vmatmul.msk.f32.vlgmr.msrb.gmra.mxu1 %vm143_vm2, %v3846_v36 }
 0x4fa   :  { %v1113_v48 = vsel %vm1112_vm4, %v3003_v39, %v1109_v13  ;;  %v1085_v58 = vpop.xlane.xlu0 %1084 }
 0x4fb   :  { %v1135_v42 = vmul.f32 %v1113_v48, %v3808_v7  ;;  %v1089_v62 = vmul.f32 %v1085_v58, %v3800_v60 }
 0x4fd   :  { %v1142_v26 = vmul.f32 %v3839_v3, %v1135_v42  ;;  %v3005_v63 = vpop.eup %3004  ;;  %v1093_v1 = vadd.f32 1e-05, %v1089_v62 }
 0x4fe   :  { %v1115_v28 = vmul.f32 %v3005_v63, %v1092_v22  ;;  %vm1121_vm5 = vweird.f32 %v3005_v63 }
 0x4ff   :  { %v3868_v56 = vadd.f32 %v2918_v51, %v1142_v26  ;;  %3006 = vrsqrt.f32 %v1093_v1  ;;  %vm1122_vm7 = vmor %vm1120_vm6, %vm1121_vm5  ;;  %vm1130_vm9 = vweird.f32 %v1093_v1 }
 0x500   :  { %v1116_v2 = vmul.f32 %v3005_v63, %v1115_v28 }
 0x501   :  { %2789 = vmatmul.msk.f32.gmra.mxu1 %vm143_vm2, %v3868_v56 }
 0x502   :  { %v1117_v6 = vmul.f32 0.5, %v1116_v2 }
 0x504   :  { %v1118_v7 = vsub.f32 1.5, %v1117_v6 }
 0x505   :  { %v3007_v8 = vpop.eup %3006 }
 0x506   :  { %v1119_v0 = vmul.f32 %v3005_v63, %v1118_v7  ;;  %v1125_v9 = vmul.f32 %v3007_v8, %v1093_v1  ;;  %vm1131_vm8 = vweird.f32 %v3007_v8 }
 0x507   :  { %vm1132_vm10 = vmor %vm1130_vm9, %vm1131_vm8 }
 0x508   :  { %v1123_v4 = vsel %vm1122_vm7, %v3005_v63, %v1119_v0  ;;  %v1126_v57 = vmul.f32 %v3007_v8, %v1125_v9 }
 0x509   :  { %v1136_v53 = vmul.f32 %v1123_v4, %v3814_v17  ;;  %v1207_v17 = vld [vmem:[%s4579_s14 + $0x10] sm:$0xff] }
 0x50a   :  { %v1127_v14 = vmul.f32 0.5, %v1126_v57  ;;  %1243 = vmatpush.msrb.mxu2 %v1207_v17 }
 0x50b   :  { %v1143_v15 = vmul.f32 %v3839_v3, %v1136_v53 }
 0x50c   :  { %v1128_v16 = vsub.f32 1.5, %v1127_v14  ;;  %1244 = vmatpush.msrb.mxu2 %v1206_v25 }
 0x50d   :  { %v1150_v47 = vadd.f32 %v2918_v51, %v1143_v15 }
 0x50e   :  { %v1129_v29 = vmul.f32 %v3007_v8, %v1128_v16  ;;  %1245 = vmatpush.msrb.mxu2 %v1205_v27  ;;  %v2797_v27 = vld [vmem:[%s4604_s30 + $0x28] sm:$0xff] }
 0x50f   :  { %2790 = vmatmul.msk.f32.gmra.mxu1 %vm143_vm2, %v1150_v47 }
 0x510   :  { %v1133_v46 = vsel %vm1132_vm10, %v3007_v8, %v1129_v29  ;;  %v2808_v29 = vld [vmem:[%s4605_s23 + $0x38] sm:$0xff] }
 0x511   :  { %v1137_v23 = vmul.f32 %v1133_v46, %v3820_v11  ;;  %v2919_v11 = vld [vmem:[%s4578_s13] ss:$0 sm:$0xff]  ;;  %v2817_v46 = vld [vmem:[%s4606_s6 + $0x38] sm:$0xff]  ;;  %1440 = vmatpush.msrb.mxu0 %v2808_v29 }
 0x512   :  { %1479 = vmatpush.msra.mxu1 %v2817_v46 }
 0x513   :  { %v1144_v40 = vmul.f32 %v3839_v3, %v1137_v23  ;;  %v2798_v23 = vld [vmem:[%s4604_s30 + $0x30] sm:$0xff] }
 0x515   :  { %v1151_v37 = vadd.f32 %v2918_v51, %v1144_v40  ;;  %v2807_v40 = vld [vmem:[%s4605_s23 + $0x30] sm:$0xff] }
 0x516   :  { %1441 = vmatpush.msrb.mxu0 %v2807_v40 }
 0x517   :  { %2791 = vmatmul.msk.f32.gmra.mxu1 %vm143_vm2, %v1151_v37 }
 0x576   :  { %v1189_v18 = vpop.f32.mrf.mxu1 }
 0x577   :  { %v1190_v30 = vadd.f32 %v2919_v11, %v1189_v18  ;;  %v2815_v18 = vld [vmem:[%s4606_s6 + $0x28] sm:$0xff] }
 0x579   :  { %v1201_v10 = vmax.f32 %v1190_v30, 0.0 }
 0x57b   :  { %2792 = vmatmul.msk.f32.vlgmr.msrb.gmra.mxu2 %vm1217_vm11, %v1201_v10  ;;  %v2796_v10 = vld [vmem:[%s4604_s30 + $0x20] sm:$0xff] }
 0x57e   :  { %v1192_v20 = vpop.f32.mrf.mxu1 }
 0x57f   :  { %v1193_v34 = vadd.f32 %v2919_v11, %v1192_v20  ;;  %v2805_v20 = vld [vmem:[%s4605_s23 + $0x20] sm:$0xff] }
 0x581   :  { %v1202_v35 = vmax.f32 %v1193_v34, 0.0  ;;  %v2814_v34 = vld [vmem:[%s4606_s6 + $0x20] sm:$0xff] }
 0x583   :  { %2793 = vmatmul.msk.f32.gmra.mxu2 %vm1217_vm11, %v1202_v35 }
 0x58c   :  { %v1195_v12 = vpop.f32.mrf.mxu1 }
 0x58d   :  { %v1196_v39 = vadd.f32 %v2919_v11, %v1195_v12 }
 0x58f   :  { %v1203_v32 = vmax.f32 %v1196_v39, 0.0 }
 0x591   :  { %2794 = vmatmul.msk.f32.gmra.mxu2 %vm1217_vm11, %v1203_v32 }
 0x594   :  { %v1198_v33 = vpop.f32.mrf.mxu1 }
 0x595   :  { %v1199_v3 = vadd.f32 %v2919_v11, %v1198_v33  ;;  %v2806_v11 = vld [vmem:[%s4605_s23 + $0x28] sm:$0xff] }
 0x596   :  { %1442 = vmatpush.msrb.mxu0 %v2806_v11 }
 0x597   :  { %v1204_v43 = vmax.f32 %v1199_v3, 0.0 }
 0x598   :  { %1443 = vmatpush.msrb.mxu0 %v2805_v20 }
 0x599   :  { %2795 = vmatmul.msk.f32.gmra.mxu2 %vm1217_vm11, %v1204_v43 }
 0x5fe   :  { %v1247_v49 = vpop.f32.mrf.mxu2 }
 0x5ff   :  { %v1248_v59 = vadd.f32 %v2920_v45, %v1247_v49 }
 0x601   :  { %v1259_v51 = vadd.f32 %v1248_v59, %v3846_v36 }
 0x603   :  { %v1265_v54 = vsel %vm143_vm2, %v1259_v51, 0.0 }
 0x604   :  { %1266 = vadd.xlane.f32.xlu1 %v1265_v54  ;;  %v2921_v54 = vld [vmem:[%s4583_s18] ss:$0 sm:$0xff] }
 0x606   :  { %v1250_v31 = vpop.f32.mrf.mxu2 }
 0x607   :  { %v1251_v61 = vadd.f32 %v2920_v45, %v1250_v31 }
 0x609   :  { %v1260_v50 = vadd.f32 %v1251_v61, %v3868_v56 }
 0x60b   :  { %v1268_v22 = vsel %vm143_vm2, %v1260_v50, 0.0 }
 0x60c   :  { %1269 = vadd.xlane.f32.xlu2 %v1268_v22 }
 0x614   :  { %v1253_v13 = vpop.f32.mrf.mxu2 }
 0x615   :  { %v1254_v21 = vadd.f32 %v2920_v45, %v1253_v13  ;;  %v2922_v13 = vld [vmem:[%s4584_s19] ss:$0 sm:$0xff] }
 0x617   :  { %v1261_v55 = vadd.f32 %v1254_v21, %v1150_v47  ;;  %v2799_v47 = vld [vmem:[%s4604_s30 + $0x38] sm:$0xff] }
 0x618   :  { %1401 = vmatpush.msrb.mxu3 %v2799_v47 }
 0x619   :  { %v1271_v48 = vsel %vm143_vm2, %v1261_v55, 0.0 }
 0x61a   :  { %1272 = vadd.xlane.f32.xlu0 %v1271_v48  ;;  %1402 = vmatpush.msrb.mxu3 %v2798_v23 }
 0x61c   :  { %v1256_v24 = vpop.f32.mrf.mxu2  ;;  %1403 = vmatpush.msrb.mxu3 %v2797_v27 }
 0x61d   :  { %v1257_v58 = vadd.f32 %v2920_v45, %v1256_v24 }
 0x61e   :  { %1404 = vmatpush.msrb.mxu3 %v2796_v10  ;;  %v2925_v10 = vld [vmem:[%s4572_s7 + $0x1] ss:$0 sm:$0xff]  ;;  %s2722_s7 = sshll.u32 %s4587_s22, 4  ;;  %s2723_s7 = int_to_ptr.hbm [resolvable:$true] %s2722_s7 }
 0x61f   :  { %v1262_v42 = vadd.f32 %v1257_v58, %v1151_v37  ;;  %v2816_v37 = vld [vmem:[%s4606_s6 + $0x30] sm:$0xff] }
 0x620   :  { %1480 = vmatpush.msra.mxu1 %v2816_v37 }
 0x621   :  { %v1274_v36 = vsel %vm143_vm2, %v1262_v42, 0.0 }
 0x622   :  { %1275 = vadd.xlane.f32.xlu1 %v1274_v36  ;;  %1481 = vmatpush.msra.mxu1 %v2815_v18  ;;  %v2923_v18 = vld [vmem:[%s4573_s8 + $0x1] ss:$0 sm:$0xff] }
 0x624   :  { %1482 = vmatpush.msra.mxu1 %v2814_v34 }
 0x677   :  { %v1267_v62 = vpop.xlane.xlu1 %1266 }
 0x678   :  { %v1277_v38 = vmul.f32 %v1267_v62, %v3800_v60 }
 0x67a   :  { %v3904_v26 = vsub.f32 %v1259_v51, %v1277_v38 }
 0x67c   :  { %v1285_v63 = vmul.f32 %v3904_v26, %v3904_v26 }
 0x67e   :  { %v1289_v1 = vsel %vm143_vm2, %v1285_v63, 0.0 }
 0x67f   :  { %v1270_v41 = vpop.xlane.xlu2 %1269  ;;  %1290 = vadd.xlane.f32.xlu2 %v1289_v1 }
 0x680   :  { %v1278_v28 = vmul.f32 %v1270_v41, %v3800_v60 }
 0x682   :  { %v3910_v56 = vsub.f32 %v1260_v50, %v1278_v28 }
 0x684   :  { %v1286_v2 = vmul.f32 %v3910_v56, %v3910_v56 }
 0x686   :  { %v1292_v6 = vsel %vm143_vm2, %v1286_v2, 0.0 }
 0x687   :  { %1293 = vadd.xlane.f32.xlu0 %v1292_v6 }
 0x68d   :  { %v1273_v7 = vpop.xlane.xlu0 %1272 }
 0x68e   :  { %v1279_v8 = vmul.f32 %v1273_v7, %v3800_v60 }
 0x690   :  { %v3916_v0 = vsub.f32 %v1261_v55, %v1279_v8 }
 0x692   :  { %v1287_v9 = vmul.f32 %v3916_v0, %v3916_v0 }
 0x694   :  { %v1295_v4 = vsel %vm143_vm2, %v1287_v9, 0.0 }
 0x695   :  { %1296 = vadd.xlane.f32.xlu1 %v1295_v4  ;;  %v1276_v57 = vpop.xlane.xlu1 %1275 }
 0x696   :  { %v1280_v53 = vmul.f32 %v1276_v57, %v3800_v60 }
 0x698   :  { %v3922_v14 = vsub.f32 %v1262_v42, %v1280_v53 }
 0x69a   :  { %v1288_v15 = vmul.f32 %v3922_v14, %v3922_v14 }
 0x69c   :  { %v1298_v16 = vsel %vm143_vm2, %v1288_v15, 0.0 }
 0x69d   :  { %1299 = vadd.xlane.f32.xlu2 %v1298_v16 }
 0x6f2   :  { %v1291_v17 = vpop.xlane.xlu2 %1290 }
 0x6f3   :  { %v1301_v25 = vmul.f32 %v1291_v17, %v3800_v60 }
 0x6f5   :  { %v1305_v30 = vadd.f32 1e-05, %v1301_v25 }
 0x6f7   :  { %3008 = vrsqrt.f32 %v1305_v30  ;;  %vm1315_vm13 = vweird.f32 %v1305_v30 }
 0x6fa   :  { %v1294_v35 = vpop.xlane.xlu0 %1293 }
 0x6fb   :  { %v1302_v12 = vmul.f32 %v1294_v35, %v3800_v60 }
 0x6fd   :  { %v3009_v39 = vpop.eup %3008  ;;  %v1306_v32 = vadd.f32 1e-05, %v1302_v12 }
 0x6fe   :  { %v1310_v33 = vmul.f32 %v3009_v39, %v1305_v30  ;;  %vm1316_vm12 = vweird.f32 %v3009_v39 }
 0x6ff   :  { %3010 = vrsqrt.f32 %v1306_v32  ;;  %vm1317_vm14 = vmor %vm1315_vm13, %vm1316_vm12  ;;  %vm1325_vm0 = vweird.f32 %v1306_v32 }
 0x700   :  { %v1311_v3 = vmul.f32 %v3009_v39, %v1310_v33 }
 0x702   :  { %v1312_v43 = vmul.f32 0.5, %v1311_v3 }
 0x704   :  { %v1313_v45 = vsub.f32 1.5, %v1312_v43 }
 0x705   :  { %v3011_v49 = vpop.eup %3010 }
 0x706   :  { %v1314_v59 = vmul.f32 %v3009_v39, %v1313_v45  ;;  %v1320_v51 = vmul.f32 %v3011_v49, %v1306_v32  ;;  %vm1326_vm15 = vweird.f32 %v3011_v49 }
 0x707   :  { %vm1327_vm1 = vmor %vm1325_vm0, %vm1326_vm15 }
 0x708   :  { %v1318_v31 = vsel %vm1317_vm14, %v3009_v39, %v1314_v59  ;;  %v1321_v61 = vmul.f32 %v3011_v49, %v1320_v51  ;;  %v1297_v22 = vpop.xlane.xlu1 %1296 }
 0x709   :  { %v1349_v50 = vmul.f32 %v1318_v31, %v3904_v26  ;;  %v1303_v55 = vmul.f32 %v1297_v22, %v3800_v60 }
 0x70a   :  { %v1322_v21 = vmul.f32 0.5, %v1321_v61 }
 0x70b   :  { %v1356_v48 = vmul.f32 %v2921_v54, %v1349_v50  ;;  %v1307_v58 = vadd.f32 1e-05, %v1303_v55 }
 0x70c   :  { %v1323_v24 = vsub.f32 1.5, %v1322_v21 }
 0x70d   :  { %v3973_v42 = vadd.f32 %v2922_v13, %v1356_v48  ;;  %3012 = vrsqrt.f32 %v1307_v58  ;;  %vm1335_vm5 = vweird.f32 %v1307_v58 }
 0x70e   :  { %v1324_v36 = vmul.f32 %v3011_v49, %v1323_v24 }
 0x70f   :  { %2801 = vmatmul.msk.f32.vlgmr.msrb.gmra.mxu3 %vm143_vm2, %v3973_v42  ;;  %2810 = vmatmul.msk.f32.vlgmr.msrb.gmra.mxu0 %vm143_vm2, %v3973_v42 }
 0x710   :  { %v1328_v62 = vsel %vm1327_vm1, %v3011_v49, %v1324_v36  ;;  %2819 = vmatmul.msk.f32.vlgmr.msra.gmra.mxu1 %vm143_vm2, %v3973_v42  ;;  %v1300_v26 = vpop.xlane.xlu2 %1299 }
 0x711   :  { %v1350_v38 = vmul.f32 %v1328_v62, %v3910_v56  ;;  %v1304_v63 = vmul.f32 %v1300_v26, %v3800_v60 }
 0x713   :  { %v1357_v1 = vmul.f32 %v2921_v54, %v1350_v38  ;;  %v3013_v41 = vpop.eup %3012  ;;  %v1308_v28 = vadd.f32 1e-05, %v1304_v63 }
 0x714   :  { %v1330_v2 = vmul.f32 %v3013_v41, %v1307_v58  ;;  %vm1336_vm4 = vweird.f32 %v3013_v41 }
 0x715   :  { %v3983_v6 = vadd.f32 %v2922_v13, %v1357_v1  ;;  %3014 = vrsqrt.f32 %v1308_v28  ;;  %vm1337_vm6 = vmor %vm1335_vm5, %vm1336_vm4  ;;  %vm1345_vm8 = vweird.f32 %v1308_v28 }
 0x716   :  { %v1331_v7 = vmul.f32 %v3013_v41, %v1330_v2 }
 0x717   :  { %2802 = vmatmul.msk.f32.gmra.mxu3 %vm143_vm2, %v3983_v6  ;;  %2811 = vmatmul.msk.f32.gmra.mxu0 %vm143_vm2, %v3983_v6 }
 0x718   :  { %2820 = vmatmul.msk.f32.gmra.mxu1 %vm143_vm2, %v3983_v6  ;;  %v1332_v56 = vmul.f32 0.5, %v1331_v7 }
 0x71a   :  { %v1333_v8 = vsub.f32 1.5, %v1332_v56 }
 0x71b   :  { %v3015_v9 = vpop.eup %3014 }
 0x71c   :  { %v1334_v4 = vmul.f32 %v3013_v41, %v1333_v8  ;;  %v1340_v57 = vmul.f32 %v3015_v9, %v1308_v28  ;;  %vm1346_vm7 = vweird.f32 %v3015_v9 }
 0x71d   :  { %vm1347_vm9 = vmor %vm1345_vm8, %vm1346_vm7 }
 0x71e   :  { %v1338_v53 = vsel %vm1337_vm6, %v3013_v41, %v1334_v4  ;;  %v1341_v15 = vmul.f32 %v3015_v9, %v1340_v57 }
 0x71f   :  { %v1351_v16 = vmul.f32 %v1338_v53, %v3916_v0 }
 0x720   :  { %v1342_v47 = vmul.f32 0.5, %v1341_v15 }
 0x721   :  { %v1358_v29 = vmul.f32 %v2921_v54, %v1351_v16 }
 0x722   :  { %v1343_v46 = vsub.f32 1.5, %v1342_v47 }
 0x723   :  { %v3992_v23 = vadd.f32 %v2922_v13, %v1358_v29 }
 0x724   :  { %v1344_v40 = vmul.f32 %v3015_v9, %v1343_v46 }
 0x725   :  { %2803 = vmatmul.msk.f32.gmra.mxu3 %vm143_vm2, %v3992_v23  ;;  %2812 = vmatmul.msk.f32.gmra.mxu0 %vm143_vm2, %v3992_v23 }
 0x726   :  { %v1348_v37 = vsel %vm1347_vm9, %v3015_v9, %v1344_v40  ;;  %2821 = vmatmul.msk.f32.gmra.mxu1 %vm143_vm2, %v3992_v23 }
 0x727   :  { %v1352_v0 = vmul.f32 %v1348_v37, %v3922_v14  ;;  %v2924_v14 = vld [vmem:[%s4574_s9 + $0x1] ss:$0 sm:$0xff] }
 0x729   :  { %v1359_v17 = vmul.f32 %v2921_v54, %v1352_v0 }
 0x72b   :  { %v4001_v25 = vadd.f32 %v2922_v13, %v1359_v17 }
 0x72d   :  { %2804 = vmatmul.msk.f32.gmra.mxu3 %vm143_vm2, %v4001_v25  ;;  %2813 = vmatmul.msk.f32.gmra.mxu0 %vm143_vm2, %v4001_v25 }
 0x72e   :  { %2822 = vmatmul.msk.f32.gmra.mxu1 %vm143_vm2, %v4001_v25 }
 0x78c   :  { %v1445_v27 = vpop.f32.mrf.mxu0 }
 0x78d   :  { %v1484_v11 = vpop.f32.mrf.mxu1  ;;  %v1446_v33 = vadd.f32 %v2923_v18, %v1445_v27 }
 0x78e   :  { %v1485_v39 = vadd.f32 %v2924_v14, %v1484_v11 }
 0x792   :  { %v1406_v30 = vpop.f32.mrf.mxu3 }
 0x793   :  { %v1407_v32 = vadd.f32 %v2925_v10, %v1406_v30 }
 0x794   :  { %v1448_v20 = vpop.f32.mrf.mxu0 }
 0x795   :  { %v1449_v34 = vadd.f32 %v2923_v18, %v1448_v20  ;;  %v1487_v35 = vpop.f32.mrf.mxu1  ;;  %v1496_v3 = vmul.f32 %v3737_v52, %v1407_v32  ;;  %v1498_v22 = vmul.f32 %v3759_v44, %v1407_v32  ;;  %v1500_v26 = vmul.f32 %v3766_v5, %v1407_v32 }
 0x796   :  { %v1488_v12 = vadd.f32 %v2924_v14, %v1487_v35  ;;  %v1502_v28 = vmul.f32 %v3776_v19, %v1407_v32 }
 0x797   :  { %2823 = vmatpush.xpose.msk.msra.mxu2 %vm143_vm2, %v1449_v34 }
 0x798   :  { %2076 = vmatpush.msra.mxu0 %v1488_v12 }
 0x79a   :  { %2077 = vmatpush.msra.mxu0 %v1485_v39  ;;  %v1409_v43 = vpop.f32.mrf.mxu3 }
 0x79b   :  { %2824 = vmatpush.xpose.msk.msra.mxu2 %vm143_vm2, %v1446_v33  ;;  %v1410_v45 = vadd.f32 %v2925_v10, %v1409_v43 }
 0x79d   :  { %v1497_v51 = vmul.f32 %v3737_v52, %v1410_v45  ;;  %v1499_v36 = vmul.f32 %v3759_v44, %v1410_v45  ;;  %v1501_v1 = vmul.f32 %v3766_v5, %v1410_v45  ;;  %v1503_v2 = vmul.f32 %v3776_v19, %v1410_v45 }
 0x79e   :  { %2825 = vmatmul.msk.f32.vlgmr.msra.gmra.mxu2 %vm143_vm2, %v1496_v3 }
 0x7a2   :  { %v1451_v49 = vpop.f32.mrf.mxu0 }
 0x7a3   :  { %v1490_v59 = vpop.f32.mrf.mxu1  ;;  %v1452_v48 = vadd.f32 %v2923_v18, %v1451_v49 }
 0x7a4   :  { %v1491_v21 = vadd.f32 %v2924_v14, %v1490_v59 }
 0x7a6   :  { %2826 = vmatmul.msk.f32.gmra.mxu2 %vm143_vm2, %v1497_v51 }
 0x7a8   :  { %v1412_v54 = vpop.f32.mrf.mxu3 }
 0x7a9   :  { %v1413_v55 = vadd.f32 %v2925_v10, %v1412_v54 }
 0x7aa   :  { %v1454_v31 = vpop.f32.mrf.mxu0 }
 0x7ab   :  { %v1455_v61 = vadd.f32 %v2923_v18, %v1454_v31  ;;  %v1493_v50 = vpop.f32.mrf.mxu1  ;;  %v1504_v24 = vmul.f32 %v3737_v52, %v1413_v55  ;;  %v1506_v63 = vmul.f32 %v3759_v44, %v1413_v55 }
 0x7ac   :  { %v1494_v13 = vadd.f32 %v2924_v14, %v1493_v50 }
 0x7ad   :  { %2833 = vmatpush.xpose.msk.msra.mxu3 %vm143_vm2, %v1455_v61 }
 0x7ae   :  { %2827 = vmatmul.msk.f32.gmra.mxu2 %vm143_vm2, %v1498_v22  ;;  %2141 = vmatpush.msrb.mxu1 %v1494_v13 }
 0x7b0   :  { %2142 = vmatpush.msrb.mxu1 %v1491_v21  ;;  %v1415_v58 = vpop.f32.mrf.mxu3 }
 0x7b1   :  { %2834 = vmatpush.xpose.msk.msra.mxu3 %vm143_vm2, %v1452_v48  ;;  %v1416_v62 = vadd.f32 %v2925_v10, %v1415_v58 }
 0x7b3   :  { %v1505_v38 = vmul.f32 %v3737_v52, %v1416_v62  ;;  %v1507_v41 = vmul.f32 %v3759_v44, %v1416_v62  ;;  %v1508_v52 = vmul.f32 %v3766_v5, %v1413_v55  ;;  %v1509_v7 = vmul.f32 %v3766_v5, %v1416_v62 }
 0x7b4   :  { %2835 = vmatmul.msk.f32.vlgmr.msra.gmra.mxu3 %vm143_vm2, %v1504_v24  ;;  %v1510_v44 = vmul.f32 %v3776_v19, %v1413_v55  ;;  %v1511_v56 = vmul.f32 %v3776_v19, %v1416_v62 }
 0x7b6   :  { %2828 = vmatmul.msk.f32.gmra.mxu2 %vm143_vm2, %v1499_v36 }
 0x7bc   :  { %2836 = vmatmul.msk.f32.gmra.mxu3 %vm143_vm2, %v1505_v38 }
 0x7be   :  { %2829 = vmatmul.msk.f32.gmra.mxu2 %vm143_vm2, %v1500_v26 }
 0x7c4   :  { %2837 = vmatmul.msk.f32.gmra.mxu3 %vm143_vm2, %v1506_v63 }
 0x7c6   :  { %2830 = vmatmul.msk.f32.gmra.mxu2 %vm143_vm2, %v1501_v1 }
 0x7cc   :  { %2838 = vmatmul.msk.f32.gmra.mxu3 %vm143_vm2, %v1507_v41 }
 0x7ce   :  { %2831 = vmatmul.msk.f32.gmra.mxu2 %vm143_vm2, %v1502_v28 }
 0x7d4   :  { %2839 = vmatmul.msk.f32.gmra.mxu3 %vm143_vm2, %v1508_v52 }
 0x7d6   :  { %2832 = vmatmul.msk.f32.gmra.mxu2 %vm143_vm2, %v1503_v2 }
 0x7dc   :  { %2840 = vmatmul.msk.f32.gmra.mxu3 %vm143_vm2, %v1509_v7 }
 0x7e4   :  { %2841 = vmatmul.msk.f32.gmra.mxu3 %vm143_vm2, %v1510_v44 }
 0x7ec   :  { %2842 = vmatmul.msk.f32.gmra.mxu3 %vm143_vm2, %v1511_v56 }
 0x821   :  { %v1559_v8 = vpop.f32.mrf.mxu2 }
 0x822   :  { %v1654_v9 = vsel %vm429_vm3, %v1559_v8, -inf }
 0x823   :  { %1655 = vmax.xlane.f32.xlu0 %v1654_v9 }
 0x829   :  { %v1562_v4 = vpop.f32.mrf.mxu2 }
 0x82a   :  { %v1657_v57 = vsel %vm429_vm3, %v1562_v4, -inf }
 0x82b   :  { %1658 = vmax.xlane.f32.xlu1 %v1657_v57 }
 0x831   :  { %v1565_v53 = vpop.f32.mrf.mxu2 }
 0x832   :  { %v1660_v5 = vsel %vm429_vm3, %v1565_v53, -inf }
 0x833   :  { %1661 = vmax.xlane.f32.xlu2 %v1660_v5 }
 0x837   :  { %v1630_v15 = vpop.f32.mrf.mxu3 }
 0x838   :  { %v1678_v47 = vsel %vm429_vm3, %v1630_v15, -inf }
 0x839   :  { %v1568_v16 = vpop.f32.mrf.mxu2  ;;  %1679 = vmax.xlane.f32.xlu0 %v1678_v47 }
 0x83a   :  { %v1663_v19 = vsel %vm429_vm3, %v1568_v16, -inf }
 0x83b   :  { %1664 = vmax.xlane.f32.xlu1 %v1663_v19 }
 0x83f   :  { %v4059_v29 = vpop.f32.mrf.mxu3 }
 0x840   :  { %v1681_v40 = vsel %vm429_vm3, %v4059_v29, -inf }
 0x841   :  { %v4061_v46 = vpop.f32.mrf.mxu2  ;;  %1682 = vmax.xlane.f32.xlu2 %v1681_v40 }
 0x842   :  { %v1666_v37 = vsel %vm429_vm3, %v4061_v46, -inf }
 0x843   :  { %1667 = vmax.xlane.f32.xlu0 %v1666_v37 }
 0x847   :  { %v4067_v0 = vpop.f32.mrf.mxu3 }
 0x848   :  { %v1684_v27 = vsel %vm429_vm3, %v4067_v0, -inf }
 0x849   :  { %v4069_v17 = vpop.f32.mrf.mxu2  ;;  %1685 = vmax.xlane.f32.xlu1 %v1684_v27 }
 0x84a   :  { %v1669_v11 = vsel %vm429_vm3, %v4069_v17, -inf }
 0x84b   :  { %1670 = vmax.xlane.f32.xlu2 %v1669_v11 }
 0x84f   :  { %v4075_v18 = vpop.f32.mrf.mxu3 }
 0x850   :  { %v1687_v14 = vsel %vm429_vm3, %v4075_v18, -inf }
 0x851   :  { %v4077_v30 = vpop.f32.mrf.mxu2  ;;  %1688 = vmax.xlane.f32.xlu0 %v1687_v14 }
 0x852   :  { %v1672_v10 = vsel %vm429_vm3, %v4077_v30, -inf }
 0x853   :  { %1673 = vmax.xlane.f32.xlu1 %v1672_v10 }
 0x857   :  { %v4083_v20 = vpop.f32.mrf.mxu3 }
 0x858   :  { %v1690_v35 = vsel %vm429_vm3, %v4083_v20, -inf }
 0x859   :  { %v4085_v34 = vpop.f32.mrf.mxu2  ;;  %1691 = vmax.xlane.f32.xlu2 %v1690_v35 }
 0x85a   :  { %v1675_v12 = vsel %vm429_vm3, %v4085_v34, -inf }
 0x85b   :  { %1676 = vmax.xlane.f32.xlu1 %v1675_v12 }
 0x85f   :  { %v4091_v39 = vpop.f32.mrf.mxu3 }
 0x860   :  { %v1693_v32 = vsel %vm429_vm3, %v4091_v39, -inf }
 0x861   :  { %1694 = vmax.xlane.f32.xlu2 %v1693_v32 }
 0x867   :  { %v4095_v33 = vpop.f32.mrf.mxu3 }
 0x868   :  { %v1696_v3 = vsel %vm429_vm3, %v4095_v33, -inf }
 0x869   :  { %1697 = vmax.xlane.f32.xlu1 %v1696_v3 }
 0x86f   :  { %v4099_v43 = vpop.f32.mrf.mxu3 }
 0x870   :  { %v1699_v45 = vsel %vm429_vm3, %v4099_v43, -inf }
 0x871   :  { %1700 = vmax.xlane.f32.xlu1 %v1699_v45 }
 0x896   :  { %v1656_v49 = vpop.xlane.xlu0 %1655 }
 0x897   :  { %v1702_v59 = vsub.f32 %v1559_v8, %v1656_v49 }
 0x899   :  { %v1718_v51 = vmul.f32 1.442695, %v1702_v59 }
 0x89b   :  { %3016 = vpow2.f32 %v1718_v51 }
 0x89e   :  { %v1659_v54 = vpop.xlane.xlu1 %1658 }
 0x89f   :  { %v1703_v31 = vsub.f32 %v1562_v4, %v1659_v54 }
 0x8a1   :  { %v4103_v61 = vpop.eup %3016  ;;  %v1720_v50 = vmul.f32 1.442695, %v1703_v31 }
 0x8a2   :  { %v1750_v22 = vsel %vm429_vm3, %v4103_v61, 0.0 }
 0x8a3   :  { %3018 = vpow2.f32 %v1720_v50  ;;  %1751 = vadd.xlane.f32.xlu0 %v1750_v22 }
 0x8a6   :  { %v1662_v13 = vpop.xlane.xlu2 %1661 }
 0x8a7   :  { %v1704_v21 = vsub.f32 %v1565_v53, %v1662_v13 }
 0x8a9   :  { %v4107_v55 = vpop.eup %3018  ;;  %v1722_v48 = vmul.f32 1.442695, %v1704_v21 }
 0x8aa   :  { %v1753_v24 = vsel %vm429_vm3, %v4107_v55, 0.0 }
 0x8ab   :  { %3020 = vpow2.f32 %v1722_v48  ;;  %1754 = vadd.xlane.f32.xlu0 %v1753_v24 }
 0x8ac   :  { %v1680_v58 = vpop.xlane.xlu0 %1679 }
 0x8ad   :  { %v1710_v36 = vsub.f32 %v1630_v15, %v1680_v58 }
 0x8ae   :  { %v1665_v62 = vpop.xlane.xlu1 %1664 }
 0x8af   :  { %v1705_v38 = vsub.f32 %v1568_v16, %v1665_v62  ;;  %v1734_v26 = vmul.f32 1.442695, %v1710_v36 }
 0x8b1   :  { %v4111_v63 = vpop.eup %3020  ;;  %v1724_v1 = vmul.f32 1.442695, %v1705_v38  ;;  %3022 = vpow2.f32 %v1734_v26 }
 0x8b2   :  { %v1756_v41 = vsel %vm429_vm3, %v4111_v63, 0.0 }
 0x8b3   :  { %3024 = vpow2.f32 %v1724_v1  ;;  %1757 = vadd.xlane.f32.xlu2 %v1756_v41 }
 0x8b4   :  { %v1683_v28 = vpop.xlane.xlu2 %1682 }
 0x8b5   :  { %v1711_v2 = vsub.f32 %v4059_v29, %v1683_v28 }
 0x8b6   :  { %v1668_v52 = vpop.xlane.xlu0 %1667 }
 0x8b7   :  { %v1706_v7 = vsub.f32 %v4061_v46, %v1668_v52  ;;  %v4117_v44 = vpop.eup %3022  ;;  %v1736_v56 = vmul.f32 1.442695, %v1711_v2 }
 0x8b8   :  { %v1774_v4 = vsel %vm429_vm3, %v4117_v44, 0.0 }
 0x8b9   :  { %v4119_v8 = vpop.eup %3024  ;;  %v1726_v9 = vmul.f32 1.442695, %v1706_v7  ;;  %3026 = vpow2.f32 %v1736_v56  ;;  %1775 = vadd.xlane.f32.xlu0 %v1774_v4 }
 0x8ba   :  { %v1759_v57 = vsel %vm429_vm3, %v4119_v8, 0.0 }
 0x8bb   :  { %3028 = vpow2.f32 %v1726_v9  ;;  %1760 = vadd.xlane.f32.xlu2 %v1759_v57 }
 0x8bc   :  { %v1686_v53 = vpop.xlane.xlu1 %1685 }
 0x8bd   :  { %v1712_v15 = vsub.f32 %v4067_v0, %v1686_v53 }
 0x8be   :  { %v1671_v5 = vpop.xlane.xlu2 %1670 }
 0x8bf   :  { %v1707_v16 = vsub.f32 %v4069_v17, %v1671_v5  ;;  %v4127_v47 = vpop.eup %3026  ;;  %v1738_v19 = vmul.f32 1.442695, %v1712_v15 }
 0x8c0   :  { %v1777_v40 = vsel %vm429_vm3, %v4127_v47, 0.0 }
 0x8c1   :  { %v4129_v29 = vpop.eup %3028  ;;  %v1728_v46 = vmul.f32 1.442695, %v1707_v16  ;;  %3030 = vpow2.f32 %v1738_v19  ;;  %1778 = vadd.xlane.f32.xlu0 %v1777_v40 }
 0x8c2   :  { %v1762_v37 = vsel %vm429_vm3, %v4129_v29, 0.0 }
 0x8c3   :  { %3032 = vpow2.f32 %v1728_v46  ;;  %1763 = vadd.xlane.f32.xlu1 %v1762_v37 }
 0x8c4   :  { %v1689_v27 = vpop.xlane.xlu0 %1688 }
 0x8c5   :  { %v1713_v0 = vsub.f32 %v4075_v18, %v1689_v27 }
 0x8c6   :  { %v1674_v17 = vpop.xlane.xlu1 %1673 }
 0x8c7   :  { %v1708_v11 = vsub.f32 %v4077_v30, %v1674_v17  ;;  %v4137_v14 = vpop.eup %3030  ;;  %v1740_v10 = vmul.f32 1.442695, %v1713_v0 }
 0x8c8   :  { %v1780_v32 = vsel %vm429_vm3, %v4137_v14, 0.0 }
 0x8c9   :  { %v4139_v35 = vpop.eup %3032  ;;  %v1730_v12 = vmul.f32 1.442695, %v1708_v11  ;;  %3034 = vpow2.f32 %v1740_v10  ;;  %1781 = vadd.xlane.f32.xlu2 %v1780_v32 }
 0x8ca   :  { %v1765_v3 = vsel %vm429_vm3, %v4139_v35, 0.0 }
 0x8cb   :  { %3036 = vpow2.f32 %v1730_v12  ;;  %1766 = vadd.xlane.f32.xlu0 %v1765_v3 }
 0x8cc   :  { %v1692_v18 = vpop.xlane.xlu2 %1691 }
 0x8cd   :  { %v1714_v45 = vsub.f32 %v4083_v20, %v1692_v18 }
 0x8ce   :  { %v1677_v30 = vpop.xlane.xlu1 %1676 }
 0x8cf   :  { %v1709_v49 = vsub.f32 %v4085_v34, %v1677_v30  ;;  %v4147_v59 = vpop.eup %3034  ;;  %v1742_v51 = vmul.f32 1.442695, %v1714_v45 }
 0x8d0   :  { %v1783_v50 = vsel %vm429_vm3, %v4147_v59, 0.0 }
 0x8d1   :  { %v4149_v54 = vpop.eup %3036  ;;  %v1732_v31 = vmul.f32 1.442695, %v1709_v49  ;;  %3038 = vpow2.f32 %v1742_v51  ;;  %1784 = vadd.xlane.f32.xlu1 %v1783_v50 }
 0x8d2   :  { %v1768_v22 = vsel %vm429_vm3, %v4149_v54, 0.0 }
 0x8d3   :  { %3040 = vpow2.f32 %v1732_v31  ;;  %1769 = vadd.xlane.f32.xlu2 %v1768_v22 }
 0x8d4   :  { %v1695_v20 = vpop.xlane.xlu2 %1694 }
 0x8d5   :  { %v1715_v13 = vsub.f32 %v4091_v39, %v1695_v20 }
 0x8d7   :  { %v4156_v34 = vpop.eup %3038  ;;  %v1744_v21 = vmul.f32 1.442695, %v1715_v13 }
 0x8d8   :  { %v1786_v24 = vsel %vm429_vm3, %v4156_v34, 0.0 }
 0x8d9   :  { %v4158_v48 = vpop.eup %3040  ;;  %3042 = vpow2.f32 %v1744_v21  ;;  %1787 = vadd.xlane.f32.xlu0 %v1786_v24 }
 0x8da   :  { %v1771_v58 = vsel %vm429_vm3, %v4158_v48, 0.0 }
 0x8db   :  { %1772 = vadd.xlane.f32.xlu1 %v1771_v58 }
 0x8dc   :  { %v1698_v36 = vpop.xlane.xlu1 %1697 }
 0x8dd   :  { %v1716_v62 = vsub.f32 %v4095_v33, %v1698_v36 }
 0x8df   :  { %v4165_v38 = vpop.eup %3042  ;;  %v1746_v39 = vmul.f32 1.442695, %v1716_v62 }
 0x8e0   :  { %v1789_v26 = vsel %vm429_vm3, %v4165_v38, 0.0 }
 0x8e1   :  { %3044 = vpow2.f32 %v1746_v39  ;;  %1790 = vadd.xlane.f32.xlu2 %v1789_v26 }
 0x8e4   :  { %v1701_v1 = vpop.xlane.xlu1 %1700 }
 0x8e5   :  { %v1717_v41 = vsub.f32 %v4099_v43, %v1701_v1 }
 0x8e7   :  { %v4170_v28 = vpop.eup %3044  ;;  %v1748_v52 = vmul.f32 1.442695, %v1717_v41 }
 0x8e8   :  { %v1792_v2 = vsel %vm429_vm3, %v4170_v28, 0.0 }
 0x8e9   :  { %3046 = vpow2.f32 %v1748_v52  ;;  %1793 = vadd.xlane.f32.xlu0 %v1792_v2 }
 0x8ef   :  { %v4174_v33 = vpop.eup %3046 }
 0x8f0   :  { %v1795_v7 = vsel %vm429_vm3, %v4174_v33, 0.0 }
 0x8f1   :  { %1796 = vadd.xlane.f32.xlu1 %v1795_v7 }
 0x916   :  { %v1752_v56 = vpop.xlane.xlu0 %1751 }
 0x917   :  { %3048 = vrcp.f32 %v1752_v56  ;;  %v1809_v53 = vand.u32 2147483648, %v1752_v56  ;;  %v1807_v15 = vand.u32 2147483647, %v1752_v56  ;;  %vm1803_vm12 = vweird.f32 %v1752_v56 }
 0x919   :  { %v1810_v46 = vor.u32 1.1754944e-38, %v1809_v53  ;;  %vm1808_vm14 = vcmp.eq.f32.partialorder %v1807_v15, 8.507059e+37 }
 0x91d   :  { %v3049_v9 = vpop.eup %3048 }
 0x91e   :  { %v1799_v4 = vmul.f32 %v3049_v9, %v1752_v56  ;;  %v1755_v57 = vpop.xlane.xlu0 %1754  ;;  %vm1804_vm10 = vweird.f32 %v3049_v9 }
 0x91f   :  { %3050 = vrcp.f32 %v1755_v57  ;;  %vm1805_vm13 = vmor %vm1803_vm12, %vm1804_vm10  ;;  %v1824_v12 = vand.u32 2147483648, %v1755_v57  ;;  %v1822_v3 = vand.u32 2147483647, %v1755_v57  ;;  %vm1818_vm0 = vweird.f32 %v1755_v57 }
 0x920   :  { %v1800_v43 = vsub.f32 1.0, %v1799_v4 }
 0x921   :  { %v1825_v51 = vor.u32 1.1754944e-38, %v1824_v12  ;;  %vm1823_vm4 = vcmp.eq.f32.partialorder %v1822_v3, 8.507059e+37 }
 0x922   :  { %v1801_v5 = vmul.f32 %v3049_v9, %v1800_v43 }
 0x924   :  { %v1802_v16 = vadd.f32 %v3049_v9, %v1801_v5 }
 0x925   :  { %v3051_v19 = vpop.eup %3050 }
 0x926   :  { %v1806_v40 = vsel %vm1805_vm13, %v3049_v9, %v1802_v16  ;;  %v1814_v37 = vmul.f32 %v3051_v19, %v1755_v57  ;;  %v1758_v27 = vpop.xlane.xlu2 %1757  ;;  %vm1819_vm15 = vweird.f32 %v3051_v19 }
 0x927   :  { %v1811_v0 = vsel %vm1808_vm14, %v1810_v46, %v1806_v40  ;;  %3052 = vrcp.f32 %v1758_v27  ;;  %vm1820_vm1 = vmor %vm1818_vm0, %vm1819_vm15  ;;  %v1839_v13 = vand.u32 2147483648, %v1758_v27  ;;  %v1837_v58 = vand.u32 2147483647, %v1758_v27 }
 0x928   :  { %v1815_v17 = vsub.f32 1.0, %v1814_v37  ;;  %v1812_v11 = vmul.f32 %v4103_v61, %v1811_v0  ;;  %vm1833_vm6 = vweird.f32 %v1758_v27 }
 0x929   :  { %v1840_v41 = vor.u32 1.1754944e-38, %v1839_v13  ;;  %vm1838_vm8 = vcmp.eq.f32.partialorder %v1837_v58, 8.507059e+37 }
 0x92a   :  { %v1816_v10 = vmul.f32 %v3051_v19, %v1815_v17  ;;  %2843 = vmatmul.msk.f32.vlgmr.msra.gmra.mxu0 %vm429_vm3, %v1812_v11 }
 0x92c   :  { %v1817_v32 = vadd.f32 %v3051_v19, %v1816_v10  ;;  %v1776_v45 = vpop.xlane.xlu0 %1775 }
 0x92d   :  { %v3053_v18 = vpop.eup %3052  ;;  %3054 = vrcp.f32 %v1776_v45  ;;  %v1929_v52 = vand.u32 2147483648, %v1776_v45  ;;  %v1927_v9 = vand.u32 2147483647, %v1776_v45  ;;  %vm1923_vm10 = vweird.f32 %v1776_v45 }
 0x92e   :  { %v1829_v30 = vmul.f32 %v3053_v18, %v1758_v27  ;;  %v4180_v49 = vpop.xlane.xlu2 %1760  ;;  %v1821_v61 = vsel %vm1820_vm1, %v3051_v19, %v1817_v32  ;;  %vm1834_vm5 = vweird.f32 %v3053_v18 }
 0x92f   :  { %3056 = vrcp.f32 %v4180_v49  ;;  %v1826_v50 = vsel %vm1823_vm4, %v1825_v51, %v1821_v61  ;;  %vm1835_vm7 = vmor %vm1833_vm6, %vm1834_vm5  ;;  %v1854_v5 = vand.u32 2147483648, %v4180_v49  ;;  %v1930_v16 = vor.u32 1.1754944e-38, %v1929_v52 }
 0x930   :  { %v1830_v31 = vsub.f32 1.0, %v1829_v30  ;;  %v1827_v20 = vmul.f32 %v4107_v55, %v1826_v50  ;;  %v1852_v46 = vand.u32 2147483647, %v4180_v49  ;;  %vm1928_vm14 = vcmp.eq.f32.partialorder %v1927_v9, 8.507059e+37 }
 0x931   :  { %vm1848_vm15 = vweird.f32 %v4180_v49  ;;  %v1855_v10 = vor.u32 1.1754944e-38, %v1854_v5 }
 0x932   :  { %v1831_v22 = vmul.f32 %v3053_v18, %v1830_v31  ;;  %2844 = vmatmul.msk.f32.gmra.mxu0 %vm429_vm3, %v1827_v20  ;;  %vm1853_vm1 = vcmp.eq.f32.partialorder %v1852_v46, 8.507059e+37 }
 0x933   :  { %v3055_v21 = vpop.eup %3054 }
 0x934   :  { %v1832_v24 = vadd.f32 %v3053_v18, %v1831_v22  ;;  %v1919_v62 = vmul.f32 %v3055_v21, %v1776_v45  ;;  %v4185_v39 = vpop.xlane.xlu0 %1778  ;;  %vm1924_vm9 = vweird.f32 %v3055_v21 }
 0x935   :  { %v3057_v36 = vpop.eup %3056  ;;  %3058 = vrcp.f32 %v4185_v39  ;;  %vm1925_vm12 = vmor %vm1923_vm10, %vm1924_vm9  ;;  %vm1938_vm5 = vweird.f32 %v4185_v39 }
 0x936   :  { %v1844_v26 = vmul.f32 %v3057_v36, %v4180_v49  ;;  %v4189_v1 = vpop.xlane.xlu1 %1763  ;;  %v1920_v55 = vsub.f32 1.0, %v1919_v62  ;;  %v1836_v7 = vsel %vm1835_vm7, %v3053_v18, %v1832_v24  ;;  %vm1849_vm13 = vweird.f32 %v3057_v36 }
 0x937   :  { %3060 = vrcp.f32 %v4189_v1  ;;  %v1841_v4 = vsel %vm1838_vm8, %v1840_v41, %v1836_v7  ;;  %vm1850_vm0 = vmor %vm1848_vm15, %vm1849_vm13  ;;  %v1944_v49 = vand.u32 2147483648, %v4185_v39  ;;  %v1869_v61 = vand.u32 2147483648, %v4189_v1 }
 0x938   :  { %v1845_v2 = vsub.f32 1.0, %v1844_v26  ;;  %v1921_v56 = vmul.f32 %v3055_v21, %v1920_v55  ;;  %v1842_v43 = vmul.f32 %v4111_v63, %v1841_v4  ;;  %v1867_v50 = vand.u32 2147483647, %v4189_v1 }
 0x939   :  { %vm1863_vm7 = vweird.f32 %v4189_v1 }
 0x93a   :  { %v1846_v57 = vmul.f32 %v3057_v36, %v1845_v2  ;;  %v1922_v53 = vadd.f32 %v3055_v21, %v1921_v56  ;;  %2845 = vmatmul.msk.f32.gmra.mxu0 %vm429_vm3, %v1842_v43  ;;  %vm1868_vm10 = vcmp.eq.f32.partialorder %v1867_v50, 8.507059e+37 }
 0x93b   :  { %v4194_v15 = vpop.eup %3058 }
 0x93c   :  { %v1847_v19 = vadd.f32 %v3057_v36, %v1846_v57  ;;  %v1926_v37 = vsel %vm1925_vm12, %v3055_v21, %v1922_v53  ;;  %v1934_v63 = vmul.f32 %v4194_v15, %v4185_v39  ;;  %v4200_v27 = vpop.xlane.xlu2 %1781  ;;  %vm1939_vm4 = vweird.f32 %v4194_v15 }
 0x93d   :  { %v3061_v40 = vpop.eup %3060  ;;  %v1931_v0 = vsel %vm1928_vm14, %v1930_v16, %v1926_v37  ;;  %3062 = vrcp.f32 %v4200_v27  ;;  %vm4230_vm8 = vmor %vm1938_vm5, %vm1939_vm4  ;;  %v1959_v56 = vand.u32 2147483648, %v4200_v27  ;;  %v1957_v16 = vand.u32 2147483647, %v4200_v27 }
 0x93e   :  { %v1859_v17 = vmul.f32 %v3061_v40, %v4189_v1  ;;  %v4204_v11 = vpop.xlane.xlu0 %1766  ;;  %v1935_v12 = vsub.f32 1.0, %v1934_v63  ;;  %v1851_v3 = vsel %vm1850_vm0, %v3057_v36, %v1847_v19  ;;  %v1932_v18 = vmul.f32 %v4117_v44, %v1931_v0 }
 0x93f   :  { %3064 = vrcp.f32 %v4204_v11  ;;  %v1856_v30 = vsel %vm1853_vm1, %v1855_v10, %v1851_v3  ;;  %vm1864_vm6 = vweird.f32 %v3061_v40  ;;  %v1945_v36 = vor.u32 1.1754944e-38, %v1944_v49 }
 0x940   :  { %v1860_v32 = vsub.f32 1.0, %v1859_v17  ;;  %v1936_v45 = vmul.f32 %v4194_v15, %v1935_v12  ;;  %v1857_v31 = vmul.f32 %v4119_v8, %v1856_v30  ;;  %2851 = vmatmul.msk.f32.vlgmr.msrb.gmra.mxu1 %vm429_vm3, %v1932_v18  ;;  %v1942_v8 = vand.u32 2147483647, %v4185_v39  ;;  %vm1865_vm9 = vmor %vm1863_vm7, %vm1864_vm6 }
 0x941   :  { %v1870_v1 = vor.u32 1.1754944e-38, %v1869_v61  ;;  %v1884_v52 = vand.u32 2147483648, %v4204_v11  ;;  %v1882_v5 = vand.u32 2147483647, %v4204_v11  ;;  %vm1878_vm14 = vweird.f32 %v4204_v11 }
 0x942   :  { %v1861_v51 = vmul.f32 %v3061_v40, %v1860_v32  ;;  %v1937_v22 = vadd.f32 %v4194_v15, %v1936_v45  ;;  %2846 = vmatmul.msk.f32.gmra.mxu0 %vm429_vm3, %v1857_v31  ;;  %vm1943_vm12 = vcmp.eq.f32.partialorder %v1942_v8, 8.507059e+37  ;;  %vm1953_vm15 = vweird.f32 %v4200_v27 }
 0x943   :  { %v4218_v20 = vpop.eup %3062  ;;  %v1885_v46 = vor.u32 1.1754944e-38, %v1884_v52  ;;  %vm1883_vm4 = vcmp.eq.f32.partialorder %v1882_v5, 8.507059e+37  ;;  %vm1958_vm5 = vcmp.eq.f32.partialorder %v1957_v16, 8.507059e+37 }
 0x944   :  { %v1862_v44 = vadd.f32 %v3061_v40, %v1861_v51  ;;  %v1949_v21 = vmul.f32 %v4218_v20, %v4200_v27  ;;  %v4228_v24 = vpop.xlane.xlu1 %1784  ;;  %v1941_v39 = vsel %vm4230_vm8, %v4194_v15, %v1937_v22  ;;  %vm1954_vm13 = vweird.f32 %v4218_v20 }
 0x945   :  { %v4223_v13 = vpop.eup %3064  ;;  %3066 = vrcp.f32 %v4228_v24  ;;  %v1946_v4 = vsel %vm1943_vm12, %v1945_v36, %v1941_v39  ;;  %vm4265_vm1 = vmor %vm1953_vm15, %vm1954_vm13  ;;  %v1960_v27 = vor.u32 1.1754944e-38, %v1959_v56  ;;  %vm1968_vm6 = vweird.f32 %v4228_v24 }
 0x946   :  { %v1874_v62 = vmul.f32 %v4223_v13, %v4204_v11  ;;  %v4236_v26 = vpop.xlane.xlu2 %1769  ;;  %v1950_v41 = vsub.f32 1.0, %v1949_v21  ;;  %v1866_v2 = vsel %vm1865_vm9, %v3061_v40, %v1862_v44  ;;  %v1947_v53 = vmul.f32 %v4127_v47, %v1946_v4 }
 0x947   :  { %3068 = vrcp.f32 %v4236_v26  ;;  %v1871_v9 = vsel %vm1868_vm10, %v1870_v1, %v1866_v2  ;;  %vm1879_vm0 = vweird.f32 %v4223_v13  ;;  %v1899_v3 = vand.u32 2147483648, %v4236_v26 }
 0x948   :  { %v1875_v55 = vsub.f32 1.0, %v1874_v62  ;;  %v1951_v7 = vmul.f32 %v4218_v20, %v1950_v41  ;;  %v1872_v43 = vmul.f32 %v4129_v29, %v1871_v9  ;;  %2852 = vmatmul.msk.f32.gmra.mxu1 %vm429_vm3, %v1947_v53  ;;  %v1972_v18 = vand.u32 2147483647, %v4228_v24  ;;  %vm1880_vm7 = vmor %vm1878_vm14, %vm1879_vm0 }
 0x949   :  { %v1974_v31 = vand.u32 2147483648, %v4228_v24  ;;  %v1897_v50 = vand.u32 2147483647, %v4236_v26  ;;  %vm1893_vm12 = vweird.f32 %v4236_v26  ;;  %v1900_v36 = vor.u32 1.1754944e-38, %v1899_v3 }
 0x94a   :  { %v1876_v57 = vmul.f32 %v4223_v13, %v1875_v55  ;;  %v1952_v15 = vadd.f32 %v4218_v20, %v1951_v7  ;;  %2847 = vmatmul.msk.f32.gmra.mxu0 %vm429_vm3, %v1872_v43  ;;  %vm1973_vm14 = vcmp.eq.f32.partialorder %v1972_v18, 8.507059e+37 }
 0x94b   :  { %v3067_v19 = vpop.eup %3066  ;;  %vm1898_vm15 = vcmp.eq.f32.partialorder %v1897_v50, 8.507059e+37 }
 0x94c   :  { %v1964_v47 = vmul.f32 %v3067_v19, %v4228_v24  ;;  %v4259_v40 = vpop.xlane.xlu0 %1787  ;;  %v1877_v37 = vadd.f32 %v4223_v13, %v1876_v57  ;;  %v1956_v10 = vsel %vm4265_vm1, %v4218_v20, %v1952_v15  ;;  %vm1969_vm8 = vweird.f32 %v3067_v19  ;;  %v3101_v15 = vld [vmem:[%s4608_s29] ss:$0 sm:$0xff] }
 0x94d   :  { %v3069_v29 = vpop.eup %3068  ;;  %3070 = vrcp.f32 %v4259_v40  ;;  %v1961_v49 = vsel %vm1958_vm5, %v1960_v27, %v1956_v10  ;;  %vm4291_vm10 = vmor %vm1968_vm6, %vm1969_vm8  ;;  %v1975_v24 = vor.u32 1.1754944e-38, %v1974_v31  ;;  %v1989_v2 = vand.u32 2147483648, %v4259_v40 }
 0x94e   :  { %v1889_v0 = vmul.f32 %v3069_v29, %v4236_v26  ;;  %v4271_v17 = vpop.xlane.xlu1 %1772  ;;  %v1965_v12 = vsub.f32 1.0, %v1964_v47  ;;  %v1881_v30 = vsel %vm1880_vm7, %v4223_v13, %v1877_v37  ;;  %v1962_v44 = vmul.f32 %v4137_v14, %v1961_v49 }
 0x94f   :  { %3072 = vrcp.f32 %v4271_v17  ;;  %v1886_v61 = vsel %vm1883_vm4, %v1885_v46, %v1881_v30  ;;  %vm1894_vm9 = vweird.f32 %v3069_v29  ;;  %v1987_v56 = vand.u32 2147483647, %v4259_v40 }
 0x950   :  { %v1890_v32 = vsub.f32 1.0, %v1889_v0  ;;  %v1966_v45 = vmul.f32 %v3067_v19, %v1965_v12  ;;  %v1887_v20 = vmul.f32 %v4139_v35, %v1886_v61  ;;  %2853 = vmatmul.msk.f32.gmra.mxu1 %vm429_vm3, %v1962_v44  ;;  %vm1895_vm13 = vmor %vm1893_vm12, %vm1894_vm9  ;;  %v1914_v4 = vand.u32 2147483648, %v4271_v17 }
 0x951   :  { %vm1983_vm1 = vweird.f32 %v4259_v40  ;;  %v1912_v53 = vand.u32 2147483647, %v4271_v17  ;;  %vm1908_vm6 = vweird.f32 %v4271_v17  ;;  %vm1988_vm7 = vcmp.eq.f32.partialorder %v1987_v56, 8.507059e+37 }
 0x952   :  { %v1891_v51 = vmul.f32 %v3069_v29, %v1890_v32  ;;  %v1967_v22 = vadd.f32 %v3067_v19, %v1966_v45  ;;  %2848 = vmatmul.msk.f32.gmra.mxu0 %vm429_vm3, %v1887_v20  ;;  %v1915_v46 = vor.u32 1.1754944e-38, %v1914_v4 }
 0x953   :  { %v3071_v8 = vpop.eup %3070  ;;  %vm1913_vm9 = vcmp.eq.f32.partialorder %v1912_v53, 8.507059e+37  ;;  %v3100_v53 = vld [vmem:[%s4608_s29 + $0x1] ss:$0 sm:$0xff] }
 0x954   :  { %v1892_v13 = vadd.f32 %v3069_v29, %v1891_v51  ;;  %v1979_v58 = vmul.f32 %v3071_v8, %v4259_v40  ;;  %v1791_v35 = vpop.xlane.xlu2 %1790  ;;  %v1971_v14 = vsel %vm4291_vm10, %v3067_v19, %v1967_v22  ;;  %vm1984_vm0 = vweird.f32 %v3071_v8 }
 0x955   :  { %v3073_v21 = vpop.eup %3072  ;;  %3074 = vrcp.f32 %v1791_v35  ;;  %v1976_v55 = vsel %vm1973_vm14, %v1975_v24, %v1971_v14  ;;  %vm4310_vm5 = vmor %vm1983_vm1, %vm1984_vm0  ;;  %v2004_v63 = vand.u32 2147483648, %v1791_v35  ;;  %v2002_v12 = vand.u32 2147483647, %v1791_v35 }
 0x956   :  { %v1904_v62 = vmul.f32 %v3073_v21, %v4271_v17  ;;  %v1980_v39 = vsub.f32 1.0, %v1979_v58  ;;  %v1896_v26 = vsel %vm1895_vm13, %v3069_v29, %v1892_v13  ;;  %v1977_v57 = vmul.f32 %v4147_v59, %v1976_v55 }
 0x957   :  { %v1901_v41 = vsel %vm1898_vm15, %v1900_v36, %v1896_v26  ;;  %vm1909_vm4 = vweird.f32 %v3073_v21  ;;  %vm1998_vm12 = vweird.f32 %v1791_v35  ;;  %v2005_v18 = vor.u32 1.1754944e-38, %v2004_v63 }
 0x958   :  { %v1905_v1 = vsub.f32 1.0, %v1904_v62  ;;  %v1981_v52 = vmul.f32 %v3071_v8, %v1980_v39  ;;  %v1902_v7 = vmul.f32 %v4149_v54, %v1901_v41  ;;  %v1990_v54 = vor.u32 1.1754944e-38, %v1989_v2  ;;  %2854 = vmatmul.msk.f32.gmra.mxu1 %vm429_vm3, %v1977_v57  ;;  %vm1910_vm8 = vmor %vm1908_vm6, %vm1909_vm4  ;;  %v2860_v2 = vld [vmem:[%s4575_s10 + $0x28] sm:$0xff] }
 0x959   :  { %vm2003_vm14 = vcmp.eq.f32.partialorder %v2002_v12, 8.507059e+37 }
 0x95a   :  { %v1906_v9 = vmul.f32 %v3073_v21, %v1905_v1  ;;  %v1982_v43 = vadd.f32 %v3071_v8, %v1981_v52  ;;  %2849 = vmatmul.msk.f32.gmra.mxu0 %vm429_vm3, %v1902_v7  ;;  %v2862_v1 = vld [vmem:[%s4575_s10 + $0x38] sm:$0xff] }
 0x95b   :  { %v3075_v5 = vpop.eup %3074  ;;  %2246 = vmatpush.msrb.mxu2 %v2862_v1 }
 0x95c   :  { %v1907_v16 = vadd.f32 %v3073_v21, %v1906_v9  ;;  %v1994_v19 = vmul.f32 %v3075_v5, %v1791_v35  ;;  %v1794_v59 = vpop.xlane.xlu0 %1793  ;;  %v1986_v29 = vsel %vm4310_vm5, %v3071_v8, %v1982_v43  ;;  %vm1999_vm10 = vweird.f32 %v3075_v5 }
 0x95d   :  { %3076 = vrcp.f32 %v1794_v59  ;;  %v1991_v37 = vsel %vm1988_vm7, %v1990_v54, %v1986_v29  ;;  %vm2000_vm13 = vmor %vm1998_vm12, %vm1999_vm10  ;;  %vm2013_vm0 = vweird.f32 %v1794_v59  ;;  %v3102_v54 = vld [vmem:[%s4608_s29 + $0x2] ss:$0 sm:$0xff] }
 0x95e   :  { %v1995_v47 = vsub.f32 1.0, %v1994_v19  ;;  %v1911_v40 = vsel %vm1910_vm8, %v3073_v21, %v1907_v16  ;;  %v1992_v10 = vmul.f32 %v4156_v34, %v1991_v37  ;;  %v2017_v34 = vand.u32 2147483647, %v1794_v59 }
 0x95f   :  { %v1916_v27 = vsel %vm1913_vm9, %v1915_v46, %v1911_v40 }
 0x960   :  { %v1996_v0 = vmul.f32 %v3075_v5, %v1995_v47  ;;  %v1917_v17 = vmul.f32 %v4158_v48, %v1916_v27  ;;  %2855 = vmatmul.msk.f32.gmra.mxu1 %vm429_vm3, %v1992_v10  ;;  %v2019_v48 = vand.u32 2147483648, %v1794_v59  ;;  %vm2018_vm4 = vcmp.eq.f32.partialorder %v2017_v34, 8.507059e+37  ;;  %v3103_v27 = vld [vmem:[%s4608_s29 + $0x3] ss:$0 sm:$0xff]  ;;  %s3131_s29 = smov [#allocation2]  }
 0x961   :  { %s2720_s27 = sshll.u32 %s3131_s29, 4  ;;  %s2721_s27 = int_to_ptr.vmem [resolvable:$true] %s2720_s27 }
 0x962   :  { %v1997_v32 = vadd.f32 %v3075_v5, %v1996_v0  ;;  %2850 = vmatmul.msk.f32.gmra.mxu0 %vm429_vm3, %v1917_v17  ;;  %v2020_v44 = vor.u32 1.1754944e-38, %v2019_v48 }
 0x963   :  { %v3077_v3 = vpop.eup %3076 }
 0x964   :  { %v2009_v45 = vmul.f32 %v3077_v3, %v1794_v59  ;;  %v1797_v30 = vpop.xlane.xlu1 %1796  ;;  %v2001_v49 = vsel %vm2000_vm13, %v3075_v5, %v1997_v32  ;;  %vm2014_vm15 = vweird.f32 %v3077_v3 }
 0x965   :  { %3078 = vrcp.f32 %v1797_v30  ;;  %v2006_v31 = vsel %vm2003_vm14, %v2005_v18, %v2001_v49  ;;  %vm2015_vm1 = vmor %vm2013_vm0, %vm2014_vm15  ;;  %v2034_v58 = vand.u32 2147483648, %v1797_v30  ;;  %v2032_v14 = vand.u32 2147483647, %v1797_v30 }
 0x966   :  { %v2010_v51 = vsub.f32 1.0, %v2009_v45  ;;  %v2007_v50 = vmul.f32 %v4165_v38, %v2006_v31  ;;  %vm2028_vm6 = vweird.f32 %v1797_v30 }
 0x967   :  { %v2035_v38 = vor.u32 1.1754944e-38, %v2034_v58  ;;  %vm2033_vm8 = vcmp.eq.f32.partialorder %v2032_v14, 8.507059e+37 }
 0x968   :  { %v2011_v61 = vmul.f32 %v3077_v3, %v2010_v51  ;;  %2856 = vmatmul.msk.f32.gmra.mxu1 %vm429_vm3, %v2007_v50 }
 0x96a   :  { %v2012_v22 = vadd.f32 %v3077_v3, %v2011_v61 }
 0x96b   :  { %v3079_v20 = vpop.eup %3078 }
 0x96c   :  { %v2024_v8 = vmul.f32 %v3079_v20, %v1797_v30  ;;  %v2016_v11 = vsel %vm2015_vm1, %v3077_v3, %v2012_v22  ;;  %vm2029_vm5 = vweird.f32 %v3079_v20 }
 0x96d   :  { %v2021_v13 = vsel %vm2018_vm4, %v2020_v44, %v2016_v11  ;;  %vm2030_vm7 = vmor %vm2028_vm6, %vm2029_vm5 }
 0x96e   :  { %v2025_v21 = vsub.f32 1.0, %v2024_v8  ;;  %v2022_v36 = vmul.f32 %v4170_v28, %v2021_v13  ;;  %v2861_v28 = vld [vmem:[%s4575_s10 + $0x30] sm:$0xff] }
 0x96f   :  { %2247 = vmatpush.msrb.mxu2 %v2861_v28 }
 0x970   :  { %v2026_v35 = vmul.f32 %v3079_v20, %v2025_v21  ;;  %2857 = vmatmul.msk.f32.gmra.mxu1 %vm429_vm3, %v2022_v36 }
 0x971   :  { %2248 = vmatpush.msrb.mxu2 %v2860_v2 }
 0x972   :  { %v2027_v24 = vadd.f32 %v3079_v20, %v2026_v35 }
 0x974   :  { %v2031_v62 = vsel %vm2030_vm7, %v3079_v20, %v2027_v24 }
 0x975   :  { %v2036_v39 = vsel %vm2033_vm8, %v2035_v38, %v2031_v62 }
 0x976   :  { %v2037_v26 = vmul.f32 %v4174_v33, %v2036_v39  ;;  %v2859_v33 = vld [vmem:[%s4575_s10 + $0x20] sm:$0xff] }
 0x977   :  { %2249 = vmatpush.msrb.mxu2 %v2859_v33 }
 0x978   :  { %2858 = vmatmul.msk.f32.gmra.mxu1 %vm429_vm3, %v2037_v26 }
 0x9a7   :  { %v2079_v41 = vpop.f32.mrf.mxu0 }
 0x9a8   :  { %v2168_v16 = vmul.f32 %v3101_v15, %v2079_v41 }
 0x9aa   :  { %v2184_v29 = vsel %vm143_vm2, %v2168_v16, 0.0 }
 0x9af   :  { %v2082_v55 = vpop.f32.mrf.mxu0 }
 0x9b0   :  { %v2169_v10 = vmul.f32 %v3101_v15, %v2082_v55 }
 0x9b2   :  { %v2191_v45 = vsel %vm143_vm2, %v2169_v10, 0.0 }
 0x9b7   :  { %v2085_v52 = vpop.f32.mrf.mxu0 }
 0x9b8   :  { %v2170_v5 = vmul.f32 %v3100_v53, %v2085_v52 }
 0x9ba   :  { %v2185_v59 = vsel %vm143_vm2, %v2170_v5, 0.0 }
 0x9bb   :  { %v2186_v47 = vadd.f32 %v2185_v59, %v2184_v29 }
 0x9bd   :  { %v2144_v7 = vpop.f32.mrf.mxu1 }
 0x9be   :  { %v2176_v44 = vmul.f32 %v3101_v15, %v2144_v7 }
 0x9bf   :  { %v2088_v56 = vpop.f32.mrf.mxu0 }
 0x9c0   :  { %v2171_v63 = vmul.f32 %v3100_v53, %v2088_v56  ;;  %v2198_v13 = vsel %vm143_vm2, %v2176_v44, 0.0 }
 0x9c2   :  { %v2192_v18 = vsel %vm143_vm2, %v2171_v63, 0.0 }
 0x9c3   :  { %v2193_v49 = vadd.f32 %v2192_v18, %v2191_v45 }
 0x9c5   :  { %v2147_v4 = vpop.f32.mrf.mxu1 }
 0x9c6   :  { %v2177_v38 = vmul.f32 %v3101_v15, %v2147_v4 }
 0x9c7   :  { %v2091_v9 = vpop.f32.mrf.mxu0 }
 0x9c8   :  { %v2172_v19 = vmul.f32 %v3102_v54, %v2091_v9  ;;  %v2205_v41 = vsel %vm143_vm2, %v2177_v38, 0.0  ;;  %v2926_v9 = vld [vmem:[%s4576_s11 + $0x1] ss:$0 sm:$0xff] }
 0x9ca   :  { %v2187_v46 = vsel %vm143_vm2, %v2172_v19, 0.0 }
 0x9cb   :  { %v2188_v17 = vadd.f32 %v2187_v46, %v2186_v47 }
 0x9cd   :  { %v2150_v43 = vpop.f32.mrf.mxu1 }
 0x9ce   :  { %v2178_v20 = vmul.f32 %v3100_v53, %v2150_v43 }
 0x9cf   :  { %v2094_v57 = vpop.f32.mrf.mxu0 }
 0x9d0   :  { %v2173_v12 = vmul.f32 %v3102_v54, %v2094_v57  ;;  %v2199_v11 = vsel %vm143_vm2, %v2178_v20, 0.0  ;;  %v2871_v20 = vld [vmem:[%s4577_s12 + $0x28] sm:$0xff] }
 0x9d1   :  { %v2200_v58 = vadd.f32 %v2199_v11, %v2198_v13 }
 0x9d2   :  { %v2194_v30 = vsel %vm143_vm2, %v2173_v12, 0.0 }
 0x9d3   :  { %v2195_v61 = vadd.f32 %v2194_v30, %v2193_v49 }
 0x9d5   :  { %v2153_v37 = vpop.f32.mrf.mxu1 }
 0x9d6   :  { %v2179_v14 = vmul.f32 %v3100_v53, %v2153_v37 }
 0x9d7   :  { %v2097_v40 = vpop.f32.mrf.mxu0 }
 0x9d8   :  { %v2174_v0 = vmul.f32 %v3103_v27, %v2097_v40  ;;  %v2206_v1 = vsel %vm143_vm2, %v2179_v14, 0.0 }
 0x9d9   :  { %v2207_v55 = vadd.f32 %v2206_v1, %v2205_v41  ;;  %v4421_v41 = vld [vmem:[%s4581_s16 + $0x1] ss:$0 sm:$0xff] }
 0x9da   :  { %v2189_v32 = vsel %vm143_vm2, %v2174_v0, 0.0 }
 0x9db   :  { %v2190_v3 = vadd.f32 %v2189_v32, %v2188_v17 }
 0x9dd   :  { %2864 = vmatmul.msk.f32.vlgmr.msrb.gmra.mxu2 %vm143_vm2, %v2190_v3  ;;  %v2156_v31 = vpop.f32.mrf.mxu1 }
 0x9de   :  { %v2180_v8 = vmul.f32 %v3102_v54, %v2156_v31 }
 0x9df   :  { %v2100_v51 = vpop.f32.mrf.mxu0 }
 0x9e0   :  { %v2175_v48 = vmul.f32 %v3103_v27, %v2100_v51  ;;  %v2201_v21 = vsel %vm143_vm2, %v2180_v8, 0.0  ;;  %v2870_v8 = vld [vmem:[%s4577_s12 + $0x20] sm:$0xff] }
 0x9e1   :  { %v2202_v24 = vadd.f32 %v2201_v21, %v2200_v58 }
 0x9e2   :  { %v2196_v34 = vsel %vm143_vm2, %v2175_v48, 0.0 }
 0x9e3   :  { %v2197_v50 = vadd.f32 %v2196_v34, %v2195_v61 }
 0x9e5   :  { %2865 = vmatmul.msk.f32.gmra.mxu2 %vm143_vm2, %v2197_v50  ;;  %v2159_v22 = vpop.f32.mrf.mxu1 }
 0x9e6   :  { %v2181_v62 = vmul.f32 %v3102_v54, %v2159_v22  ;;  %v2872_v22 = vld [vmem:[%s4577_s12 + $0x30] sm:$0xff] }
 0x9e8   :  { %v2208_v28 = vsel %vm143_vm2, %v2181_v62, 0.0 }
 0x9e9   :  { %v2209_v33 = vadd.f32 %v2208_v28, %v2207_v55 }
 0x9ed   :  { %v2162_v35 = vpop.f32.mrf.mxu1 }
 0x9ee   :  { %v2182_v36 = vmul.f32 %v3103_v27, %v2162_v35 }
 0x9f0   :  { %v2203_v39 = vsel %vm143_vm2, %v2182_v36, 0.0 }
 0x9f1   :  { %v2204_v26 = vadd.f32 %v2203_v39, %v2202_v24 }
 0x9f3   :  { %2866 = vmatmul.msk.f32.gmra.mxu2 %vm143_vm2, %v2204_v26 }
 0x9f5   :  { %v2165_v52 = vpop.f32.mrf.mxu1 }
 0x9f6   :  { %v2183_v2 = vmul.f32 %v3103_v27, %v2165_v52  ;;  %v2928_v52 = vld [vmem:[%s4582_s17 + $0x1] ss:$0 sm:$0xff] }
 0x9f8   :  { %v2210_v7 = vsel %vm143_vm2, %v2183_v2, 0.0 }
 0x9f9   :  { %v2211_v56 = vadd.f32 %v2210_v7, %v2209_v33 }
 0x9fb   :  { %2867 = vmatmul.msk.f32.gmra.mxu2 %vm143_vm2, %v2211_v56 }
 0xa60   :  { %v2251_v4 = vpop.f32.mrf.mxu2 }
 0xa61   :  { %v2252_v57 = vadd.f32 %v2926_v9, %v2251_v4 }
 0xa63   :  { %v2263_v43 = vadd.f32 %v2252_v57, %v3973_v42 }
 0xa65   :  { %v2271_v53 = vsel %vm143_vm2, %v2263_v43, 0.0 }
 0xa66   :  { %2272 = vadd.xlane.f32.xlu2 %v2271_v53 }
 0xa68   :  { %v2254_v5 = vpop.f32.mrf.mxu2 }
 0xa69   :  { %v2255_v15 = vadd.f32 %v2926_v9, %v2254_v5  ;;  %v2886_v5 = vld [vmem:[%s4579_s14 + $0x78] sm:$0xff] }
 0xa6a   :  { %2462 = vmatpush.msrb.mxu0 %v2886_v5 }
 0xa6b   :  { %v2264_v16 = vadd.f32 %v2255_v15, %v3983_v6  ;;  %v2885_v15 = vld [vmem:[%s4579_s14 + $0x70] sm:$0xff] }
 0xa6c   :  { %2463 = vmatpush.msrb.mxu0 %v2885_v15 }
 0xa6d   :  { %v2274_v54 = vsel %vm143_vm2, %v2264_v16, 0.0 }
 0xa6e   :  { %2275 = vadd.xlane.f32.xlu0 %v2274_v54 }
 0xa76   :  { %v2257_v19 = vpop.f32.mrf.mxu2 }
 0xa77   :  { %v2258_v59 = vadd.f32 %v2926_v9, %v2257_v19  ;;  %v2884_v19 = vld [vmem:[%s4579_s14 + $0x68] sm:$0xff] }
 0xa78   :  { %2464 = vmatpush.msrb.mxu0 %v2884_v19 }
 0xa79   :  { %v2265_v29 = vadd.f32 %v2258_v59, %v3992_v23  ;;  %v2873_v23 = vld [vmem:[%s4577_s12 + $0x38] sm:$0xff] }
 0xa7a   :  { %2407 = vmatpush.msrb.mxu3 %v2873_v23 }
 0xa7b   :  { %v2277_v46 = vsel %vm143_vm2, %v2265_v29, 0.0 }
 0xa7c   :  { %2278 = vadd.xlane.f32.xlu1 %v2277_v46  ;;  %2408 = vmatpush.msrb.mxu3 %v2872_v22 }
 0xa7e   :  { %v2260_v47 = vpop.f32.mrf.mxu2  ;;  %2409 = vmatpush.msrb.mxu3 %v2871_v20  ;;  %v2880_v20 = vld [vmem:[%s4579_s14 + $0x48] sm:$0xff] }
 0xa7f   :  { %v2261_v40 = vadd.f32 %v2926_v9, %v2260_v47  ;;  %v2883_v47 = vld [vmem:[%s4579_s14 + $0x60] sm:$0xff] }
 0xa80   :  { %2410 = vmatpush.msrb.mxu3 %v2870_v8  ;;  %2465 = vmatpush.msrb.mxu0 %v2883_v47 }
 0xa81   :  { %v2266_v42 = vadd.f32 %v2261_v40, %v4001_v25 }
 0xa83   :  { %v2280_v37 = vsel %vm143_vm2, %v2266_v42, 0.0 }
 0xa84   :  { %2281 = vadd.xlane.f32.xlu2 %v2280_v37 }
 0xad9   :  { %v2273_v63 = vpop.xlane.xlu2 %2272 }
 0xada   :  { %v2283_v6 = vmul.f32 %v2273_v63, %v3800_v60  ;;  %v2882_v63 = vld [vmem:[%s4579_s14 + $0x58] sm:$0xff] }
 0xadb   :  { %2466 = vmatpush.msrb.mxu0 %v2882_v63 }
 0xadc   :  { %v2287_v27 = vsub.f32 %v2263_v43, %v2283_v6 }
 0xade   :  { %v2291_v0 = vmul.f32 %v2287_v27, %v2287_v27 }
 0xae0   :  { %v2295_v17 = vsel %vm143_vm2, %v2291_v0, 0.0 }
 0xae1   :  { %2296 = vadd.xlane.f32.xlu0 %v2295_v17  ;;  %v2276_v10 = vpop.xlane.xlu0 %2275 }
 0xae2   :  { %v2284_v12 = vmul.f32 %v2276_v10, %v3800_v60 }
 0xae4   :  { %v4390_v25 = vsub.f32 %v2264_v16, %v2284_v12 }
 0xae6   :  { %v2292_v32 = vmul.f32 %v4390_v25, %v4390_v25 }
 0xae8   :  { %v2298_v3 = vsel %vm143_vm2, %v2292_v32, 0.0 }
 0xae9   :  { %2299 = vadd.xlane.f32.xlu1 %v2298_v3 }
 0xaef   :  { %v2279_v18 = vpop.xlane.xlu1 %2278 }
 0xaf0   :  { %v2285_v45 = vmul.f32 %v2279_v18, %v3800_v60 }
 0xaf2   :  { %v4396_v30 = vsub.f32 %v2265_v29, %v2285_v45 }
 0xaf4   :  { %v2293_v49 = vmul.f32 %v4396_v30, %v4396_v30 }
 0xaf6   :  { %v2301_v51 = vsel %vm143_vm2, %v2293_v49, 0.0 }
 0xaf7   :  { %v2282_v31 = vpop.xlane.xlu2 %2281  ;;  %2302 = vadd.xlane.f32.xlu2 %v2301_v51 }
 0xaf8   :  { %v2286_v48 = vmul.f32 %v2282_v31, %v3800_v60 }
 0xafa   :  { %v4402_v61 = vsub.f32 %v2266_v42, %v2286_v48 }
 0xafc   :  { %v2294_v34 = vmul.f32 %v4402_v61, %v4402_v61 }
 0xafe   :  { %v2304_v50 = vsel %vm143_vm2, %v2294_v34, 0.0 }
 0xaff   :  { %2305 = vadd.xlane.f32.xlu0 %v2304_v50 }
 0xb54   :  { %v2297_v44 = vpop.xlane.xlu0 %2296 }
 0xb55   :  { %v2307_v11 = vmul.f32 %v2297_v44, %v3800_v60  ;;  %v2879_v44 = vld [vmem:[%s4579_s14 + $0x40] sm:$0xff] }
 0xb57   :  { %v2311_v13 = vadd.f32 1e-05, %v2307_v11 }
 0xb59   :  { %3080 = vrsqrt.f32 %v2311_v13  ;;  %vm2321_vm9 = vweird.f32 %v2311_v13 }
 0xb5c   :  { %v2300_v21 = vpop.xlane.xlu1 %2299 }
 0xb5d   :  { %v2308_v58 = vmul.f32 %v2300_v21, %v3800_v60 }
 0xb5f   :  { %v3081_v35 = vpop.eup %3080  ;;  %v2312_v14 = vadd.f32 1e-05, %v2308_v58 }
 0xb60   :  { %v2316_v36 = vmul.f32 %v3081_v35, %v2311_v13  ;;  %vm2322_vm3 = vweird.f32 %v3081_v35 }
 0xb61   :  { %3082 = vrsqrt.f32 %v2312_v14  ;;  %vm2323_vm10 = vmor %vm2321_vm9, %vm2322_vm3  ;;  %vm2331_vm13 = vweird.f32 %v2312_v14 }
 0xb62   :  { %v2317_v24 = vmul.f32 %v3081_v35, %v2316_v36 }
 0xb64   :  { %v2318_v38 = vmul.f32 0.5, %v2317_v24 }
 0xb66   :  { %v2319_v62 = vsub.f32 1.5, %v2318_v38 }
 0xb67   :  { %v3083_v39 = vpop.eup %3082 }
 0xb68   :  { %v2320_v26 = vmul.f32 %v3081_v35, %v2319_v62  ;;  %v2326_v1 = vmul.f32 %v3083_v39, %v2312_v14  ;;  %vm2332_vm12 = vweird.f32 %v3083_v39 }
 0xb69   :  { %vm2333_vm14 = vmor %vm2331_vm13, %vm2332_vm12 }
 0xb6a   :  { %v2324_v28 = vsel %vm2323_vm10, %v3081_v35, %v2320_v26  ;;  %v2327_v55 = vmul.f32 %v3083_v39, %v2326_v1  ;;  %v2303_v7 = vpop.xlane.xlu2 %2302  ;;  %v2930_v26 = vld [vmem:[%s4580_s15 + $0x1] ss:$0 sm:$0xff] }
 0xb6b   :  { %v2355_v2 = vmul.f32 %v2324_v28, %v2287_v27  ;;  %v2309_v9 = vmul.f32 %v2303_v7, %v3800_v60 }
 0xb6c   :  { %v2328_v33 = vmul.f32 0.5, %v2327_v55 }
 0xb6d   :  { %v2362_v56 = vmul.f32 %v4421_v41, %v2355_v2  ;;  %v2313_v43 = vadd.f32 1e-05, %v2309_v9 }
 0xb6e   :  { %v2329_v4 = vsub.f32 1.5, %v2328_v33 }
 0xb6f   :  { %v4428_v57 = vadd.f32 %v2928_v52, %v2362_v56  ;;  %3084 = vrsqrt.f32 %v2313_v43  ;;  %vm2341_vm0 = vweird.f32 %v2313_v43 }
 0xb70   :  { %v2330_v53 = vmul.f32 %v3083_v39, %v2329_v4 }
 0xb71   :  { %2875 = vmatmul.msk.f32.vlgmr.msrb.gmra.mxu3 %vm143_vm2, %v4428_v57 }
 0xb72   :  { %v2334_v16 = vsel %vm2333_vm14, %v3083_v39, %v2330_v53  ;;  %v2306_v59 = vpop.xlane.xlu0 %2305 }
 0xb73   :  { %v2356_v54 = vmul.f32 %v2334_v16, %v4390_v25  ;;  %v2310_v29 = vmul.f32 %v2306_v59, %v3800_v60 }
 0xb75   :  { %v2363_v46 = vmul.f32 %v4421_v41, %v2356_v54  ;;  %v3085_v40 = vpop.eup %3084  ;;  %v2314_v42 = vadd.f32 1e-05, %v2310_v29 }
 0xb76   :  { %v2336_v6 = vmul.f32 %v3085_v40, %v2313_v43  ;;  %vm2342_vm15 = vweird.f32 %v3085_v40 }
 0xb77   :  { %v4447_v37 = vadd.f32 %v2928_v52, %v2363_v46  ;;  %3086 = vrsqrt.f32 %v2314_v42  ;;  %vm2343_vm1 = vmor %vm2341_vm0, %vm2342_vm15  ;;  %vm2351_vm5 = vweird.f32 %v2314_v42 }
 0xb78   :  { %v2337_v27 = vmul.f32 %v3085_v40, %v2336_v6 }
 0xb79   :  { %2876 = vmatmul.msk.f32.gmra.mxu3 %vm143_vm2, %v4447_v37 }
 0xb7a   :  { %v2338_v0 = vmul.f32 0.5, %v2337_v27 }
 0xb7c   :  { %v2339_v17 = vsub.f32 1.5, %v2338_v0 }
 0xb7d   :  { %v3087_v10 = vpop.eup %3086 }
 0xb7e   :  { %v2340_v23 = vmul.f32 %v3085_v40, %v2339_v17  ;;  %v2346_v12 = vmul.f32 %v3087_v10, %v2314_v42  ;;  %vm2352_vm4 = vweird.f32 %v3087_v10 }
 0xb7f   :  { %vm2353_vm6 = vmor %vm2351_vm5, %vm2352_vm4  ;;  %vm2704_vm4 = vcmask 7168   ;;  %vm2706_vm5 = vcmask 15360  }
 0xb80   :  { %v2344_v25 = vsel %vm2343_vm1, %v3085_v40, %v2340_v23  ;;  %v2347_v32 = vmul.f32 %v3087_v10, %v2346_v12 }
 0xb81   :  { %v2357_v3 = vmul.f32 %v2344_v25, %v4396_v30  ;;  %v2881_v30 = vld [vmem:[%s4579_s14 + $0x50] sm:$0xff] }
 0xb82   :  { %v2348_v18 = vmul.f32 0.5, %v2347_v32  ;;  %2467 = vmatpush.msrb.mxu0 %v2881_v30 }
 0xb83   :  { %v2364_v45 = vmul.f32 %v4421_v41, %v2357_v3 }
 0xb84   :  { %v2349_v49 = vsub.f32 1.5, %v2348_v18  ;;  %2468 = vmatpush.msrb.mxu0 %v2880_v20 }
 0xb85   :  { %v2371_v51 = vadd.f32 %v2928_v52, %v2364_v45 }
 0xb86   :  { %v2350_v31 = vmul.f32 %v3087_v10, %v2349_v49  ;;  %2469 = vmatpush.msrb.mxu0 %v2879_v44 }
 0xb87   :  { %2877 = vmatmul.msk.f32.gmra.mxu3 %vm143_vm2, %v2371_v51 }
 0xb88   :  { %v2354_v48 = vsel %vm2353_vm6, %v3087_v10, %v2350_v31  ;;  %vm2713_vm6 = vcmask 17408  }
 0xb89   :  { %v2358_v34 = vmul.f32 %v2354_v48, %v4402_v61  ;;  %v2929_v61 = vld [vmem:[%s4578_s13 + $0x1] ss:$0 sm:$0xff] }
 0xb8b   :  { %v2365_v50 = vmul.f32 %v4421_v41, %v2358_v34 }
 0xb8d   :  { %v2372_v22 = vadd.f32 %v2928_v52, %v2365_v50 }
 0xb8f   :  { %2878 = vmatmul.msk.f32.gmra.mxu3 %vm143_vm2, %v2372_v22 }
 0xbf4   :  { %v2412_v8 = vpop.f32.mrf.mxu3 }
 0xbf5   :  { %v2413_v11 = vadd.f32 %v2929_v61, %v2412_v8  ;;  %v4506_v8 = vld [vmem:[%s4583_s18 + $0x1] ss:$0 sm:$0xff] }
 0xbf7   :  { %v2424_v13 = vmax.f32 %v2413_v11, 0.0 }
 0xbf9   :  { %2888 = vmatmul.msk.f32.vlgmr.msrb.gmra.mxu0 %vm1217_vm11, %v2424_v13 }
 0xbfc   :  { %v2415_v21 = vpop.f32.mrf.mxu3 }
 0xbfd   :  { %v2416_v58 = vadd.f32 %v2929_v61, %v2415_v21 }
 0xbff   :  { %v2425_v35 = vmax.f32 %v2416_v58, 0.0  ;;  %v4511_v58 = vld [vmem:[%s4584_s19 + $0x1] ss:$0 sm:$0xff] }
 0xc01   :  { %2889 = vmatmul.msk.f32.gmra.mxu0 %vm1217_vm11, %v2425_v35 }
 0xc0a   :  { %v2418_v14 = vpop.f32.mrf.mxu3 }
 0xc0b   :  { %v2419_v36 = vadd.f32 %v2929_v61, %v2418_v14 }
 0xc0d   :  { %v2426_v24 = vmax.f32 %v2419_v36, 0.0 }
 0xc0f   :  { %2890 = vmatmul.msk.f32.gmra.mxu0 %vm1217_vm11, %v2426_v24 }
 0xc12   :  { %v2421_v38 = vpop.f32.mrf.mxu3 }
 0xc13   :  { %v2422_v62 = vadd.f32 %v2929_v61, %v2421_v38 }
 0xc15   :  { %v2427_v39 = vmax.f32 %v2422_v62, 0.0  ;;  %v2894_v62 = vld [vmem:[%s4585_s20 + $0x10] sm:$0xff] }
 0xc17   :  { %2891 = vmatmul.msk.f32.gmra.mxu0 %vm1217_vm11, %v2427_v39  ;;  %v2593_v39 = vld [vmem:[%s4585_s20] sm:$0xff] }
 0xc76   :  { %v2471_v1 = vpop.f32.mrf.mxu0 }
 0xc77   :  { %v2472_v41 = vadd.f32 %v2930_v26, %v2471_v1 }
 0xc79   :  { %v2483_v28 = vadd.f32 %v2472_v41, %v4428_v57  ;;  %v4525_v41 = vld [vmem:[%s4585_s20 + $0x20] sm:$0xff] }
 0xc7b   :  { %v2491_v55 = vsel %vm143_vm2, %v2483_v28, 0.0 }
 0xc7c   :  { %2492 = vadd.xlane.f32.xlu1 %v2491_v55 }
 0xc7e   :  { %v2474_v52 = vpop.f32.mrf.mxu0 }
 0xc7f   :  { %v2475_v2 = vadd.f32 %v2930_v26, %v2474_v52 }
 0xc81   :  { %v2484_v33 = vadd.f32 %v2475_v2, %v4447_v37 }
 0xc83   :  { %v2494_v7 = vsel %vm143_vm2, %v2484_v33, 0.0 }
 0xc84   :  { %2495 = vadd.xlane.f32.xlu2 %v2494_v7 }
 0xc8c   :  { %v2477_v56 = vpop.f32.mrf.mxu0 }
 0xc8d   :  { %v2478_v9 = vadd.f32 %v2930_v26, %v2477_v56 }
 0xc8f   :  { %v2485_v4 = vadd.f32 %v2478_v9, %v2371_v51 }
 0xc91   :  { %v2497_v43 = vsel %vm143_vm2, %v2485_v4, 0.0 }
 0xc92   :  { %2498 = vadd.xlane.f32.xlu0 %v2497_v43 }
 0xc94   :  { %v2480_v53 = vpop.f32.mrf.mxu0 }
 0xc95   :  { %v2481_v5 = vadd.f32 %v2930_v26, %v2480_v53 }
 0xc97   :  { %v2486_v15 = vadd.f32 %v2481_v5, %v2372_v22 }
 0xc99   :  { %v2500_v57 = vsel %vm143_vm2, %v2486_v15, 0.0 }
 0xc9a   :  { %2501 = vadd.xlane.f32.xlu1 %v2500_v57  ;;  %v2895_v57 = vld [vmem:[%s4585_s20 + $0x18] sm:$0xff] }
 0xcef   :  { %v2493_v16 = vpop.xlane.xlu1 %2492 }
 0xcf0   :  { %v2503_v54 = vmul.f32 %v2493_v16, %v3800_v60 }
 0xcf2   :  { %v2507_v19 = vsub.f32 %v2483_v28, %v2503_v54 }
 0xcf4   :  { %v2511_v59 = vmul.f32 %v2507_v19, %v2507_v19 }
 0xcf6   :  { %v2515_v29 = vsel %vm143_vm2, %v2511_v59, 0.0 }
 0xcf7   :  { %v2496_v46 = vpop.xlane.xlu2 %2495  ;;  %2516 = vadd.xlane.f32.xlu2 %v2515_v29 }
 0xcf8   :  { %v2504_v47 = vmul.f32 %v2496_v46, %v3800_v60 }
 0xcfa   :  { %v2508_v40 = vsub.f32 %v2484_v33, %v2504_v47 }
 0xcfc   :  { %v2512_v42 = vmul.f32 %v2508_v40, %v2508_v40 }
 0xcfe   :  { %v2518_v37 = vsel %vm143_vm2, %v2512_v42, 0.0 }
 0xcff   :  { %2519 = vadd.xlane.f32.xlu0 %v2518_v37 }
 0xd05   :  { %v2499_v63 = vpop.xlane.xlu0 %2498 }
 0xd06   :  { %v2505_v6 = vmul.f32 %v2499_v63, %v3800_v60 }
 0xd08   :  { %v4490_v27 = vsub.f32 %v2485_v4, %v2505_v6 }
 0xd0a   :  { %v2513_v0 = vmul.f32 %v4490_v27, %v4490_v27 }
 0xd0c   :  { %v2521_v17 = vsel %vm143_vm2, %v2513_v0, 0.0 }
 0xd0d   :  { %2522 = vadd.xlane.f32.xlu1 %v2521_v17  ;;  %v2502_v10 = vpop.xlane.xlu1 %2501 }
 0xd0e   :  { %v2506_v23 = vmul.f32 %v2502_v10, %v3800_v60 }
 0xd10   :  { %v4496_v12 = vsub.f32 %v2486_v15, %v2506_v23  ;;  %v2594_v15 = vld [vmem:[%s4585_s20 + $0x8] sm:$0xff] }
 0xd12   :  { %v2514_v25 = vmul.f32 %v4496_v12, %v4496_v12 }
 0xd14   :  { %v2524_v32 = vsel %vm143_vm2, %v2514_v25, 0.0 }
 0xd15   :  { %2525 = vadd.xlane.f32.xlu2 %v2524_v32 }
 0xd6a   :  { %v2517_v3 = vpop.xlane.xlu2 %2516 }
 0xd6b   :  { %v2527_v18 = vmul.f32 %v2517_v3, %v3800_v60 }
 0xd6d   :  { %v2531_v45 = vadd.f32 1e-05, %v2527_v18 }
 0xd6f   :  { %3088 = vrsqrt.f32 %v2531_v45  ;;  %vm2541_vm7 = vweird.f32 %v2531_v45 }
 0xd72   :  { %v2520_v49 = vpop.xlane.xlu0 %2519 }
 0xd73   :  { %v2528_v51 = vmul.f32 %v2520_v49, %v3800_v60 }
 0xd75   :  { %v3089_v31 = vpop.eup %3088  ;;  %v2532_v48 = vadd.f32 1e-05, %v2528_v51 }
 0xd76   :  { %v2536_v34 = vmul.f32 %v3089_v31, %v2531_v45  ;;  %vm2542_vm11 = vweird.f32 %v3089_v31 }
 0xd77   :  { %3090 = vrsqrt.f32 %v2532_v48  ;;  %vm2543_vm8 = vmor %vm2541_vm7, %vm2542_vm11  ;;  %vm2551_vm9 = vweird.f32 %v2532_v48 }
 0xd78   :  { %v2537_v50 = vmul.f32 %v3089_v31, %v2536_v34 }
 0xd7a   :  { %v2538_v22 = vmul.f32 0.5, %v2537_v50 }
 0xd7c   :  { %v2539_v30 = vsub.f32 1.5, %v2538_v22 }
 0xd7d   :  { %v3091_v20 = vpop.eup %3090 }
 0xd7e   :  { %v2540_v44 = vmul.f32 %v3089_v31, %v2539_v30  ;;  %v2546_v61 = vmul.f32 %v3091_v20, %v2532_v48  ;;  %vm2552_vm3 = vweird.f32 %v3091_v20  ;;  %v2897_v30 = vld [vmem:[%s4585_s20 + $0x28] sm:$0xff] }
 0xd7f   :  { %vm2553_vm10 = vmor %vm2551_vm9, %vm2552_vm3 }
 0xd80   :  { %v2544_v11 = vsel %vm2543_vm8, %v3089_v31, %v2540_v44  ;;  %v2547_v13 = vmul.f32 %v3091_v20, %v2546_v61  ;;  %v2523_v14 = vpop.xlane.xlu1 %2522 }
 0xd81   :  { %v2575_v21 = vmul.f32 %v2544_v11, %v2507_v19  ;;  %v2529_v36 = vmul.f32 %v2523_v14, %v3800_v60 }
 0xd82   :  { %v2548_v35 = vmul.f32 0.5, %v2547_v13 }
 0xd83   :  { %v2582_v24 = vmul.f32 %v4506_v8, %v2575_v21  ;;  %v2533_v26 = vadd.f32 1e-05, %v2529_v36 }
 0xd84   :  { %v2549_v38 = vsub.f32 1.5, %v2548_v35 }
 0xd85   :  { %v2589_v1 = vadd.f32 %v4511_v58, %v2582_v24  ;;  %3092 = vrsqrt.f32 %v2533_v26  ;;  %vm2561_vm13 = vweird.f32 %v2533_v26 }
 0xd86   :  { %v2550_v28 = vmul.f32 %v3091_v20, %v2549_v38 }
 0xd87   :  { %v2628_v55 = vmul.f32 %v2894_v62, %v2589_v1  ;;  %v2595_v52 = vmul.f32 %v2593_v39, %v2589_v1  ;;  %v2661_v33 = vmul.f32 %v4525_v41, %v2589_v1 }
 0xd88   :  { %v2554_v2 = vsel %vm2553_vm10, %v3091_v20, %v2550_v28  ;;  %v2526_v43 = vpop.xlane.xlu2 %2525 }
 0xd89   :  { %v2576_v7 = vmul.f32 %v2554_v2, %v2508_v40  ;;  %v2632_v56 = vsel %vm143_vm2, %v2628_v55, 0.0  ;;  %v2599_v9 = vsel %vm143_vm2, %v2595_v52, 0.0  ;;  %v2665_v4 = vsel %vm143_vm2, %v2661_v33, 0.0 }
 0xd8a   :  { %2633 = vadd.xlane.f32.xlu1 %v2632_v56  ;;  %2600 = vadd.xlane.f32.xlu0 %v2599_v9  ;;  %v2530_v53 = vmul.f32 %v2526_v43, %v3800_v60 }
 0xd8b   :  { %2666 = vadd.xlane.f32.xlu2 %v2665_v4  ;;  %v2583_v5 = vmul.f32 %v4506_v8, %v2576_v7  ;;  %v3093_v16 = vpop.eup %3092 }
 0xd8c   :  { %v2534_v54 = vadd.f32 1e-05, %v2530_v53  ;;  %v2556_v59 = vmul.f32 %v3093_v16, %v2533_v26  ;;  %vm2562_vm12 = vweird.f32 %v3093_v16 }
 0xd8d   :  { %v2590_v19 = vadd.f32 %v4511_v58, %v2583_v5  ;;  %vm2563_vm14 = vmor %vm2561_vm13, %vm2562_vm12 }
 0xd8e   :  { %3094 = vrsqrt.f32 %v2534_v54  ;;  %v2557_v47 = vmul.f32 %v3093_v16, %v2556_v59  ;;  %vm2571_vm0 = vweird.f32 %v2534_v54 }
 0xd8f   :  { %v2596_v29 = vmul.f32 %v2594_v15, %v2590_v19  ;;  %v2629_v46 = vmul.f32 %v2895_v57, %v2590_v19  ;;  %v2662_v21 = vmul.f32 %v2897_v30, %v2590_v19 }
 0xd90   :  { %v2558_v42 = vmul.f32 0.5, %v2557_v47 }
 0xd91   :  { %v2602_v60 = vsel %vm143_vm2, %v2596_v29, 0.0  ;;  %v2635_v40 = vsel %vm143_vm2, %v2629_v46, 0.0  ;;  %v2668_v35 = vsel %vm143_vm2, %v2662_v21, 0.0 }
 0xd92   :  { %2603 = vadd.xlane.f32.xlu1 %v2602_v60  ;;  %v2559_v37 = vsub.f32 1.5, %v2558_v42 }
 0xd93   :  { %2636 = vadd.xlane.f32.xlu2 %v2635_v40 }
 0xd94   :  { %v3095_v63 = vpop.eup %3094  ;;  %v2560_v6 = vmul.f32 %v3093_v16, %v2559_v37 }
 0xd95   :  { %v2566_v0 = vmul.f32 %v3095_v63, %v2534_v54  ;;  %vm2572_vm15 = vweird.f32 %v3095_v63 }
 0xd96   :  { %v2564_v17 = vsel %vm2563_vm14, %v3093_v16, %v2560_v6  ;;  %vm2573_vm1 = vmor %vm2571_vm0, %vm2572_vm15 }
 0xd97   :  { %v2567_v10 = vmul.f32 %v3095_v63, %v2566_v0  ;;  %v2577_v23 = vmul.f32 %v2564_v17, %v4490_v27 }
 0xd99   :  { %v2568_v25 = vmul.f32 0.5, %v2567_v10  ;;  %v2584_v32 = vmul.f32 %v4506_v8, %v2577_v23 }
 0xd9b   :  { %v2569_v3 = vsub.f32 1.5, %v2568_v25  ;;  %v2591_v18 = vadd.f32 %v4511_v58, %v2584_v32 }
 0xd9d   :  { %v2570_v45 = vmul.f32 %v3095_v63, %v2569_v3  ;;  %v2630_v49 = vmul.f32 %v2894_v62, %v2591_v18  ;;  %v2597_v51 = vmul.f32 %v2593_v39, %v2591_v18 }
 0xd9f   :  { %v2574_v31 = vsel %vm2573_vm1, %v3095_v63, %v2570_v45  ;;  %v2638_v34 = vsel %vm143_vm2, %v2630_v49, 0.0  ;;  %v2605_v50 = vsel %vm143_vm2, %v2597_v51, 0.0 }
 0xda0   :  { %v2578_v48 = vmul.f32 %v2574_v31, %v4496_v12  ;;  %2639 = vadd.xlane.f32.xlu0 %v2638_v34  ;;  %2606 = vadd.xlane.f32.xlu2 %v2605_v50 }
 0xda2   :  { %v2585_v27 = vmul.f32 %v4506_v8, %v2578_v48  ;;  %v2663_v8 = vmul.f32 %v4525_v41, %v2591_v18 }
 0xda4   :  { %v2592_v22 = vadd.f32 %v4511_v58, %v2585_v27  ;;  %v2671_v58 = vsel %vm143_vm2, %v2663_v8, 0.0 }
 0xda6   :  { %v2631_v20 = vmul.f32 %v2895_v57, %v2592_v22  ;;  %v2598_v44 = vmul.f32 %v2594_v15, %v2592_v22  ;;  %v2664_v61 = vmul.f32 %v2897_v30, %v2592_v22 }
 0xda8   :  { %v2641_v11 = vsel %vm143_vm2, %v2631_v20, 0.0  ;;  %v2608_v12 = vsel %vm143_vm2, %v2598_v44, 0.0  ;;  %v2674_v13 = vsel %vm143_vm2, %v2664_v61, 0.0  ;;  %vm2693_vm2 = vcmask 1041409   ;;  %v2933_v61 = vld [vmem:[%s4586_s21] ss:$0 sm:$0xff] }
 0xda9   :  { %2642 = vadd.xlane.f32.xlu1 %v2641_v11  ;;  %2609 = vadd.xlane.f32.xlu0 %v2608_v12 }
 0xdaa   :  { %2675 = vadd.xlane.f32.xlu2 %v2674_v13 }
 0xdb1   :  { %2672 = vadd.xlane.f32.xlu1 %v2671_v58  ;;  %2669 = vadd.xlane.f32.xlu0 %v2668_v35 }
 0xdfd   :  { %v2634_v36 = vpop.xlane.xlu1 %2633  ;;  %v2601_v24 = vpop.xlane.xlu0 %2600 }
 0xdfe   :  { %v2667_v14 = vpop.xlane.xlu2 %2666 }
 0xe05   :  { %v2604_v62 = vpop.xlane.xlu1 %2603 }
 0xe06   :  { %v2637_v38 = vpop.xlane.xlu2 %2636  ;;  %v2611_v1 = vadd.f32 %v2604_v62, %v2601_v24 }
 0xe07   :  { %v2644_v26 = vadd.f32 %v2637_v38, %v2634_v36 }
 0xe08   :  { %v2612_v52 = vrot.slane %v2611_v1, 4 }
 0xe09   :  { %v2645_v55 = vrot.slane %v2644_v26, 4 }
 0xe0a   :  { %v2613_v9 = vadd.f32 %v2612_v52, %v2611_v1 }
 0xe0b   :  { %v2646_v56 = vadd.f32 %v2645_v55, %v2644_v26 }
 0xe0c   :  { %v2614_v57 = vrot.slane %v2613_v9, 2 }
 0xe0d   :  { %v2647_v15 = vrot.slane %v2646_v56, 2 }
 0xe0e   :  { %v2615_v37 = vadd.f32 %v2614_v57, %v2613_v9 }
 0xe0f   :  { %v2648_v42 = vadd.f32 %v2647_v15, %v2646_v56 }
 0xe10   :  { %v2616_v32 = vrot.slane %v2615_v37, 1 }
 0xe11   :  { %v2649_v25 = vrot.slane %v2648_v42, 1 }
 0xe12   :  { %v2617_v34 = vadd.f32 %v2616_v32, %v2615_v37 }
 0xe13   :  { %v2640_v39 = vpop.xlane.xlu0 %2639  ;;  %v2607_v28 = vpop.xlane.xlu2 %2606  ;;  %v2650_v48 = vadd.f32 %v2649_v25, %v2648_v42 }
 0xe1c   :  { %v2610_v2 = vpop.xlane.xlu0 %2609  ;;  %v2643_v41 = vpop.xlane.xlu1 %2642 }
 0xe1d   :  { %v2618_v33 = vadd.f32 %v2610_v2, %v2607_v28  ;;  %v2651_v7 = vadd.f32 %v2643_v41, %v2640_v39  ;;  %v2676_v54 = vpop.xlane.xlu2 %2675 }
 0xe1f   :  { %v2619_v4 = vrot.slane %v2618_v33, 4  ;;  %v2652_v43 = vrot.slane %v2651_v7, 4 }
 0xe21   :  { %v2620_v53 = vadd.f32 %v2619_v4, %v2618_v33  ;;  %v2653_v5 = vadd.f32 %v2652_v43, %v2651_v7 }
 0xe23   :  { %v2621_v16 = vrot.slane %v2620_v53, 2  ;;  %v2654_v19 = vrot.slane %v2653_v5, 2 }
 0xe24   :  { %v2670_v59 = vpop.xlane.xlu0 %2669  ;;  %v2673_v29 = vpop.xlane.xlu1 %2672 }
 0xe25   :  { %v2622_v46 = vadd.f32 %v2621_v16, %v2620_v53  ;;  %v2655_v47 = vadd.f32 %v2654_v19, %v2653_v5  ;;  %v2677_v60 = vadd.f32 %v2670_v59, %v2667_v14  ;;  %v2684_v40 = vadd.f32 %v2676_v54, %v2673_v29 }
 0xe27   :  { %v2678_v63 = vrot.slane %v2677_v60, 4  ;;  %v2685_v6 = vrot.slane %v2684_v40, 4  ;;  %v2623_v0 = vrot.slane %v2622_v46, 1  ;;  %v2656_v17 = vrot.slane %v2655_v47, 1 }
 0xe29   :  { %v2679_v10 = vadd.f32 %v2678_v63, %v2677_v60  ;;  %v2686_v23 = vadd.f32 %v2685_v6, %v2684_v40  ;;  %v2624_v45 = vadd.f32 %v2623_v0, %v2622_v46  ;;  %v2657_v49 = vadd.f32 %v2656_v17, %v2655_v47 }
 0xe2b   :  { %v2680_v3 = vrot.slane %v2679_v10, 2  ;;  %v2687_v18 = vrot.slane %v2686_v23, 2  ;;  %v2694_v22 = vsel %vm2693_vm2, %v2624_v45, %v2617_v34  ;;  %v2698_v30 = vsel %vm2693_vm2, %v2657_v49, %v2650_v48 }
 0xe2c   :  { %v2705_v12 = vsel %vm2704_vm4, %v2694_v22, %v2698_v30 }
 0xe2d   :  { %v2681_v51 = vadd.f32 %v2680_v3, %v2679_v10  ;;  %v2688_v31 = vadd.f32 %v2687_v18, %v2686_v23 }
 0xe2f   :  { %v2682_v50 = vrot.slane %v2681_v51, 1  ;;  %v2689_v27 = vrot.slane %v2688_v31, 1 }
 0xe31   :  { %v2683_v20 = vadd.f32 %v2682_v50, %v2681_v51  ;;  %v2690_v44 = vadd.f32 %v2689_v27, %v2688_v31 }
 0xe33   :  { %v2702_v11 = vsel %vm2693_vm2, %v2690_v44, %v2683_v20 }
 0xe34   :  { %v2707_v13 = vsel %vm2706_vm5, %v2705_v12, %v2702_v11 }
 0xe35   :  { %v2712_v8 = vadd.f32 %v2933_v61, %v2707_v13 }
 0xe37   :  { %2714 = vst.msk [vmem:[#allocation2] sm:$0x3] %vm2713_vm6, %v2712_v8 }
 0xe38   :  { %2725 = dma.vmem_to_hbm [thread:$0]  %s2721_s27, 32, %s2723_s7, [#allocation3]  }
 0xe39   :  { %3128 = dma.done.wait [#allocation3], 32  }
 0xe3a   :  { %3129 = vsyncadd [#allocation3], 4294967264 }
 0xe3b   :  { %2730 = vsyncpa [#allocation3], 1 }

</bundles_post_ra>
